<compile_context>
chip_gen: v7x
topology: tpu7x:2x2x1
jax: 0.10.0
libtpu: 0.0.40
codegen_flags: <defaults>
</compile_context>

<pallas_src>
import functools

import jax
import jax.numpy as jnp
from jax.experimental import pallas as pl
from jax.experimental.pallas import tpu as pltpu  # noqa: F401  (TPU backend assumed)

F32 = jnp.float32
BF16 = jnp.bfloat16
CP = 8       # padded xyz-component axis (x, y, z, 0, 0, 0, 0, 0)
LANE = 128
SUB = 8


# ----------------------------------------------------------------------------- helpers
def _round_up(x, m):
    return (x + m - 1) // m * m


def _full_spec(shape):
    return pl.BlockSpec(shape, lambda: (0,) * len(shape))


def _call_full(kernel, out_shapes, *args):
    out_shapes = tuple(out_shapes)
    return pl.pallas_call(
        kernel,
        out_shape=out_shapes,
        in_specs=[_full_spec(a.shape) for a in args],
        out_specs=tuple(_full_spec(s.shape) for s in out_shapes),
    )(*args)


def _silu(z):
    return z * jax.nn.sigmoid(z)


def _cross_cm(a, b):
    """Cross product of two (>=3, E) component-major stacks -> (3, E)."""
    c0 = a[1:2] * b[2:3] - a[2:3] * b[1:2]
    c1 = a[2:3] * b[0:1] - a[0:1] * b[2:3]
    c2 = a[0:1] * b[1:2] - a[1:2] * b[0:1]
    return jnp.concatenate([c0, c1, c2], axis=0)


def _local_frame(xi, xj):
    """radial (1,E) + orthogonal basis dn/cn/vt (3,E) from (CP,E) coordinates."""
    diff = xi - xj
    radial = jnp.sum(diff * diff, axis=0, keepdims=True)
    crs = _cross_cm(xi, xj)
    dn = diff[0:3] * pl.reciprocal(jnp.sqrt(radial) + 1.0, approx=True)
    cn = crs * pl.reciprocal(
        jnp.sqrt(jnp.sum(crs * crs, axis=0, keepdims=True)) + 1.0, approx=True)
    vt = _cross_cm(dn, cn)
    return radial, dn, cn, vt


# -------------------------------------------------------------------- fused setup kernel
def _setup_kernel(hin_ref, embWt_ref, embb_ref,
                  x_ref, v_ref, growT_ref, gcolT_ref,
                  gx_ref, gmean_ref, gstd_ref,
                  wf0t_ref, bf0_ref, wf1t_ref, bf1_ref,
                  h_out, ef_out):
    # node embedding:  h_T = emb_W^T @ h_in^T + b                  (Hp, Np)
    h_out[...] = (jnp.dot(embWt_ref[...], hin_ref[...].astype(BF16),
                          preferred_element_type=F32) + embb_ref[...])

    x, v = x_ref[...], v_ref[...]
    growT, gcolT = growT_ref[...], gcolT_ref[...]
    # per-edge gathers as one-hot MXU matmuls (f32 for geometry accuracy)
    xi = jnp.dot(x, growT, preferred_element_type=F32)             # (CP, Ep)
    xj = jnp.dot(x, gcolT, preferred_element_type=F32)
    vi = jnp.dot(v, growT, preferred_element_type=F32)
    vj = jnp.dot(v, gcolT, preferred_element_type=F32)

    _, dn, cn, vt = _local_frame(xi, xj)

    def proj(vec):                                                 # edge_basis @ vec
        return jnp.concatenate([
            jnp.sum(dn * vec, axis=0, keepdims=True),
            jnp.sum(cn * vec, axis=0, keepdims=True),
            jnp.sum(vt * vec, axis=0, keepdims=True)], axis=0)     # (3, Ep)

    ci, cj = proj(xi[0:3]), proj(xj[0:3])
    wi, wj = proj(vi[0:3]), proj(vj[0:3])
    ni = jnp.sqrt(jnp.sum(ci * ci, axis=0, keepdims=True))
    nj = jnp.sqrt(jnp.sum(cj * cj, axis=0, keepdims=True))
    pcos = jnp.sum(ci * cj, axis=0, keepdims=True) * pl.reciprocal(
        (ni + 1e-5) * (nj + 1e-5), approx=True)
    psin = jnp.sqrt(jnp.maximum(1.0 - pcos * pcos, 0.0))           # clamp: no NaN
    feat = jnp.concatenate([psin, pcos, ci, cj, wi, wj], axis=0)   # (14, Ep)

    # fuse-edge MLP (weights resident, bf16 MXU, f32 accumulation)
    ef = jnp.dot(wf0t_ref[...], feat.astype(BF16), preferred_element_type=F32)
    ef = _silu(ef + bf0_ref[...])
    ef = jnp.dot(wf1t_ref[...], ef.astype(BF16), preferred_element_type=F32)
    ef = _silu(ef + bf1_ref[...])

    # Gaussian-basis edge embedding, computed and added in-register
    std = jnp.abs(gstd_ref[...]) + 1e-5                            # (Kp, 1)
    inv_std = pl.reciprocal(std, approx=True)
    z = (gx_ref[...] - gmean_ref[...]) * inv_std                   # (Kp, Ep)
    gauss = jnp.exp(-0.5 * z * z) * (inv_std * 0.3989422804014327)  # 1/sqrt(2*pi)
    ef_out[...] = ef + gauss


# ------------------------------------------------------------------ fused Clof_GCL layer
def _gcl_kernel(h_ref, x_ref, v_ref, ef_ref, growT_ref, gcolT_ref, segT_ref, invc_ref,
                we0hi_ref, we0hj_ref, we0rad_ref, we0att_ref, be0_ref,
                we1_ref, be1_ref,
                wc0_ref, bc0_ref, wc1_ref,
                wv0_ref, bv0_ref, wv1_ref, bv1_ref,
                wn0h_ref, wn0a_ref, bn0_ref, wn1_ref, bn1_ref,
                h_out, x_out, *, coords_weight):
    h = h_ref[...]                     # (Hp, Np)
    x = x_ref[...]                     # (CP, Np)
    v = v_ref[...]                     # (CP, Np)
    growT, gcolT = growT_ref[...], gcolT_ref[...]
    segT = segT_ref[...]               # (Ep, Np)
    hb = h.astype(BF16)

    # in-kernel gathers (one-hot MXU matmuls), h stays resident in VMEM
    hi = jnp.dot(hb, growT.astype(BF16), preferred_element_type=F32)   # (Hp, Ep)
    hj = jnp.dot(hb, gcolT.astype(BF16), preferred_element_type=F32)
    xi = jnp.dot(x, growT, preferred_element_type=F32)                 # (CP, Ep)
    xj = jnp.dot(x, gcolT, preferred_element_type=F32)

    radial, dn, cn, vt = _local_frame(xi, xj)

    # ---- edge MLP (split-weight form: no concat materialized) ----
    pre = (jnp.dot(we0hi_ref[...], hi.astype(BF16), preferred_element_type=F32)
           + jnp.dot(we0hj_ref[...], hj.astype(BF16), preferred_element_type=F32)
           + jnp.dot(we0att_ref[...], ef_ref[...].astype(BF16),
                     preferred_element_type=F32)
           + we0rad_ref[...] * radial
           + be0_ref[...])
    m = _silu(pre)
    m = _silu(jnp.dot(we1_ref[...], m.astype(BF16), preferred_element_type=F32)
              + be1_ref[...])
    mb = m.astype(BF16)

    # ---- coordinate MLP -> 3 local-frame coefficients per edge ----
    c = _silu(jnp.dot(wc0_ref[...], mb, preferred_element_type=F32) + bc0_ref[...])
    coff = jnp.dot(wc1_ref[...], c.astype(BF16), preferred_element_type=F32)  # (CP, Ep)
    trans = dn * coff[0:1] + cn * coff[1:2] + vt * coff[2:3]                   # (3, Ep)
    trans = jnp.clip(trans, -100.0, 100.0)
    trans = jnp.concatenate(
        [trans, jnp.zeros((CP - 3, trans.shape[1]), F32)], axis=0)             # (CP, Ep)
    agg_x = jnp.dot(trans, segT, preferred_element_type=F32) * invc_ref[...]   # seg mean

    # ---- velocity branch (cvel1 weight row replicated across CP rows at pack time) ----
    hv = _silu(jnp.dot(wv0_ref[...], hb, preferred_element_type=F32) + bv0_ref[...])
    cv = jnp.dot(wv1_ref[...], hv.astype(BF16), preferred_element_type=F32) + bv1_ref[...]
    x_out[...] = x + agg_x * coords_weight + cv * v

    # ---- node MLP (segment sum via one-hot matmul) + residual ----
    aggh = jnp.dot(mb, segT.astype(BF16), preferred_element_type=F32)          # (Hp, Np)
    npre = (jnp.dot(wn0h_ref[...], hb, preferred_element_type=F32)
            + jnp.dot(wn0a_ref[...], aggh.astype(BF16), preferred_element_type=F32)
            + bn0_ref[...])
    nh = _silu(npre)
    h_out[...] = h + (jnp.dot(wn1_ref[...], nh.astype(BF16),
                              preferred_element_type=F32) + bn1_ref[...])


# ---------------------------------------------------------------- Gram-matrix cdist
def _cdist_kernel(xr_ref, xc_ref, o_ref):
    xr = xr_ref[...]                   # (Np, CP)
    xc = xc_ref[...]                   # (CP, Np)
    g = jnp.dot(xr, xc, preferred_element_type=F32)
    sq_r = jnp.sum(xr * xr, axis=1, keepdims=True)
    sq_c = jnp.sum(xc * xc, axis=0, keepdims=True)
    d2 = jnp.maximum(sq_r + sq_c - 2.0 * g, 0.0)                   # clamp: no NaN
    o_ref[...] = jnp.sqrt(d2)


# -------------------------------------------------------------------------- parameters
def init_params(key, in_node_nf, hidden_nf, n_layers, edge_types=8):
    K = hidden_nf // 2
    keys = iter(jax.random.split(key, 8 + 8 * n_layers))

    def lin(k, fan_in, fan_out):
        k1, k2 = jax.random.split(k)
        s = 1.0 / jnp.sqrt(fan_in)
        W = jax.random.uniform(k1, (fan_in, fan_out), minval=-s, maxval=s)
        b = jax.random.uniform(k2, (fan_out,), minval=-s, maxval=s)
        return W.astype(F32), b.astype(F32)

    p = {}
    p["emb_W"], p["emb_b"] = lin(next(keys), in_node_nf, hidden_nf)
    p["gbf_means"] = jax.random.uniform(next(keys), (K,), minval=0.0, maxval=3.0)
    p["gbf_stds"] = jax.random.uniform(next(keys), (K,), minval=0.0, maxval=3.0)
    p["gbf_mul"] = jnp.ones((edge_types, 1), F32)
    p["gbf_bias"] = jnp.zeros((edge_types, 1), F32)
    p["fuse0_W"], p["fuse0_b"] = lin(next(keys), 14, K)
    p["fuse1_W"], p["fuse1_b"] = lin(next(keys), K, K)

    layers = []
    edge_in = 2 * hidden_nf + 1 + K
    for _ in range(n_layers):
        lp = {}
        lp["edge0_W"], lp["edge0_b"] = lin(next(keys), edge_in, hidden_nf)
        lp["edge1_W"], lp["edge1_b"] = lin(next(keys), hidden_nf, hidden_nf)
        lp["node0_W"], lp["node0_b"] = lin(next(keys), 2 * hidden_nf, hidden_nf)
        lp["node1_W"], lp["node1_b"] = lin(next(keys), hidden_nf, hidden_nf)
        lp["coord0_W"], lp["coord0_b"] = lin(next(keys), hidden_nf, hidden_nf)
        lim = 0.001 * jnp.sqrt(6.0 / (hidden_nf + 3))   # xavier_uniform, gain=0.001
        lp["coord1_W"] = jax.random.uniform(next(keys), (hidden_nf, 3),
                                            minval=-lim, maxval=lim).astype(F32)
        lp["cvel0_W"], lp["cvel0_b"] = lin(next(keys), hidden_nf, hidden_nf)
        lp["cvel1_W"], lp["cvel1_b"] = lin(next(keys), hidden_nf, 1)
        layers.append(lp)
    p["layers"] = layers
    return p


def _padded(a, shape, dtype, fill=0.0):
    a = jnp.asarray(a, F32)
    out = jnp.full(shape, fill, F32)
    out = out.at[tuple(slice(0, s) for s in a.shape)].set(a)
    return out.astype(dtype)


def pack_params(p, in_node_nf, hidden_nf):
    """Transpose, zero-pad and bf16-cast every weight once (pad once, stay padded)."""
    H = hidden_nf
    K = hidden_nf // 2
    Hp = _round_up(H, LANE)
    Kp = _round_up(K, LANE)
    INP = _round_up(in_node_nf, SUB)

    def col(b, rows):
        return _padded(jnp.asarray(b).reshape(-1, 1), (rows, 1), F32)

    out = {
        "emb_Wt": _padded(p["emb_W"].T, (Hp, INP), BF16),
        "emb_b": col(p["emb_b"], Hp),
        "gbf_means": col(p["gbf_means"], Kp),
        "gbf_stds": _padded(p["gbf_stds"].reshape(-1, 1), (Kp, 1), F32, fill=1.0),
        "gbf_mul": jnp.asarray(p["gbf_mul"], F32),
        "gbf_bias": jnp.asarray(p["gbf_bias"], F32),
        "fuse0_Wt": _padded(p["fuse0_W"].T, (Kp, 14), BF16),
        "fuse0_b": col(p["fuse0_b"], Kp),
        "fuse1_Wt": _padded(p["fuse1_W"].T, (Kp, Kp), BF16),
        "fuse1_b": col(p["fuse1_b"], Kp),
    }
    layers = []
    for lp in p["layers"]:
        We0 = lp["edge0_W"]                      # (2H + 1 + K, H), rows: [h_i | h_j | radial | attr]
        q = {
            "we0_hi": _padded(We0[:H].T, (Hp, Hp), BF16),
            "we0_hj": _padded(We0[H:2 * H].T, (Hp, Hp), BF16),
            "we0_rad": _padded(We0[2 * H:2 * H + 1].T, (Hp, 1), F32),
            "we0_att": _padded(We0[2 * H + 1:].T, (Hp, Kp), BF16),
            "be0": col(lp["edge0_b"], Hp),
            "we1": _padded(lp["edge1_W"].T, (Hp, Hp), BF16),
            "be1": col(lp["edge1_b"], Hp),
            "wc0": _padded(lp["coord0_W"].T, (Hp, Hp), BF16),
            "bc0": col(lp["coord0_b"], Hp),
            "wc1": _padded(lp["coord1_W"].T, (CP, Hp), BF16),
            "wv0": _padded(lp["cvel0_W"].T, (Hp, Hp), BF16),
            "bv0": col(lp["cvel0_b"], Hp),
            # replicate the scalar velocity gate across CP rows -> (CP,Np) * vel directly
            "wv1": _padded(jnp.tile(lp["cvel1_W"].T, (CP, 1)), (CP, Hp), BF16),
            "bv1": _padded(jnp.tile(lp["cvel1_b"].reshape(1, 1), (CP, 1)), (CP, 1), F32),
            "wn0_h": _padded(lp["node0_W"][:H].T, (Hp, Hp), BF16),
            "wn0_a": _padded(lp["node0_W"][H:].T, (Hp, Hp), BF16),
            "bn0": col(lp["node0_b"], Hp),
            "wn1": _padded(lp["node1_W"].T, (Hp, Hp), BF16),
            "bn1": col(lp["node1_b"], Hp),
        }
        layers.append(q)
    out["layers"] = layers
    return out


# ----------------------------------------------------------------------------- forward
def clofnet_forward(packed, h_in, x, edges, vel, edge_attr, *, n_nodes, hidden_nf):
    row, col = edges
    N, in_nf = h_in.shape
    E = row.shape[0]
    Hp, INP = packed["emb_Wt"].shape
    Kp = packed["fuse1_Wt"].shape[0]
    Np = _round_up(N, SUB)
    Ep = _round_up(E, SUB)

    # ------- glue (done once): pad inputs, index one-hots, GBF type lookup ----------
    hin_T = jnp.zeros((INP, Np), F32).at[:in_nf, :N].set(h_in.T.astype(F32))

    xr = x.reshape(-1, n_nodes, 3)
    centroid = jnp.mean(xr, axis=1, keepdims=True)
    x_center = (xr - centroid).reshape(-1, 3)
    x_cm = jnp.zeros((CP, Np), F32).at[:3, :N].set(x_center.T.astype(F32))
    v_cm = jnp.zeros((CP, Np), F32).at[:3, :N].set(vel.T.astype(F32))

    node_ids = jnp.arange(Np, dtype=jnp.int32)
    row_p = jnp.full((Ep,), Np, jnp.int32).at[:E].set(row.astype(jnp.int32))
    col_p = jnp.full((Ep,), Np, jnp.int32).at[:E].set(col.astype(jnp.int32))
    growT = (node_ids[:, None] == row_p[None, :]).astype(F32)      # (Np, Ep) gather
    gcolT = (node_ids[:, None] == col_p[None, :]).astype(F32)      # (Np, Ep) gather
    segT = (row_p[:, None] == node_ids[None, :]).astype(F32)       # (Ep, Np) scatter
    counts = jnp.sum(segT, axis=0, keepdims=True)                  # (1, Np)
    invc = 1.0 / jnp.maximum(counts, 1.0)

    etype = (edge_attr[:, 0] * 0.5 + 0.5).astype(jnp.int32)
    mul_e = jnp.take(packed["gbf_mul"], etype, axis=0)[:, 0]
    bias_e = jnp.take(packed["gbf_bias"], etype, axis=0)[:, 0]
    gx = jnp.zeros((1, Ep), F32).at[0, :E].set(
        (mul_e * edge_attr[:, 1] + bias_e).astype(F32))

    # -------- fused setup: embedding + scalarization + gbf + fuse MLP ---------------
    h_T, ef_T = _call_full(
        _setup_kernel,
        (jax.ShapeDtypeStruct((Hp, Np), F32), jax.ShapeDtypeStruct((Kp, Ep), F32)),
        hin_T, packed["emb_Wt"], packed["emb_b"],
        x_cm, v_cm, growT, gcolT,
        gx, packed["gbf_means"], packed["gbf_stds"],
        packed["fuse0_Wt"], packed["fuse0_b"], packed["fuse1_Wt"], packed["fuse1_b"])

    # -------- fused Clof_GCL layers (one pallas_call per layer) ---------------------
    gcl = functools.partial(_gcl_kernel, coords_weight=1.0)
    coord = x_cm
    for q in packed["layers"]:
        h_T, coord = _call_full(
            gcl,
            (jax.ShapeDtypeStruct((Hp, Np), F32), jax.ShapeDtypeStruct((CP, Np), F32)),
            h_T, coord, v_cm, ef_T, growT, gcolT, segT, invc,
            q["we0_hi"], q["we0_hj"], q["we0_rad"], q["we0_att"], q["be0"],
            q["we1"], q["be1"],
            q["wc0"], q["bc0"], q["wc1"],
            q["wv0"], q["bv0"], q["wv1"], q["bv1"],
            q["wn0_h"], q["wn0_a"], q["bn0"], q["wn1"], q["bn1"])

    # ------------------------------- outputs ----------------------------------------
    h_out = h_T[:hidden_nf, :N].T                                   # (N, hidden_nf)
    x_final = ((coord[:3, :N].T).reshape(-1, n_nodes, 3) + centroid).reshape(-1, 3)

    xr_p = jnp.zeros((Np, CP), F32).at[:N, :3].set(x_final)
    (dist_p,) = _call_full(
        _cdist_kernel, (jax.ShapeDtypeStruct((Np, Np), F32),), xr_p, xr_p.T)
    return h_out, x_final, dist_p[:N, :N]


# -------------------------------------------------------------------------------- main
if __name__ == "__main__":
    B, n_nodes = 2, 5
    in_node_nf, hidden_nf, n_layers = 1, 32, 4
    N = B * n_nodes

    key = jax.random.PRNGKey(0)
    k1, k2, k3, k4, kp = jax.random.split(key, 5)
    h = jax.random.normal(k1, (N, in_node_nf), F32)
    x = jax.random.normal(k2, (N, 3), F32)
    vel = jax.random.normal(k3, (N, 3), F32)

    # fully connected edges within each sample (no self loops)
    rows, cols = [], []
    for b in range(B):
        for i in range(n_nodes):
            for j in range(n_nodes):
                if i != j:
                    rows.append(b * n_nodes + i)
                    cols.append(b * n_nodes + j)
    row = jnp.array(rows, jnp.int32)
    col = jnp.array(cols, jnp.int32)
    E = row.shape[0]

    charges = jnp.where(jax.random.bernoulli(k4, 0.5, (E,)), 1.0, -1.0)
    dist0 = jnp.sqrt(jnp.sum((x[row] - x[col]) ** 2, axis=1))
    edge_attr = jnp.stack([charges, dist0], axis=1).astype(F32)

    params = init_params(kp, in_node_nf, hidden_nf, n_layers)
    packed = pack_params(params, in_node_nf, hidden_nf)

    fwd = jax.jit(clofnet_forward, static_argnames=("n_nodes", "hidden_nf"))
    h_out, x_out, d_out = fwd(packed, h, x, (row, col), vel, edge_attr,
                              n_nodes=n_nodes, hidden_nf=hidden_nf)
    jax.block_until_ready((h_out, x_out, d_out))

    assert h_out.shape == (N, hidden_nf) and x_out.shape == (N, 3) and d_out.shape == (N, N)
    assert bool(jnp.all(jnp.isfinite(h_out))) and bool(jnp.all(jnp.isfinite(d_out)))
    print("KERNEL_OK")
</pallas_src>

<mosaic_0001>
module attributes {stable_mosaic.version = 11 : i64} {
  func.func @_setup_kernel(%arg0: memref<8x16xf32, #tpu.memory_space<vmem>>, %arg1: memref<128x8xbf16, #tpu.memory_space<vmem>>, %arg2: memref<128x1xf32, #tpu.memory_space<vmem>>, %arg3: memref<8x16xf32, #tpu.memory_space<vmem>>, %arg4: memref<8x16xf32, #tpu.memory_space<vmem>>, %arg5: memref<16x40xf32, #tpu.memory_space<vmem>>, %arg6: memref<16x40xf32, #tpu.memory_space<vmem>>, %arg7: memref<1x40xf32, #tpu.memory_space<vmem>>, %arg8: memref<128x1xf32, #tpu.memory_space<vmem>>, %arg9: memref<128x1xf32, #tpu.memory_space<vmem>>, %arg10: memref<128x14xbf16, #tpu.memory_space<vmem>>, %arg11: memref<128x1xf32, #tpu.memory_space<vmem>>, %arg12: memref<128x128xbf16, #tpu.memory_space<vmem>>, %arg13: memref<128x1xf32, #tpu.memory_space<vmem>>, %arg14: memref<128x16xf32, #tpu.memory_space<vmem>>, %arg15: memref<128x40xf32, #tpu.memory_space<vmem>>) attributes {dimension_semantics = [], scalar_prefetch = 0 : i64, scratch_operands = 0 : i64, tpu.core_type = #tpu.core_type<tc>} {
    %c0 = arith.constant 0 : index
    %c0_0 = arith.constant 0 : index
    %0 = vector.load %arg1[%c0, %c0_0] : memref<128x8xbf16, #tpu.memory_space<vmem>>, vector<128x8xbf16>
    %c0_1 = arith.constant 0 : index
    %c0_2 = arith.constant 0 : index
    %1 = vector.load %arg0[%c0_1, %c0_2] : memref<8x16xf32, #tpu.memory_space<vmem>>, vector<8x16xf32>
    %2 = arith.truncf %1 : vector<8x16xf32> to vector<8x16xbf16>
    %cst = arith.constant dense<0.000000e+00> : vector<128x16xf32>
    %3 = tpu.matmul %0, %2, %cst {dimension_numbers = #tpu.dot_dimension_numbers<[1], [0], [0], [1], [0, 0, 1, 1], [], []>} : vector<128x8xbf16>, vector<8x16xbf16>, vector<128x16xf32> -> vector<128x16xf32>
    %c0_3 = arith.constant 0 : index
    %c0_4 = arith.constant 0 : index
    %4 = vector.load %arg2[%c0_3, %c0_4] : memref<128x1xf32, #tpu.memory_space<vmem>>, vector<128x1xf32>
    %5 = vector.broadcast %4 : vector<128x1xf32> to vector<128x16xf32>
    %6 = arith.addf %3, %5 : vector<128x16xf32>
    %c0_5 = arith.constant 0 : index
    %c0_6 = arith.constant 0 : index
    %7 = vector.load %arg14[%c0_5, %c0_6] : memref<128x16xf32, #tpu.memory_space<vmem>>, vector<128x16xf32>
    tpu.vector_store %arg14[%c0_5, %c0_6], %6 {strides = array<i32>} : memref<128x16xf32, #tpu.memory_space<vmem>>, vector<128x16xf32>,
    %c0_7 = arith.constant 0 : index
    %c0_8 = arith.constant 0 : index
    %8 = vector.load %arg3[%c0_7, %c0_8] : memref<8x16xf32, #tpu.memory_space<vmem>>, vector<8x16xf32>
    %c0_9 = arith.constant 0 : index
    %c0_10 = arith.constant 0 : index
    %9 = vector.load %arg4[%c0_9, %c0_10] : memref<8x16xf32, #tpu.memory_space<vmem>>, vector<8x16xf32>
    %c0_11 = arith.constant 0 : index
    %c0_12 = arith.constant 0 : index
    %10 = vector.load %arg5[%c0_11, %c0_12] : memref<16x40xf32, #tpu.memory_space<vmem>>, vector<16x40xf32>
    %c0_13 = arith.constant 0 : index
    %c0_14 = arith.constant 0 : index
    %11 = vector.load %arg6[%c0_13, %c0_14] : memref<16x40xf32, #tpu.memory_space<vmem>>, vector<16x40xf32>
    %cst_15 = arith.constant dense<0.000000e+00> : vector<8x40xf32>
    %12 = tpu.matmul %8, %10, %cst_15 {dimension_numbers = #tpu.dot_dimension_numbers<[1], [0], [0], [1], [0, 0, 1, 1], [], []>} : vector<8x16xf32>, vector<16x40xf32>, vector<8x40xf32> -> vector<8x40xf32>
    %cst_16 = arith.constant dense<0.000000e+00> : vector<8x40xf32>
    %13 = tpu.matmul %8, %11, %cst_16 {dimension_numbers = #tpu.dot_dimension_numbers<[1], [0], [0], [1], [0, 0, 1, 1], [], []>} : vector<8x16xf32>, vector<16x40xf32>, vector<8x40xf32> -> vector<8x40xf32>
    %cst_17 = arith.constant dense<0.000000e+00> : vector<8x40xf32>
    %14 = tpu.matmul %9, %10, %cst_17 {dimension_numbers = #tpu.dot_dimension_numbers<[1], [0], [0], [1], [0, 0, 1, 1], [], []>} : vector<8x16xf32>, vector<16x40xf32>, vector<8x40xf32> -> vector<8x40xf32>
    %cst_18 = arith.constant dense<0.000000e+00> : vector<8x40xf32>
    %15 = tpu.matmul %9, %11, %cst_18 {dimension_numbers = #tpu.dot_dimension_numbers<[1], [0], [0], [1], [0, 0, 1, 1], [], []>} : vector<8x16xf32>, vector<16x40xf32>, vector<8x40xf32> -> vector<8x40xf32>
    %16 = arith.subf %12, %13 : vector<8x40xf32>
    %17 = arith.mulf %16, %16 : vector<8x40xf32>
    %cst_19 = arith.constant dense<0.000000e+00> : vector<40xf32>
    %18 = vector.multi_reduction <add>, %17, %cst_19 [0] : vector<8x40xf32> to vector<40xf32>
    %19 = vector.shape_cast %18 : vector<40xf32> to vector<1x40xf32>
    %20 = vector.extract_strided_slice %12 {offsets = [1, 0], sizes = [1, 40], strides = [1, 1]} : vector<8x40xf32> to vector<1x40xf32>
    %21 = vector.extract_strided_slice %13 {offsets = [2, 0], sizes = [1, 40], strides = [1, 1]} : vector<8x40xf32> to vector<1x40xf32>
    %22 = arith.mulf %20, %21 : vector<1x40xf32>
    %23 = vector.extract_strided_slice %12 {offsets = [2, 0], sizes = [1, 40], strides = [1, 1]} : vector<8x40xf32> to vector<1x40xf32>
    %24 = vector.extract_strided_slice %13 {offsets = [1, 0], sizes = [1, 40], strides = [1, 1]} : vector<8x40xf32> to vector<1x40xf32>
    %25 = arith.mulf %23, %24 : vector<1x40xf32>
    %26 = arith.subf %22, %25 : vector<1x40xf32>
    %27 = vector.extract_strided_slice %12 {offsets = [2, 0], sizes = [1, 40], strides = [1, 1]} : vector<8x40xf32> to vector<1x40xf32>
    %28 = vector.extract_strided_slice %13 {offsets = [0, 0], sizes = [1, 40], strides = [1, 1]} : vector<8x40xf32> to vector<1x40xf32>
    %29 = arith.mulf %27, %28 : vector<1x40xf32>
    %30 = vector.extract_strided_slice %12 {offsets = [0, 0], sizes = [1, 40], strides = [1, 1]} : vector<8x40xf32> to vector<1x40xf32>
    %31 = vector.extract_strided_slice %13 {offsets = [2, 0], sizes = [1, 40], strides = [1, 1]} : vector<8x40xf32> to vector<1x40xf32>
    %32 = arith.mulf %30, %31 : vector<1x40xf32>
    %33 = arith.subf %29, %32 : vector<1x40xf32>
    %34 = vector.extract_strided_slice %12 {offsets = [0, 0], sizes = [1, 40], strides = [1, 1]} : vector<8x40xf32> to vector<1x40xf32>
    %35 = vector.extract_strided_slice %13 {offsets = [1, 0], sizes = [1, 40], strides = [1, 1]} : vector<8x40xf32> to vector<1x40xf32>
    %36 = arith.mulf %34, %35 : vector<1x40xf32>
    %37 = vector.extract_strided_slice %12 {offsets = [1, 0], sizes = [1, 40], strides = [1, 1]} : vector<8x40xf32> to vector<1x40xf32>
    %38 = vector.extract_strided_slice %13 {offsets = [0, 0], sizes = [1, 40], strides = [1, 1]} : vector<8x40xf32> to vector<1x40xf32>
    %39 = arith.mulf %37, %38 : vector<1x40xf32>
    %40 = arith.subf %36, %39 : vector<1x40xf32>
    %41 = tpu.concatenate %26, %33, %40 in 0 : vector<1x40xf32>, vector<1x40xf32>, vector<1x40xf32> -> vector<3x40xf32>
    %42 = vector.extract_strided_slice %16 {offsets = [0, 0], sizes = [3, 40], strides = [1, 1]} : vector<8x40xf32> to vector<3x40xf32>
    %43 = math.sqrt %19 : vector<1x40xf32>
    %cst_20 = arith.constant 1.000000e+00 : f32
    %44 = vector.broadcast %cst_20 : f32 to vector<1x40xf32>
    %45 = arith.addf %43, %44 : vector<1x40xf32>
    %46 = tpu.reciprocal %45 {approx = true} : vector<1x40xf32> -> vector<1x40xf32>
    %47 = vector.broadcast %46 : vector<1x40xf32> to vector<3x40xf32>
    %48 = arith.mulf %42, %47 : vector<3x40xf32>
    %49 = arith.mulf %41, %41 : vector<3x40xf32>
    %cst_21 = arith.constant dense<0.000000e+00> : vector<40xf32>
    %50 = vector.multi_reduction <add>, %49, %cst_21 [0] : vector<3x40xf32> to vector<40xf32>
    %51 = vector.shape_cast %50 : vector<40xf32> to vector<1x40xf32>
    %52 = math.sqrt %51 : vector<1x40xf32>
    %cst_22 = arith.constant 1.000000e+00 : f32
    %53 = vector.broadcast %cst_22 : f32 to vector<1x40xf32>
    %54 = arith.addf %52, %53 : vector<1x40xf32>
    %55 = tpu.reciprocal %54 {approx = true} : vector<1x40xf32> -> vector<1x40xf32>
    %56 = vector.broadcast %55 : vector<1x40xf32> to vector<3x40xf32>
    %57 = arith.mulf %41, %56 : vector<3x40xf32>
    %58 = vector.extract_strided_slice %48 {offsets = [1, 0], sizes = [1, 40], strides = [1, 1]} : vector<3x40xf32> to vector<1x40xf32>
    %59 = vector.extract_strided_slice %57 {offsets = [2, 0], sizes = [1, 40], strides = [1, 1]} : vector<3x40xf32> to vector<1x40xf32>
    %60 = arith.mulf %58, %59 : vector<1x40xf32>
    %61 = vector.extract_strided_slice %48 {offsets = [2, 0], sizes = [1, 40], strides = [1, 1]} : vector<3x40xf32> to vector<1x40xf32>
    %62 = vector.extract_strided_slice %57 {offsets = [1, 0], sizes = [1, 40], strides = [1, 1]} : vector<3x40xf32> to vector<1x40xf32>
    %63 = arith.mulf %61, %62 : vector<1x40xf32>
    %64 = arith.subf %60, %63 : vector<1x40xf32>
    %65 = vector.extract_strided_slice %48 {offsets = [2, 0], sizes = [1, 40], strides = [1, 1]} : vector<3x40xf32> to vector<1x40xf32>
    %66 = vector.extract_strided_slice %57 {offsets = [0, 0], sizes = [1, 40], strides = [1, 1]} : vector<3x40xf32> to vector<1x40xf32>
    %67 = arith.mulf %65, %66 : vector<1x40xf32>
    %68 = vector.extract_strided_slice %48 {offsets = [0, 0], sizes = [1, 40], strides = [1, 1]} : vector<3x40xf32> to vector<1x40xf32>
    %69 = vector.extract_strided_slice %57 {offsets = [2, 0], sizes = [1, 40], strides = [1, 1]} : vector<3x40xf32> to vector<1x40xf32>
    %70 = arith.mulf %68, %69 : vector<1x40xf32>
    %71 = arith.subf %67, %70 : vector<1x40xf32>
    %72 = vector.extract_strided_slice %48 {offsets = [0, 0], sizes = [1, 40], strides = [1, 1]} : vector<3x40xf32> to vector<1x40xf32>
    %73 = vector.extract_strided_slice %57 {offsets = [1, 0], sizes = [1, 40], strides = [1, 1]} : vector<3x40xf32> to vector<1x40xf32>
    %74 = arith.mulf %72, %73 : vector<1x40xf32>
    %75 = vector.extract_strided_slice %48 {offsets = [1, 0], sizes = [1, 40], strides = [1, 1]} : vector<3x40xf32> to vector<1x40xf32>
    %76 = vector.extract_strided_slice %57 {offsets = [0, 0], sizes = [1, 40], strides = [1, 1]} : vector<3x40xf32> to vector<1x40xf32>
    %77 = arith.mulf %75, %76 : vector<1x40xf32>
    %78 = arith.subf %74, %77 : vector<1x40xf32>
    %79 = tpu.concatenate %64, %71, %78 in 0 : vector<1x40xf32>, vector<1x40xf32>, vector<1x40xf32> -> vector<3x40xf32>
    %80 = vector.extract_strided_slice %12 {offsets = [0, 0], sizes = [3, 40], strides = [1, 1]} : vector<8x40xf32> to vector<3x40xf32>
    %81 = arith.mulf %48, %80 : vector<3x40xf32>
    %cst_23 = arith.constant dense<0.000000e+00> : vector<40xf32>
    %82 = vector.multi_reduction <add>, %81, %cst_23 [0] : vector<3x40xf32> to vector<40xf32>
    %83 = vector.shape_cast %82 : vector<40xf32> to vector<1x40xf32>
    %84 = arith.mulf %57, %80 : vector<3x40xf32>
    %cst_24 = arith.constant dense<0.000000e+00> : vector<40xf32>
    %85 = vector.multi_reduction <add>, %84, %cst_24 [0] : vector<3x40xf32> to vector<40xf32>
    %86 = vector.shape_cast %85 : vector<40xf32> to vector<1x40xf32>
    %87 = arith.mulf %79, %80 : vector<3x40xf32>
    %cst_25 = arith.constant dense<0.000000e+00> : vector<40xf32>
    %88 = vector.multi_reduction <add>, %87, %cst_25 [0] : vector<3x40xf32> to vector<40xf32>
    %89 = vector.shape_cast %88 : vector<40xf32> to vector<1x40xf32>
    %90 = tpu.concatenate %83, %86, %89 in 0 : vector<1x40xf32>, vector<1x40xf32>, vector<1x40xf32> -> vector<3x40xf32>
    %91 = vector.extract_strided_slice %13 {offsets = [0, 0], sizes = [3, 40], strides = [1, 1]} : vector<8x40xf32> to vector<3x40xf32>
    %92 = arith.mulf %48, %91 : vector<3x40xf32>
    %cst_26 = arith.constant dense<0.000000e+00> : vector<40xf32>
    %93 = vector.multi_reduction <add>, %92, %cst_26 [0] : vector<3x40xf32> to vector<40xf32>
    %94 = vector.shape_cast %93 : vector<40xf32> to vector<1x40xf32>
    %95 = arith.mulf %57, %91 : vector<3x40xf32>
    %cst_27 = arith.constant dense<0.000000e+00> : vector<40xf32>
    %96 = vector.multi_reduction <add>, %95, %cst_27 [0] : vector<3x40xf32> to vector<40xf32>
    %97 = vector.shape_cast %96 : vector<40xf32> to vector<1x40xf32>
    %98 = arith.mulf %79, %91 : vector<3x40xf32>
    %cst_28 = arith.constant dense<0.000000e+00> : vector<40xf32>
    %99 = vector.multi_reduction <add>, %98, %cst_28 [0] : vector<3x40xf32> to vector<40xf32>
    %100 = vector.shape_cast %99 : vector<40xf32> to vector<1x40xf32>
    %101 = tpu.concatenate %94, %97, %100 in 0 : vector<1x40xf32>, vector<1x40xf32>, vector<1x40xf32> -> vector<3x40xf32>
    %102 = vector.extract_strided_slice %14 {offsets = [0, 0], sizes = [3, 40], strides = [1, 1]} : vector<8x40xf32> to vector<3x40xf32>
    %103 = arith.mulf %48, %102 : vector<3x40xf32>
    %cst_29 = arith.constant dense<0.000000e+00> : vector<40xf32>
    %104 = vector.multi_reduction <add>, %103, %cst_29 [0] : vector<3x40xf32> to vector<40xf32>
    %105 = vector.shape_cast %104 : vector<40xf32> to vector<1x40xf32>
    %106 = arith.mulf %57, %102 : vector<3x40xf32>
    %cst_30 = arith.constant dense<0.000000e+00> : vector<40xf32>
    %107 = vector.multi_reduction <add>, %106, %cst_30 [0] : vector<3x40xf32> to vector<40xf32>
    %108 = vector.shape_cast %107 : vector<40xf32> to vector<1x40xf32>
    %109 = arith.mulf %79, %102 : vector<3x40xf32>
    %cst_31 = arith.constant dense<0.000000e+00> : vector<40xf32>
    %110 = vector.multi_reduction <add>, %109, %cst_31 [0] : vector<3x40xf32> to vector<40xf32>
    %111 = vector.shape_cast %110 : vector<40xf32> to vector<1x40xf32>
    %112 = tpu.concatenate %105, %108, %111 in 0 : vector<1x40xf32>, vector<1x40xf32>, vector<1x40xf32> -> vector<3x40xf32>
    %113 = vector.extract_strided_slice %15 {offsets = [0, 0], sizes = [3, 40], strides = [1, 1]} : vector<8x40xf32> to vector<3x40xf32>
    %114 = arith.mulf %48, %113 : vector<3x40xf32>
    %cst_32 = arith.constant dense<0.000000e+00> : vector<40xf32>
    %115 = vector.multi_reduction <add>, %114, %cst_32 [0] : vector<3x40xf32> to vector<40xf32>
    %116 = vector.shape_cast %115 : vector<40xf32> to vector<1x40xf32>
    %117 = arith.mulf %57, %113 : vector<3x40xf32>
    %cst_33 = arith.constant dense<0.000000e+00> : vector<40xf32>
    %118 = vector.multi_reduction <add>, %117, %cst_33 [0] : vector<3x40xf32> to vector<40xf32>
    %119 = vector.shape_cast %118 : vector<40xf32> to vector<1x40xf32>
    %120 = arith.mulf %79, %113 : vector<3x40xf32>
    %cst_34 = arith.constant dense<0.000000e+00> : vector<40xf32>
    %121 = vector.multi_reduction <add>, %120, %cst_34 [0] : vector<3x40xf32> to vector<40xf32>
    %122 = vector.shape_cast %121 : vector<40xf32> to vector<1x40xf32>
    %123 = tpu.concatenate %116, %119, %122 in 0 : vector<1x40xf32>, vector<1x40xf32>, vector<1x40xf32> -> vector<3x40xf32>
    %124 = arith.mulf %90, %90 : vector<3x40xf32>
    %cst_35 = arith.constant dense<0.000000e+00> : vector<40xf32>
    %125 = vector.multi_reduction <add>, %124, %cst_35 [0] : vector<3x40xf32> to vector<40xf32>
    %126 = vector.shape_cast %125 : vector<40xf32> to vector<1x40xf32>
    %127 = math.sqrt %126 : vector<1x40xf32>
    %128 = arith.mulf %101, %101 : vector<3x40xf32>
    %cst_36 = arith.constant dense<0.000000e+00> : vector<40xf32>
    %129 = vector.multi_reduction <add>, %128, %cst_36 [0] : vector<3x40xf32> to vector<40xf32>
    %130 = vector.shape_cast %129 : vector<40xf32> to vector<1x40xf32>
    %131 = math.sqrt %130 : vector<1x40xf32>
    %132 = arith.mulf %90, %101 : vector<3x40xf32>
    %cst_37 = arith.constant dense<0.000000e+00> : vector<40xf32>
    %133 = vector.multi_reduction <add>, %132, %cst_37 [0] : vector<3x40xf32> to vector<40xf32>
    %134 = vector.shape_cast %133 : vector<40xf32> to vector<1x40xf32>
    %cst_38 = arith.constant 9.99999974E-6 : f32
    %135 = vector.broadcast %cst_38 : f32 to vector<1x40xf32>
    %136 = arith.addf %127, %135 : vector<1x40xf32>
    %cst_39 = arith.constant 9.99999974E-6 : f32
    %137 = vector.broadcast %cst_39 : f32 to vector<1x40xf32>
    %138 = arith.addf %131, %137 : vector<1x40xf32>
    %139 = arith.mulf %136, %138 : vector<1x40xf32>
    %140 = tpu.reciprocal %139 {approx = true} : vector<1x40xf32> -> vector<1x40xf32>
    %141 = arith.mulf %134, %140 : vector<1x40xf32>
    %142 = arith.mulf %141, %141 : vector<1x40xf32>
    %cst_40 = arith.constant 1.000000e+00 : f32
    %143 = vector.broadcast %cst_40 : f32 to vector<1x40xf32>
    %144 = arith.subf %143, %142 : vector<1x40xf32>
    %cst_41 = arith.constant 0.000000e+00 : f32
    %145 = vector.broadcast %cst_41 : f32 to vector<1x40xf32>
    %146 = arith.maximumf %144, %145 : vector<1x40xf32>
    %147 = math.sqrt %146 : vector<1x40xf32>
    %148 = tpu.concatenate %147, %141, %90, %101, %112, %123 in 0 : vector<1x40xf32>, vector<1x40xf32>, vector<3x40xf32>, vector<3x40xf32>, vector<3x40xf32>, vector<3x40xf32> -> vector<14x40xf32>
    %c0_42 = arith.constant 0 : index
    %c0_43 = arith.constant 0 : index
    %149 = vector.load %arg10[%c0_42, %c0_43] : memref<128x14xbf16, #tpu.memory_space<vmem>>, vector<128x14xbf16>
    %150 = arith.truncf %148 : vector<14x40xf32> to vector<14x40xbf16>
    %cst_44 = arith.constant dense<0.000000e+00> : vector<128x40xf32>
    %151 = tpu.matmul %149, %150, %cst_44 {dimension_numbers = #tpu.dot_dimension_numbers<[1], [0], [0], [1], [0, 0, 1, 1], [], []>} : vector<128x14xbf16>, vector<14x40xbf16>, vector<128x40xf32> -> vector<128x40xf32>
    %c0_45 = arith.constant 0 : index
    %c0_46 = arith.constant 0 : index
    %152 = vector.load %arg11[%c0_45, %c0_46] : memref<128x1xf32, #tpu.memory_space<vmem>>, vector<128x1xf32>
    %153 = vector.broadcast %152 : vector<128x1xf32> to vector<128x40xf32>
    %154 = arith.addf %151, %153 : vector<128x40xf32>
    %155 = arith.negf %154 : vector<128x40xf32>
    %156 = math.exp %155 : vector<128x40xf32>
    %cst_47 = arith.constant 1.000000e+00 : f32
    %157 = vector.broadcast %cst_47 : f32 to vector<128x40xf32>
    %158 = arith.addf %157, %156 : vector<128x40xf32>
    %159 = arith.divf %157, %158 : vector<128x40xf32>
    %160 = arith.mulf %154, %159 : vector<128x40xf32>
    %c0_48 = arith.constant 0 : index
    %c0_49 = arith.constant 0 : index
    %161 = vector.load %arg12[%c0_48, %c0_49] : memref<128x128xbf16, #tpu.memory_space<vmem>>, vector<128x128xbf16>
    %162 = arith.truncf %160 : vector<128x40xf32> to vector<128x40xbf16>
    %cst_50 = arith.constant dense<0.000000e+00> : vector<128x40xf32>
    %163 = tpu.matmul %161, %162, %cst_50 {dimension_numbers = #tpu.dot_dimension_numbers<[1], [0], [0], [1], [0, 0, 1, 1], [], []>} : vector<128x128xbf16>, vector<128x40xbf16>, vector<128x40xf32> -> vector<128x40xf32>
    %c0_51 = arith.constant 0 : index
    %c0_52 = arith.constant 0 : index
    %164 = vector.load %arg13[%c0_51, %c0_52] : memref<128x1xf32, #tpu.memory_space<vmem>>, vector<128x1xf32>
    %165 = vector.broadcast %164 : vector<128x1xf32> to vector<128x40xf32>
    %166 = arith.addf %163, %165 : vector<128x40xf32>
    %167 = arith.negf %166 : vector<128x40xf32>
    %168 = math.exp %167 : vector<128x40xf32>
    %cst_53 = arith.constant 1.000000e+00 : f32
    %169 = vector.broadcast %cst_53 : f32 to vector<128x40xf32>
    %170 = arith.addf %169, %168 : vector<128x40xf32>
    %171 = arith.divf %169, %170 : vector<128x40xf32>
    %172 = arith.mulf %166, %171 : vector<128x40xf32>
    %c0_54 = arith.constant 0 : index
    %c0_55 = arith.constant 0 : index
    %173 = vector.load %arg9[%c0_54, %c0_55] : memref<128x1xf32, #tpu.memory_space<vmem>>, vector<128x1xf32>
    %174 = math.absf %173 : vector<128x1xf32>
    %cst_56 = arith.constant 9.99999974E-6 : f32
    %175 = vector.broadcast %cst_56 : f32 to vector<128x1xf32>
    %176 = arith.addf %174, %175 : vector<128x1xf32>
    %177 = tpu.reciprocal %176 {approx = true} : vector<128x1xf32> -> vector<128x1xf32>
    %c0_57 = arith.constant 0 : index
    %c0_58 = arith.constant 0 : index
    %178 = vector.load %arg7[%c0_57, %c0_58] : memref<1x40xf32, #tpu.memory_space<vmem>>, vector<1x40xf32>
    %c0_59 = arith.constant 0 : index
    %c0_60 = arith.constant 0 : index
    %179 = vector.load %arg8[%c0_59, %c0_60] : memref<128x1xf32, #tpu.memory_space<vmem>>, vector<128x1xf32>
    %180 = vector.broadcast %178 : vector<1x40xf32> to vector<128x40xf32>
    %181 = vector.broadcast %179 : vector<128x1xf32> to vector<128x40xf32>
    %182 = arith.subf %180, %181 : vector<128x40xf32>
    %183 = vector.broadcast %177 : vector<128x1xf32> to vector<128x40xf32>
    %184 = arith.mulf %182, %183 : vector<128x40xf32>
    %cst_61 = arith.constant -5.000000e-01 : f32
    %185 = vector.broadcast %cst_61 : f32 to vector<128x40xf32>
    %186 = arith.mulf %185, %184 : vector<128x40xf32>
    %187 = arith.mulf %186, %184 : vector<128x40xf32>
    %188 = math.exp %187 : vector<128x40xf32>
    %cst_62 = arith.constant 0.398942292 : f32
    %189 = vector.broadcast %cst_62 : f32 to vector<128x1xf32>
    %190 = arith.mulf %177, %189 : vector<128x1xf32>
    %191 = vector.broadcast %190 : vector<128x1xf32> to vector<128x40xf32>
    %192 = arith.mulf %188, %191 : vector<128x40xf32>
    %193 = arith.addf %172, %192 : vector<128x40xf32>
    %c0_63 = arith.constant 0 : index
    %c0_64 = arith.constant 0 : index
    %194 = vector.load %arg15[%c0_63, %c0_64] : memref<128x40xf32, #tpu.memory_space<vmem>>, vector<128x40xf32>
    tpu.vector_store %arg15[%c0_63, %c0_64], %193 {strides = array<i32>} : memref<128x40xf32, #tpu.memory_space<vmem>>, vector<128x40xf32>,
    return
  }
}

module attributes {stable_mosaic.version = 11 : i64} {
  func.func @_gcl_kernel(%arg0: memref<128x16xf32, #tpu.memory_space<vmem>>, %arg1: memref<8x16xf32, #tpu.memory_space<vmem>>, %arg2: memref<8x16xf32, #tpu.memory_space<vmem>>, %arg3: memref<128x40xf32, #tpu.memory_space<vmem>>, %arg4: memref<16x40xf32, #tpu.memory_space<vmem>>, %arg5: memref<16x40xf32, #tpu.memory_space<vmem>>, %arg6: memref<40x16xf32, #tpu.memory_space<vmem>>, %arg7: memref<1x16xf32, #tpu.memory_space<vmem>>, %arg8: memref<128x128xbf16, #tpu.memory_space<vmem>>, %arg9: memref<128x128xbf16, #tpu.memory_space<vmem>>, %arg10: memref<128x1xf32, #tpu.memory_space<vmem>>, %arg11: memref<128x128xbf16, #tpu.memory_space<vmem>>, %arg12: memref<128x1xf32, #tpu.memory_space<vmem>>, %arg13: memref<128x128xbf16, #tpu.memory_space<vmem>>, %arg14: memref<128x1xf32, #tpu.memory_space<vmem>>, %arg15: memref<128x128xbf16, #tpu.memory_space<vmem>>, %arg16: memref<128x1xf32, #tpu.memory_space<vmem>>, %arg17: memref<8x128xbf16, #tpu.memory_space<vmem>>, %arg18: memref<128x128xbf16, #tpu.memory_space<vmem>>, %arg19: memref<128x1xf32, #tpu.memory_space<vmem>>, %arg20: memref<8x128xbf16, #tpu.memory_space<vmem>>, %arg21: memref<8x1xf32, #tpu.memory_space<vmem>>, %arg22: memref<128x128xbf16, #tpu.memory_space<vmem>>, %arg23: memref<128x128xbf16, #tpu.memory_space<vmem>>, %arg24: memref<128x1xf32, #tpu.memory_space<vmem>>, %arg25: memref<128x128xbf16, #tpu.memory_space<vmem>>, %arg26: memref<128x1xf32, #tpu.memory_space<vmem>>, %arg27: memref<128x16xf32, #tpu.memory_space<vmem>>, %arg28: memref<8x16xf32, #tpu.memory_space<vmem>>) attributes {dimension_semantics = [], scalar_prefetch = 0 : i64, scratch_operands = 0 : i64, tpu.core_type = #tpu.core_type<tc>} {
    %c0 = arith.constant 0 : index
    %c0_0 = arith.constant 0 : index
    %0 = vector.load %arg0[%c0, %c0_0] : memref<128x16xf32, #tpu.memory_space<vmem>>, vector<128x16xf32>
    %c0_1 = arith.constant 0 : index
    %c0_2 = arith.constant 0 : index
    %1 = vector.load %arg1[%c0_1, %c0_2] : memref<8x16xf32, #tpu.memory_space<vmem>>, vector<8x16xf32>
    %c0_3 = arith.constant 0 : index
    %c0_4 = arith.constant 0 : index
    %2 = vector.load %arg2[%c0_3, %c0_4] : memref<8x16xf32, #tpu.memory_space<vmem>>, vector<8x16xf32>
    %c0_5 = arith.constant 0 : index
    %c0_6 = arith.constant 0 : index
    %3 = vector.load %arg4[%c0_5, %c0_6] : memref<16x40xf32, #tpu.memory_space<vmem>>, vector<16x40xf32>
    %c0_7 = arith.constant 0 : index
    %c0_8 = arith.constant 0 : index
    %4 = vector.load %arg5[%c0_7, %c0_8] : memref<16x40xf32, #tpu.memory_space<vmem>>, vector<16x40xf32>
    %c0_9 = arith.constant 0 : index
    %c0_10 = arith.constant 0 : index
    %5 = vector.load %arg6[%c0_9, %c0_10] : memref<40x16xf32, #tpu.memory_space<vmem>>, vector<40x16xf32>
    %6 = arith.truncf %0 : vector<128x16xf32> to vector<128x16xbf16>
    %7 = arith.truncf %3 : vector<16x40xf32> to vector<16x40xbf16>
    %cst = arith.constant dense<0.000000e+00> : vector<128x40xf32>
    %8 = tpu.matmul %6, %7, %cst {dimension_numbers = #tpu.dot_dimension_numbers<[1], [0], [0], [1], [0, 0, 1, 1], [], []>} : vector<128x16xbf16>, vector<16x40xbf16>, vector<128x40xf32> -> vector<128x40xf32>
    %9 = arith.truncf %4 : vector<16x40xf32> to vector<16x40xbf16>
    %cst_11 = arith.constant dense<0.000000e+00> : vector<128x40xf32>
    %10 = tpu.matmul %6, %9, %cst_11 {dimension_numbers = #tpu.dot_dimension_numbers<[1], [0], [0], [1], [0, 0, 1, 1], [], []>} : vector<128x16xbf16>, vector<16x40xbf16>, vector<128x40xf32> -> vector<128x40xf32>
    %cst_12 = arith.constant dense<0.000000e+00> : vector<8x40xf32>
    %11 = tpu.matmul %1, %3, %cst_12 {dimension_numbers = #tpu.dot_dimension_numbers<[1], [0], [0], [1], [0, 0, 1, 1], [], []>} : vector<8x16xf32>, vector<16x40xf32>, vector<8x40xf32> -> vector<8x40xf32>
    %cst_13 = arith.constant dense<0.000000e+00> : vector<8x40xf32>
    %12 = tpu.matmul %1, %4, %cst_13 {dimension_numbers = #tpu.dot_dimension_numbers<[1], [0], [0], [1], [0, 0, 1, 1], [], []>} : vector<8x16xf32>, vector<16x40xf32>, vector<8x40xf32> -> vector<8x40xf32>
    %13 = arith.subf %11, %12 : vector<8x40xf32>
    %14 = arith.mulf %13, %13 : vector<8x40xf32>
    %cst_14 = arith.constant dense<0.000000e+00> : vector<40xf32>
    %15 = vector.multi_reduction <add>, %14, %cst_14 [0] : vector<8x40xf32> to vector<40xf32>
    %16 = vector.shape_cast %15 : vector<40xf32> to vector<1x40xf32>
    %17 = vector.extract_strided_slice %11 {offsets = [1, 0], sizes = [1, 40], strides = [1, 1]} : vector<8x40xf32> to vector<1x40xf32>
    %18 = vector.extract_strided_slice %12 {offsets = [2, 0], sizes = [1, 40], strides = [1, 1]} : vector<8x40xf32> to vector<1x40xf32>
    %19 = arith.mulf %17, %18 : vector<1x40xf32>
    %20 = vector.extract_strided_slice %11 {offsets = [2, 0], sizes = [1, 40], strides = [1, 1]} : vector<8x40xf32> to vector<1x40xf32>
    %21 = vector.extract_strided_slice %12 {offsets = [1, 0], sizes = [1, 40], strides = [1, 1]} : vector<8x40xf32> to vector<1x40xf32>
    %22 = arith.mulf %20, %21 : vector<1x40xf32>
    %23 = arith.subf %19, %22 : vector<1x40xf32>
    %24 = vector.extract_strided_slice %11 {offsets = [2, 0], sizes = [1, 40], strides = [1, 1]} : vector<8x40xf32> to vector<1x40xf32>
    %25 = vector.extract_strided_slice %12 {offsets = [0, 0], sizes = [1, 40], strides = [1, 1]} : vector<8x40xf32> to vector<1x40xf32>
    %26 = arith.mulf %24, %25 : vector<1x40xf32>
    %27 = vector.extract_strided_slice %11 {offsets = [0, 0], sizes = [1, 40], strides = [1, 1]} : vector<8x40xf32> to vector<1x40xf32>
    %28 = vector.extract_strided_slice %12 {offsets = [2, 0], sizes = [1, 40], strides = [1, 1]} : vector<8x40xf32> to vector<1x40xf32>
    %29 = arith.mulf %27, %28 : vector<1x40xf32>
    %30 = arith.subf %26, %29 : vector<1x40xf32>
    %31 = vector.extract_strided_slice %11 {offsets = [0, 0], sizes = [1, 40], strides = [1, 1]} : vector<8x40xf32> to vector<1x40xf32>
    %32 = vector.extract_strided_slice %12 {offsets = [1, 0], sizes = [1, 40], strides = [1, 1]} : vector<8x40xf32> to vector<1x40xf32>
    %33 = arith.mulf %31, %32 : vector<1x40xf32>
    %34 = vector.extract_strided_slice %11 {offsets = [1, 0], sizes = [1, 40], strides = [1, 1]} : vector<8x40xf32> to vector<1x40xf32>
    %35 = vector.extract_strided_slice %12 {offsets = [0, 0], sizes = [1, 40], strides = [1, 1]} : vector<8x40xf32> to vector<1x40xf32>
    %36 = arith.mulf %34, %35 : vector<1x40xf32>
    %37 = arith.subf %33, %36 : vector<1x40xf32>
    %38 = tpu.concatenate %23, %30, %37 in 0 : vector<1x40xf32>, vector<1x40xf32>, vector<1x40xf32> -> vector<3x40xf32>
    %39 = vector.extract_strided_slice %13 {offsets = [0, 0], sizes = [3, 40], strides = [1, 1]} : vector<8x40xf32> to vector<3x40xf32>
    %40 = math.sqrt %16 : vector<1x40xf32>
    %cst_15 = arith.constant 1.000000e+00 : f32
    %41 = vector.broadcast %cst_15 : f32 to vector<1x40xf32>
    %42 = arith.addf %40, %41 : vector<1x40xf32>
    %43 = tpu.reciprocal %42 {approx = true} : vector<1x40xf32> -> vector<1x40xf32>
    %44 = vector.broadcast %43 : vector<1x40xf32> to vector<3x40xf32>
    %45 = arith.mulf %39, %44 : vector<3x40xf32>
    %46 = arith.mulf %38, %38 : vector<3x40xf32>
    %cst_16 = arith.constant dense<0.000000e+00> : vector<40xf32>
    %47 = vector.multi_reduction <add>, %46, %cst_16 [0] : vector<3x40xf32> to vector<40xf32>
    %48 = vector.shape_cast %47 : vector<40xf32> to vector<1x40xf32>
    %49 = math.sqrt %48 : vector<1x40xf32>
    %cst_17 = arith.constant 1.000000e+00 : f32
    %50 = vector.broadcast %cst_17 : f32 to vector<1x40xf32>
    %51 = arith.addf %49, %50 : vector<1x40xf32>
    %52 = tpu.reciprocal %51 {approx = true} : vector<1x40xf32> -> vector<1x40xf32>
    %53 = vector.broadcast %52 : vector<1x40xf32> to vector<3x40xf32>
    %54 = arith.mulf %38, %53 : vector<3x40xf32>
    %55 = vector.extract_strided_slice %45 {offsets = [1, 0], sizes = [1, 40], strides = [1, 1]} : vector<3x40xf32> to vector<1x40xf32>
    %56 = vector.extract_strided_slice %54 {offsets = [2, 0], sizes = [1, 40], strides = [1, 1]} : vector<3x40xf32> to vector<1x40xf32>
    %57 = arith.mulf %55, %56 : vector<1x40xf32>
    %58 = vector.extract_strided_slice %45 {offsets = [2, 0], sizes = [1, 40], strides = [1, 1]} : vector<3x40xf32> to vector<1x40xf32>
    %59 = vector.extract_strided_slice %54 {offsets = [1, 0], sizes = [1, 40], strides = [1, 1]} : vector<3x40xf32> to vector<1x40xf32>
    %60 = arith.mulf %58, %59 : vector<1x40xf32>
    %61 = arith.subf %57, %60 : vector<1x40xf32>
    %62 = vector.extract_strided_slice %45 {offsets = [2, 0], sizes = [1, 40], strides = [1, 1]} : vector<3x40xf32> to vector<1x40xf32>
    %63 = vector.extract_strided_slice %54 {offsets = [0, 0], sizes = [1, 40], strides = [1, 1]} : vector<3x40xf32> to vector<1x40xf32>
    %64 = arith.mulf %62, %63 : vector<1x40xf32>
    %65 = vector.extract_strided_slice %45 {offsets = [0, 0], sizes = [1, 40], strides = [1, 1]} : vector<3x40xf32> to vector<1x40xf32>
    %66 = vector.extract_strided_slice %54 {offsets = [2, 0], sizes = [1, 40], strides = [1, 1]} : vector<3x40xf32> to vector<1x40xf32>
    %67 = arith.mulf %65, %66 : vector<1x40xf32>
    %68 = arith.subf %64, %67 : vector<1x40xf32>
    %69 = vector.extract_strided_slice %45 {offsets = [0, 0], sizes = [1, 40], strides = [1, 1]} : vector<3x40xf32> to vector<1x40xf32>
    %70 = vector.extract_strided_slice %54 {offsets = [1, 0], sizes = [1, 40], strides = [1, 1]} : vector<3x40xf32> to vector<1x40xf32>
    %71 = arith.mulf %69, %70 : vector<1x40xf32>
    %72 = vector.extract_strided_slice %45 {offsets = [1, 0], sizes = [1, 40], strides = [1, 1]} : vector<3x40xf32> to vector<1x40xf32>
    %73 = vector.extract_strided_slice %54 {offsets = [0, 0], sizes = [1, 40], strides = [1, 1]} : vector<3x40xf32> to vector<1x40xf32>
    %74 = arith.mulf %72, %73 : vector<1x40xf32>
    %75 = arith.subf %71, %74 : vector<1x40xf32>
    %76 = tpu.concatenate %61, %68, %75 in 0 : vector<1x40xf32>, vector<1x40xf32>, vector<1x40xf32> -> vector<3x40xf32>
    %c0_18 = arith.constant 0 : index
    %c0_19 = arith.constant 0 : index
    %77 = vector.load %arg8[%c0_18, %c0_19] : memref<128x128xbf16, #tpu.memory_space<vmem>>, vector<128x128xbf16>
    %78 = arith.truncf %8 : vector<128x40xf32> to vector<128x40xbf16>
    %cst_20 = arith.constant dense<0.000000e+00> : vector<128x40xf32>
    %79 = tpu.matmul %77, %78, %cst_20 {dimension_numbers = #tpu.dot_dimension_numbers<[1], [0], [0], [1], [0, 0, 1, 1], [], []>} : vector<128x128xbf16>, vector<128x40xbf16>, vector<128x40xf32> -> vector<128x40xf32>
    %c0_21 = arith.constant 0 : index
    %c0_22 = arith.constant 0 : index
    %80 = vector.load %arg9[%c0_21, %c0_22] : memref<128x128xbf16, #tpu.memory_space<vmem>>, vector<128x128xbf16>
    %81 = arith.truncf %10 : vector<128x40xf32> to vector<128x40xbf16>
    %cst_23 = arith.constant dense<0.000000e+00> : vector<128x40xf32>
    %82 = tpu.matmul %80, %81, %cst_23 {dimension_numbers = #tpu.dot_dimension_numbers<[1], [0], [0], [1], [0, 0, 1, 1], [], []>} : vector<128x128xbf16>, vector<128x40xbf16>, vector<128x40xf32> -> vector<128x40xf32>
    %83 = arith.addf %79, %82 : vector<128x40xf32>
    %c0_24 = arith.constant 0 : index
    %c0_25 = arith.constant 0 : index
    %84 = vector.load %arg11[%c0_24, %c0_25] : memref<128x128xbf16, #tpu.memory_space<vmem>>, vector<128x128xbf16>
    %c0_26 = arith.constant 0 : index
    %c0_27 = arith.constant 0 : index
    %85 = vector.load %arg3[%c0_26, %c0_27] : memref<128x40xf32, #tpu.memory_space<vmem>>, vector<128x40xf32>
    %86 = arith.truncf %85 : vector<128x40xf32> to vector<128x40xbf16>
    %cst_28 = arith.constant dense<0.000000e+00> : vector<128x40xf32>
    %87 = tpu.matmul %84, %86, %cst_28 {dimension_numbers = #tpu.dot_dimension_numbers<[1], [0], [0], [1], [0, 0, 1, 1], [], []>} : vector<128x128xbf16>, vector<128x40xbf16>, vector<128x40xf32> -> vector<128x40xf32>
    %88 = arith.addf %83, %87 : vector<128x40xf32>
    %c0_29 = arith.constant 0 : index
    %c0_30 = arith.constant 0 : index
    %89 = vector.load %arg10[%c0_29, %c0_30] : memref<128x1xf32, #tpu.memory_space<vmem>>, vector<128x1xf32>
    %90 = vector.broadcast %89 : vector<128x1xf32> to vector<128x40xf32>
    %91 = vector.broadcast %16 : vector<1x40xf32> to vector<128x40xf32>
    %92 = arith.mulf %90, %91 : vector<128x40xf32>
    %93 = arith.addf %88, %92 : vector<128x40xf32>
    %c0_31 = arith.constant 0 : index
    %c0_32 = arith.constant 0 : index
    %94 = vector.load %arg12[%c0_31, %c0_32] : memref<128x1xf32, #tpu.memory_space<vmem>>, vector<128x1xf32>
    %95 = vector.broadcast %94 : vector<128x1xf32> to vector<128x40xf32>
    %96 = arith.addf %93, %95 : vector<128x40xf32>
    %97 = arith.negf %96 : vector<128x40xf32>
    %98 = math.exp %97 : vector<128x40xf32>
    %cst_33 = arith.constant 1.000000e+00 : f32
    %99 = vector.broadcast %cst_33 : f32 to vector<128x40xf32>
    %100 = arith.addf %99, %98 : vector<128x40xf32>
    %101 = arith.divf %99, %100 : vector<128x40xf32>
    %102 = arith.mulf %96, %101 : vector<128x40xf32>
    %c0_34 = arith.constant 0 : index
    %c0_35 = arith.constant 0 : index
    %103 = vector.load %arg13[%c0_34, %c0_35] : memref<128x128xbf16, #tpu.memory_space<vmem>>, vector<128x128xbf16>
    %104 = arith.truncf %102 : vector<128x40xf32> to vector<128x40xbf16>
    %cst_36 = arith.constant dense<0.000000e+00> : vector<128x40xf32>
    %105 = tpu.matmul %103, %104, %cst_36 {dimension_numbers = #tpu.dot_dimension_numbers<[1], [0], [0], [1], [0, 0, 1, 1], [], []>} : vector<128x128xbf16>, vector<128x40xbf16>, vector<128x40xf32> -> vector<128x40xf32>
    %c0_37 = arith.constant 0 : index
    %c0_38 = arith.constant 0 : index
    %106 = vector.load %arg14[%c0_37, %c0_38] : memref<128x1xf32, #tpu.memory_space<vmem>>, vector<128x1xf32>
    %107 = vector.broadcast %106 : vector<128x1xf32> to vector<128x40xf32>
    %108 = arith.addf %105, %107 : vector<128x40xf32>
    %109 = arith.negf %108 : vector<128x40xf32>
    %110 = math.exp %109 : vector<128x40xf32>
    %cst_39 = arith.constant 1.000000e+00 : f32
    %111 = vector.broadcast %cst_39 : f32 to vector<128x40xf32>
    %112 = arith.addf %111, %110 : vector<128x40xf32>
    %113 = arith.divf %111, %112 : vector<128x40xf32>
    %114 = arith.mulf %108, %113 : vector<128x40xf32>
    %115 = arith.truncf %114 : vector<128x40xf32> to vector<128x40xbf16>
    %c0_40 = arith.constant 0 : index
    %c0_41 = arith.constant 0 : index
    %116 = vector.load %arg15[%c0_40, %c0_41] : memref<128x128xbf16, #tpu.memory_space<vmem>>, vector<128x128xbf16>
    %cst_42 = arith.constant dense<0.000000e+00> : vector<128x40xf32>
    %117 = tpu.matmul %116, %115, %cst_42 {dimension_numbers = #tpu.dot_dimension_numbers<[1], [0], [0], [1], [0, 0, 1, 1], [], []>} : vector<128x128xbf16>, vector<128x40xbf16>, vector<128x40xf32> -> vector<128x40xf32>
    %c0_43 = arith.constant 0 : index
    %c0_44 = arith.constant 0 : index
    %118 = vector.load %arg16[%c0_43, %c0_44] : memref<128x1xf32, #tpu.memory_space<vmem>>, vector<128x1xf32>
    %119 = vector.broadcast %118 : vector<128x1xf32> to vector<128x40xf32>
    %120 = arith.addf %117, %119 : vector<128x40xf32>
    %121 = arith.negf %120 : vector<128x40xf32>
    %122 = math.exp %121 : vector<128x40xf32>
    %cst_45 = arith.constant 1.000000e+00 : f32
    %123 = vector.broadcast %cst_45 : f32 to vector<128x40xf32>
    %124 = arith.addf %123, %122 : vector<128x40xf32>
    %125 = arith.divf %123, %124 : vector<128x40xf32>
    %126 = arith.mulf %120, %125 : vector<128x40xf32>
    %c0_46 = arith.constant 0 : index
    %c0_47 = arith.constant 0 : index
    %127 = vector.load %arg17[%c0_46, %c0_47] : memref<8x128xbf16, #tpu.memory_space<vmem>>, vector<8x128xbf16>
    %128 = arith.truncf %126 : vector<128x40xf32> to vector<128x40xbf16>
    %cst_48 = arith.constant dense<0.000000e+00> : vector<8x40xf32>
    %129 = tpu.matmul %127, %128, %cst_48 {dimension_numbers = #tpu.dot_dimension_numbers<[1], [0], [0], [1], [0, 0, 1, 1], [], []>} : vector<8x128xbf16>, vector<128x40xbf16>, vector<8x40xf32> -> vector<8x40xf32>
    %130 = vector.extract_strided_slice %129 {offsets = [0, 0], sizes = [1, 40], strides = [1, 1]} : vector<8x40xf32> to vector<1x40xf32>
    %131 = vector.broadcast %130 : vector<1x40xf32> to vector<3x40xf32>
    %132 = arith.mulf %45, %131 : vector<3x40xf32>
    %133 = vector.extract_strided_slice %129 {offsets = [1, 0], sizes = [1, 40], strides = [1, 1]} : vector<8x40xf32> to vector<1x40xf32>
    %134 = vector.broadcast %133 : vector<1x40xf32> to vector<3x40xf32>
    %135 = arith.mulf %54, %134 : vector<3x40xf32>
    %136 = arith.addf %132, %135 : vector<3x40xf32>
    %137 = vector.extract_strided_slice %129 {offsets = [2, 0], sizes = [1, 40], strides = [1, 1]} : vector<8x40xf32> to vector<1x40xf32>
    %138 = vector.broadcast %137 : vector<1x40xf32> to vector<3x40xf32>
    %139 = arith.mulf %76, %138 : vector<3x40xf32>
    %140 = arith.addf %136, %139 : vector<3x40xf32>
    %cst_49 = arith.constant -1.000000e+02 : f32
    %cst_50 = arith.constant 1.000000e+02 : f32
    %141 = vector.broadcast %cst_49 : f32 to vector<3x40xf32>
    %142 = arith.maximumf %141, %140 : vector<3x40xf32>
    %143 = vector.broadcast %cst_50 : f32 to vector<3x40xf32>
    %144 = arith.minimumf %143, %142 : vector<3x40xf32>
    %cst_51 = arith.constant 0.000000e+00 : f32
    %145 = vector.broadcast %cst_51 : f32 to vector<5x40xf32>
    %146 = tpu.concatenate %144, %145 in 0 : vector<3x40xf32>, vector<5x40xf32> -> vector<8x40xf32>
    %cst_52 = arith.constant dense<0.000000e+00> : vector<8x16xf32>
    %147 = tpu.matmul %146, %5, %cst_52 {dimension_numbers = #tpu.dot_dimension_numbers<[1], [0], [0], [1], [0, 0, 1, 1], [], []>} : vector<8x40xf32>, vector<40x16xf32>, vector<8x16xf32> -> vector<8x16xf32>
    %c0_53 = arith.constant 0 : index
    %c0_54 = arith.constant 0 : index
    %148 = vector.load %arg7[%c0_53, %c0_54] : memref<1x16xf32, #tpu.memory_space<vmem>>, vector<1x16xf32>
    %149 = vector.broadcast %148 : vector<1x16xf32> to vector<8x16xf32>
    %150 = arith.mulf %147, %149 : vector<8x16xf32>
    %c0_55 = arith.constant 0 : index
    %c0_56 = arith.constant 0 : index
    %151 = vector.load %arg18[%c0_55, %c0_56] : memref<128x128xbf16, #tpu.memory_space<vmem>>, vector<128x128xbf16>
    %cst_57 = arith.constant dense<0.000000e+00> : vector<128x16xf32>
    %152 = tpu.matmul %151, %6, %cst_57 {dimension_numbers = #tpu.dot_dimension_numbers<[1], [0], [0], [1], [0, 0, 1, 1], [], []>} : vector<128x128xbf16>, vector<128x16xbf16>, vector<128x16xf32> -> vector<128x16xf32>
    %c0_58 = arith.constant 0 : index
    %c0_59 = arith.constant 0 : index
    %153 = vector.load %arg19[%c0_58, %c0_59] : memref<128x1xf32, #tpu.memory_space<vmem>>, vector<128x1xf32>
    %154 = vector.broadcast %153 : vector<128x1xf32> to vector<128x16xf32>
    %155 = arith.addf %152, %154 : vector<128x16xf32>
    %156 = arith.negf %155 : vector<128x16xf32>
    %157 = math.exp %156 : vector<128x16xf32>
    %cst_60 = arith.constant 1.000000e+00 : f32
    %158 = vector.broadcast %cst_60 : f32 to vector<128x16xf32>
    %159 = arith.addf %158, %157 : vector<128x16xf32>
    %160 = arith.divf %158, %159 : vector<128x16xf32>
    %161 = arith.mulf %155, %160 : vector<128x16xf32>
    %c0_61 = arith.constant 0 : index
    %c0_62 = arith.constant 0 : index
    %162 = vector.load %arg20[%c0_61, %c0_62] : memref<8x128xbf16, #tpu.memory_space<vmem>>, vector<8x128xbf16>
    %163 = arith.truncf %161 : vector<128x16xf32> to vector<128x16xbf16>
    %cst_63 = arith.constant dense<0.000000e+00> : vector<8x16xf32>
    %164 = tpu.matmul %162, %163, %cst_63 {dimension_numbers = #tpu.dot_dimension_numbers<[1], [0], [0], [1], [0, 0, 1, 1], [], []>} : vector<8x128xbf16>, vector<128x16xbf16>, vector<8x16xf32> -> vector<8x16xf32>
    %c0_64 = arith.constant 0 : index
    %c0_65 = arith.constant 0 : index
    %165 = vector.load %arg21[%c0_64, %c0_65] : memref<8x1xf32, #tpu.memory_space<vmem>>, vector<8x1xf32>
    %166 = vector.broadcast %165 : vector<8x1xf32> to vector<8x16xf32>
    %167 = arith.addf %164, %166 : vector<8x16xf32>
    %cst_66 = arith.constant 1.000000e+00 : f32
    %168 = vector.broadcast %cst_66 : f32 to vector<8x16xf32>
    %169 = arith.mulf %150, %168 : vector<8x16xf32>
    %170 = arith.addf %1, %169 : vector<8x16xf32>
    %171 = arith.mulf %167, %2 : vector<8x16xf32>
    %172 = arith.addf %170, %171 : vector<8x16xf32>
    %c0_67 = arith.constant 0 : index
    %c0_68 = arith.constant 0 : index
    %173 = vector.load %arg28[%c0_67, %c0_68] : memref<8x16xf32, #tpu.memory_space<vmem>>, vector<8x16xf32>
    tpu.vector_store %arg28[%c0_67, %c0_68], %172 {strides = array<i32>} : memref<8x16xf32, #tpu.memory_space<vmem>>, vector<8x16xf32>,
    %174 = arith.truncf %5 : vector<40x16xf32> to vector<40x16xbf16>
    %cst_69 = arith.constant dense<0.000000e+00> : vector<128x16xf32>
    %175 = tpu.matmul %115, %174, %cst_69 {dimension_numbers = #tpu.dot_dimension_numbers<[1], [0], [0], [1], [0, 0, 1, 1], [], []>} : vector<128x40xbf16>, vector<40x16xbf16>, vector<128x16xf32> -> vector<128x16xf32>
    %c0_70 = arith.constant 0 : index
    %c0_71 = arith.constant 0 : index
    %176 = vector.load %arg22[%c0_70, %c0_71] : memref<128x128xbf16, #tpu.memory_space<vmem>>, vector<128x128xbf16>
    %cst_72 = arith.constant dense<0.000000e+00> : vector<128x16xf32>
    %177 = tpu.matmul %176, %6, %cst_72 {dimension_numbers = #tpu.dot_dimension_numbers<[1], [0], [0], [1], [0, 0, 1, 1], [], []>} : vector<128x128xbf16>, vector<128x16xbf16>, vector<128x16xf32> -> vector<128x16xf32>
    %c0_73 = arith.constant 0 : index
    %c0_74 = arith.constant 0 : index
    %178 = vector.load %arg23[%c0_73, %c0_74] : memref<128x128xbf16, #tpu.memory_space<vmem>>, vector<128x128xbf16>
    %179 = arith.truncf %175 : vector<128x16xf32> to vector<128x16xbf16>
    %cst_75 = arith.constant dense<0.000000e+00> : vector<128x16xf32>
    %180 = tpu.matmul %178, %179, %cst_75 {dimension_numbers = #tpu.dot_dimension_numbers<[1], [0], [0], [1], [0, 0, 1, 1], [], []>} : vector<128x128xbf16>, vector<128x16xbf16>, vector<128x16xf32> -> vector<128x16xf32>
    %181 = arith.addf %177, %180 : vector<128x16xf32>
    %c0_76 = arith.constant 0 : index
    %c0_77 = arith.constant 0 : index
    %182 = vector.load %arg24[%c0_76, %c0_77] : memref<128x1xf32, #tpu.memory_space<vmem>>, vector<128x1xf32>
    %183 = vector.broadcast %182 : vector<128x1xf32> to vector<128x16xf32>
    %184 = arith.addf %181, %183 : vector<128x16xf32>
    %185 = arith.negf %184 : vector<128x16xf32>
    %186 = math.exp %185 : vector<128x16xf32>
    %cst_78 = arith.constant 1.000000e+00 : f32
    %187 = vector.broadcast %cst_78 : f32 to vector<128x16xf32>
    %188 = arith.addf %187, %186 : vector<128x16xf32>
    %189 = arith.divf %187, %188 : vector<128x16xf32>
    %190 = arith.mulf %184, %189 : vector<128x16xf32>
    %c0_79 = arith.constant 0 : index
    %c0_80 = arith.constant 0 : index
    %191 = vector.load %arg25[%c0_79, %c0_80] : memref<128x128xbf16, #tpu.memory_space<vmem>>, vector<128x128xbf16>
    %192 = arith.truncf %190 : vector<128x16xf32> to vector<128x16xbf16>
    %cst_81 = arith.constant dense<0.000000e+00> : vector<128x16xf32>
    %193 = tpu.matmul %191, %192, %cst_81 {dimension_numbers = #tpu.dot_dimension_numbers<[1], [0], [0], [1], [0, 0, 1, 1], [], []>} : vector<128x128xbf16>, vector<128x16xbf16>, vector<128x16xf32> -> vector<128x16xf32>
    %c0_82 = arith.constant 0 : index
    %c0_83 = arith.constant 0 : index
    %194 = vector.load %arg26[%c0_82, %c0_83] : memref<128x1xf32, #tpu.memory_space<vmem>>, vector<128x1xf32>
    %195 = vector.broadcast %194 : vector<128x1xf32> to vector<128x16xf32>
    %196 = arith.addf %193, %195 : vector<128x16xf32>
    %197 = arith.addf %0, %196 : vector<128x16xf32>
    %c0_84 = arith.constant 0 : index
    %c0_85 = arith.constant 0 : index
    %198 = vector.load %arg27[%c0_84, %c0_85] : memref<128x16xf32, #tpu.memory_space<vmem>>, vector<128x16xf32>
    tpu.vector_store %arg27[%c0_84, %c0_85], %197 {strides = array<i32>} : memref<128x16xf32, #tpu.memory_space<vmem>>, vector<128x16xf32>,
    return
  }
}

module attributes {stable_mosaic.version = 11 : i64} {
  func.func @_cdist_kernel(%arg0: memref<16x8xf32, #tpu.memory_space<vmem>>, %arg1: memref<8x16xf32, #tpu.memory_space<vmem>>, %arg2: memref<16x16xf32, #tpu.memory_space<vmem>>) attributes {dimension_semantics = [], scalar_prefetch = 0 : i64, scratch_operands = 0 : i64, tpu.core_type = #tpu.core_type<tc>} {
    %c0 = arith.constant 0 : index
    %c0_0 = arith.constant 0 : index
    %0 = vector.load %arg0[%c0, %c0_0] : memref<16x8xf32, #tpu.memory_space<vmem>>, vector<16x8xf32>
    %c0_1 = arith.constant 0 : index
    %c0_2 = arith.constant 0 : index
    %1 = vector.load %arg1[%c0_1, %c0_2] : memref<8x16xf32, #tpu.memory_space<vmem>>, vector<8x16xf32>
    %cst = arith.constant dense<0.000000e+00> : vector<16x16xf32>
    %2 = tpu.matmul %0, %1, %cst {dimension_numbers = #tpu.dot_dimension_numbers<[1], [0], [0], [1], [0, 0, 1, 1], [], []>} : vector<16x8xf32>, vector<8x16xf32>, vector<16x16xf32> -> vector<16x16xf32>
    %3 = arith.mulf %0, %0 : vector<16x8xf32>
    %cst_3 = arith.constant dense<0.000000e+00> : vector<16xf32>
    %4 = vector.multi_reduction <add>, %3, %cst_3 [1] : vector<16x8xf32> to vector<16xf32>
    %5 = vector.shape_cast %4 : vector<16xf32> to vector<16x1xf32>
    %6 = arith.mulf %1, %1 : vector<8x16xf32>
    %cst_4 = arith.constant dense<0.000000e+00> : vector<16xf32>
    %7 = vector.multi_reduction <add>, %6, %cst_4 [0] : vector<8x16xf32> to vector<16xf32>
    %8 = vector.shape_cast %7 : vector<16xf32> to vector<1x16xf32>
    %9 = vector.broadcast %5 : vector<16x1xf32> to vector<16x16xf32>
    %10 = vector.broadcast %8 : vector<1x16xf32> to vector<16x16xf32>
    %11 = arith.addf %9, %10 : vector<16x16xf32>
    %cst_5 = arith.constant 2.000000e+00 : f32
    %12 = vector.broadcast %cst_5 : f32 to vector<16x16xf32>
    %13 = arith.mulf %12, %2 : vector<16x16xf32>
    %14 = arith.subf %11, %13 : vector<16x16xf32>
    %cst_6 = arith.constant 0.000000e+00 : f32
    %15 = vector.broadcast %cst_6 : f32 to vector<16x16xf32>
    %16 = arith.maximumf %14, %15 : vector<16x16xf32>
    %17 = math.sqrt %16 : vector<16x16xf32>
    %c0_7 = arith.constant 0 : index
    %c0_8 = arith.constant 0 : index
    %18 = vector.load %arg2[%c0_7, %c0_8] : memref<16x16xf32, #tpu.memory_space<vmem>>, vector<16x16xf32>
    tpu.vector_store %arg2[%c0_7, %c0_8], %17 {strides = array<i32>} : memref<16x16xf32, #tpu.memory_space<vmem>>, vector<16x16xf32>,
    return
  }
}

</mosaic_0001>

<bundles_post_ra>
// kernel: clofnet_forward.11
= control target key start
LH: loop header
LB: loop body
LE: loop exit
PB: predicated region body
PF: predicated region fallthrough
CT: control target
= control target key end

     0   :  { %vm15_vm0 = vcmask 64512   ;;  %s237_s0 = inlined_call_operand.vmem [shape: f32[16,8], index: 0, kind: input, shape index: {}]   ;;  %s238_s1 = inlined_call_operand.vmem [shape: f32[8,16], index: 1, kind: input, shape index: {}]   ;;  %s239_s2 = inlined_call_operand.hbm [shape: f32[16,16], index: 2, kind: output, shape index: {}]  }
   0x1   :  { %v14_v0 = vld [vmem:[%s238_s1] sm:$0xff]  ;;  %v13_v2 = vld [vmem:[%s237_s0 + $0x8] sm:$0xff] }
   0x2   :  { %v12_v1 = vld [vmem:[%s237_s0] sm:$0xff]  ;;  %159 = vmatprep.subr.mxu0 %v14_v0  ;;  %v98_v4 = vmul.f32 %v13_v2, %v13_v2 }
   0x3   :  { %161 = vmatprep.mubr.msk.f32.mxu0 %vm15_vm0, %v12_v1  ;;  %v97_v3 = vmul.f32 %v12_v1, %v12_v1 }
   0x4   :  { %7 = vsyncpa [#allocation3], 0  ;;  %160 = vmatpush3.msra.mxu0 %v14_v0  ;;  %v102_v6 = vsel %vm15_vm0, %v98_v4, 0.0  ;;  %v105_v7 = vmul.f32 %v14_v0, %v14_v0  ;;  %vm106_vm1 = vcmask 130048   ;;  %s195_s0 = smov [#allocation2]  }
   0x5   :  { %162 = vmatmul.mubr.msk.f32.vlgmr.msra.gmra.mrb[0].mxu0 %vm15_vm0, %v13_v2  ;;  %v99_v5 = vsel %vm15_vm0, %v97_v3, 0.0  ;;  %s143_s1 = sshll.u32 %s195_s0, 4  ;;  %s144_s1 = int_to_ptr.vmem [resolvable:$true] %s143_s1 }
   0x6   :  { %100 = vadd.xlane.f32.xlu0 %v99_v5  ;;  %v107_v8 = vsel %vm106_vm1, %v105_v7, 0.0  ;;  %s171_s15 = scalar_lea.vmem %s144_s1, 256  ;;  %p176_p1 = scmp.lt.s32.totalorder %s144_s1, %s144_s1 }
   0x7   :  { %v108_v9 = vrot.slane %v107_v8, 4  ;;  %p172_p0 = scmp.ne.s32.totalorder %s144_s1, %s171_s15  ;;  %p177_p2 = scmp.lt.s32.totalorder %s171_s15, %s171_s15 }
   0x9   :  { %v109_v10 = vadd.f32 %v108_v9, %v107_v8  ;;  %p178_p3 = por %p177_p2, %p176_p1 }
   0xa   :  { %103 = vadd.xlane.f32.xlu0 %v102_v6 }
   0xb   :  { %v110_v11 = vrot.slane %v109_v10, 2  ;;  %p179_p4 = pnand %p178_p3, %p172_p0 }
   0xd   :  { %v111_v12 = vadd.f32 %v110_v11, %v109_v10 }
   0xf   :  { %v112_v14 = vrot.slane %v111_v12, 1 }
  0x11   :  { %v113_v16 = vadd.f32 %v112_v14, %v111_v12 }
  0x93   :  { %v101_v13 = vpop.xlane.xlu0 %100 }
  0x94   :  { %v114_v21 = vadd.f32 %v113_v16, %v101_v13 }
  0x97   :  { %v104_v15 = vpop.xlane.xlu0 %103 }
  0x98   :  { %v115_v17 = vadd.f32 %v113_v16, %v104_v15 }
  0xd8   :  { %v163_v18 = vpop.f32.mrb[0].mxu0 }
  0xd9   :  { %v117_v19 = vmul.f32 2.0, %v163_v18  ;;  %v88_v20 = vpop.f32.mrb[1].mxu0 }
  0xda   :  { %v116_v22 = vmul.f32 2.0, %v88_v20 }
  0xdb   :  { %v119_v23 = vsub.f32 %v115_v17, %v117_v19 }
  0xdc   :  { %v118_v24 = vsub.f32 %v114_v21, %v116_v22 }
  0xdd   :  { %v121_v25 = vmax.f32 %v119_v23, 0.0 }
  0xde   :  { %v120_v26 = vmax.f32 %v118_v24, 0.0 }
  0xdf   :  { %167 = vrsqrt.f32 %v121_v25  ;;  %vm131_vm2 = vcmp.eq.f32.partialorder %v121_v25, inf  ;;  %v134_v31 = vand.u32 2147483648, %v121_v25  ;;  %vm133_vm4 = vcmp.eq.f32.partialorder %v121_v25, 0.0 }
  0xe0   :  { %169 = vrsqrt.f32 %v120_v26  ;;  %vm124_vm3 = vcmp.eq.f32.partialorder %v120_v26, inf  ;;  %v127_v32 = vand.u32 2147483648, %v120_v26  ;;  %vm126_vm5 = vcmp.eq.f32.partialorder %v120_v26, 0.0 }
  0xe9   :  { %v168_v27 = vpop.eup %167 }
  0xea   :  { %v170_v28 = vpop.eup %169  ;;  %v130_v29 = vmul.f32 %v168_v27, %v121_v25 }
  0xeb   :  { %v123_v30 = vmul.f32 %v170_v28, %v120_v26 }
  0xec   :  { %v132_v33 = vsel %vm131_vm2, %v121_v25, %v130_v29 }
  0xed   :  { %v125_v34 = vsel %vm124_vm3, %v120_v26, %v123_v30  ;;  %v135_v35 = vsel %vm133_vm4, %v134_v31, %v132_v33 }
  0xee   :  { %v128_v36 = vsel %vm126_vm5, %v127_v32, %v125_v34  ;;  %137 = vst.msk [vmem:[#allocation2 + $0x8] sm:$0xff] %vm106_vm1, %v135_v35 }
  0xef   :  { %136 = vst.msk [vmem:[#allocation2] sm:$0xff] %vm106_vm1, %v128_v36 }
  0xf0   :  { %182 = shalt.err (!%p179_p4)
}
  0xf1   :  { %s183_s18 = scalar_lea.hbm %s239_s2, 256 }
  0xf2   :  { %p184_p5 = scmp.ne.s32.totalorder %s239_s2, %s183_s18  ;;  %p187_p6 = scmp.lt.u32.totalorder %s183_s18, %s239_s2 }
  0xf4   :  { %p189_p7 = pnand %p187_p6, %p184_p5 }
  0xf6   :  { %192 = shalt.err (!%p189_p7)
}
  0xf7   :  { %s196_s23 = smov 128   ;;  %s197_s24 = smov 8  }
  0xf8   :  { %149 = dma.vmem_to_hbm [thread:$0]  %s144_s1, 256, %s239_s2, [#allocation3], %s196_s23, %s196_s23, %s197_s24  }
  0xf9   :  { %193 = dma.done.wait [#allocation3], 256  }
  0xfa   :  { %194 = vsyncadd [#allocation3], 4294967040 }
  0xfb   :  { %153 = vsyncpa [#allocation3], 1 }

// kernel: clofnet_forward.6
= control target key start
LH: loop header
LB: loop body
LE: loop exit
PB: predicated region body
PF: predicated region fallthrough
CT: control target
= control target key end

     0   :  { %v2664_v0 = vmov 0.0|0.0   ;;  %vm2665_vm0 = vmmov 0   ;;  %v2666_v3 = vmov 0.0   ;;  %vm330_vm1 = vcmask 130048   ;;  %s3739_s5 = inlined_call_operand.vmem [shape: f32[16,40], index: 5, kind: input, shape index: {}]   ;;  %s3740_s6 = inlined_call_operand.vmem [shape: f32[16,40], index: 6, kind: input, shape index: {}]   ;;  %s3741_s3 = inlined_call_operand.vmem [shape: f32[8,16], index: 3, kind: input, shape index: {}]   ;;  %s3742_s4 = inlined_call_operand.vmem [shape: f32[8,16], index: 4, kind: input, shape index: {}]   ;;  %s3743_s11 = inlined_call_operand.vmem [shape: f32[128,1], index: 11, kind: input, shape index: {}]   ;;  %s3744_s2 = inlined_call_operand.vmem [shape: f32[128,1], index: 2, kind: input, shape index: {}]   ;;  %s3745_s0 = inlined_call_operand.vmem [shape: f32[8,16], index: 0, kind: input, shape index: {}]   ;;  %s3746_s1 = inlined_call_operand.vmem [shape: bf16[128,8], index: 1, kind: input, shape index: {}]   ;;  %s3747_s13 = inlined_call_operand.vmem [shape: f32[128,1], index: 13, kind: input, shape index: {}]   ;;  %s3748_s8 = inlined_call_operand.vmem [shape: f32[128,1], index: 8, kind: input, shape index: {}]   ;;  %s3749_s10 = inlined_call_operand.vmem [shape: bf16[128,14], index: 10, kind: input, shape index: {}]   ;;  %s3750_s9 = inlined_call_operand.vmem [shape: f32[128,1], index: 9, kind: input, shape index: {}]   ;;  %s3751_s14 = inlined_call_operand.vmem [shape: f32[128,16], index: 14, kind: output, shape index: {0}]   ;;  %s3752_s12 = inlined_call_operand.vmem [shape: bf16[128,128], index: 12, kind: input, shape index: {}]   ;;  %s3753_s7 = inlined_call_operand.vmem [shape: f32[1,40], index: 7, kind: input, shape index: {}]   ;;  %s3754_s15 = inlined_call_operand.vmem [shape: f32[128,40], index: 15, kind: output, shape index: {1}]  }
   0x1   :  { %2396 = vmatprep.subr.bf16.mxu1 %v2664_v0  ;;  %v349_v1 = vld [vmem:[%s3739_s5] sm:$0xff]  ;;  %v350_v2 = vld [vmem:[%s3739_s5 + $0x8] sm:$0xff]  ;;  %2322 = vmatprep.mubr.msk.f32.mxu1 %vm2665_vm0, %v2666_v3  ;;  %v2667_v10 = vmov 0   ;;  %v933_v12 = vld [vmem:[%s3743_s11 + $0x10] sm:$0xff]  ;;  %vm229_vm2 = vcmask 1043456   ;;  %vm204_vm3 = vcmask 64512  }
   0x2   :  { %v2397_v4 = vpack.c.bf16 %v350_v2, %v349_v1  ;;  %v351_v5 = vld [vmem:[%s3740_s6] sm:$0xff]  ;;  %v352_v6 = vld [vmem:[%s3740_s6 + $0x8] sm:$0xff]  ;;  %2430 = vset.pattern.permute.xlu0 %v2667_v10  ;;  %2431 = vset.pattern.permute.xlu1 %v2667_v10  ;;  %v934_v14 = vld [vmem:[%s3743_s11 + $0x18] sm:$0xff]  ;;  %vm641_vm4 = vcmask 326656   ;;  %vm678_vm5 = vcmask 1040384   ;;  %vm680_vm6 = vcmask 1041408  }
   0x3   :  { %v347_v7 = vld [vmem:[%s3741_s3] sm:$0xff]  ;;  %v2400_v8 = vpack.c.bf16 %v352_v6, %v351_v5  ;;  %v932_v13 = vld [vmem:[%s3743_s11 + $0x8] sm:$0xff]  ;;  %959 = vperm.xlu1 %2431, %v933_v12   ;;  %v937_v17 = vld [vmem:[%s3743_s11 + $0x30] sm:$0xff]  ;;  %vm693_vm7 = vcmask 321536   ;;  %vm1067_vm10 = vcmask 113664   ;;  %vm912_vm13 = vcmask 1042432  }
   0x4   :  { %2398 = vmatpush3.bf16.msra.mxu1 %v2397_v4  ;;  %v348_v9 = vld [vmem:[%s3742_s4] sm:$0xff]  ;;  %v936_v16 = vld [vmem:[%s3743_s11 + $0x28] sm:$0xff]  ;;  %v938_v18 = vld [vmem:[%s3743_s11 + $0x38] sm:$0xff] }
   0x5   :  { %2399 = vmatprep.subr.bf16.mxu1 %v2664_v0  ;;  %v931_v11 = vld [vmem:[%s3743_s11] sm:$0xff]  ;;  %v940_v20 = vld [vmem:[%s3743_s11 + $0x48] sm:$0xff]  ;;  %v941_v21 = vld [vmem:[%s3743_s11 + $0x50] sm:$0xff] }
   0x6   :  { %949 = vperm.xlu0 %2430, %v931_v11   ;;  %v935_v15 = vld [vmem:[%s3743_s11 + $0x20] sm:$0xff]  ;;  %v942_v22 = vld [vmem:[%s3743_s11 + $0x58] sm:$0xff]  ;;  %v944_v24 = vld [vmem:[%s3743_s11 + $0x68] sm:$0xff] }
   0x7   :  { %2323 = vmatmul.mubr.msk.f32.vlgmr.msra.gmra.mrb[0].mxu1 %vm330_vm1, %v347_v7  ;;  %964 = vperm.xlu1 %2431, %v934_v14   ;;  %v939_v19 = vld [vmem:[%s3743_s11 + $0x40] sm:$0xff]  ;;  %v945_v25 = vld [vmem:[%s3743_s11 + $0x70] sm:$0xff]  ;;  %v946_v26 = vld [vmem:[%s3743_s11 + $0x78] sm:$0xff] }
   0x8   :  { %2401 = vmatpush3.bf16.msra.mxu1 %v2400_v8  ;;  %2329 = vmatprep.mubr.msk.f32.mxu1 %vm2665_vm0, %v2666_v3  ;;  %v943_v23 = vld [vmem:[%s3743_s11 + $0x60] sm:$0xff]  ;;  %v69_v29 = vld [vmem:[%s3744_s2 + $0x8] sm:$0xff]  ;;  %v70_v30 = vld [vmem:[%s3744_s2 + $0x10] sm:$0xff] }
   0x9   :  { %2402 = vmatprep.subr.bf16.mxu1 %v2664_v0  ;;  %v68_v27 = vld [vmem:[%s3744_s2] sm:$0xff]  ;;  %v2433_v34 = vld [vmem:[%s3746_s1 + $0x8] sm:$0xff]   ;;  %v71_v35 = vld [vmem:[%s3744_s2 + $0x18] sm:$0xff] }
   0xa   :  { %954 = vperm.xlu0 %2430, %v932_v13   ;;  %v66_v28 = vld [vmem:[%s3745_s0] sm:$0xff]  ;;  %v2434_v36 = vld [vmem:[%s3746_s1 + $0x10] sm:$0xff]   ;;  %v73_v38 = vld [vmem:[%s3744_s2 + $0x28] sm:$0xff] }
   0xb   :  { %2330 = vmatmul.mubr.msk.f32.vlgmr.msra.gmra.mrb[2].mxu1 %vm330_vm1, %v347_v7  ;;  %974 = vperm.xlu1 %2431, %v936_v16   ;;  %v67_v31 = vpack.c.bf16 %v66_v28, %v66_v28  ;;  %v2432_v32 = vld [vmem:[%s3746_s1] sm:$0xff]   ;;  %v74_v39 = vld [vmem:[%s3744_s2 + $0x30] sm:$0xff]  ;;  %v2435_v40 = vld [vmem:[%s3746_s1 + $0x18] sm:$0xff]  }
   0xc   :  { %2404 = vmatpush3.bf16.msra.mxu1 %v2397_v4  ;;  %2336 = vmatprep.mubr.msk.f32.mxu1 %vm2665_vm0, %v2666_v3  ;;  %v72_v37 = vld [vmem:[%s3744_s2 + $0x20] sm:$0xff]  ;;  %v75_v42 = vld [vmem:[%s3744_s2 + $0x38] sm:$0xff]  ;;  %v77_v44 = vld [vmem:[%s3744_s2 + $0x48] sm:$0xff] }
   0xd   :  { %2405 = vmatprep.subr.bf16.mxu1 %v2664_v0  ;;  %2424 = vmatprep.subr.msk.bf16.mxu0 %vm229_vm2, %v67_v31  ;;  %v231_v33 = vsel %vm229_vm2, %v67_v31, 0  ;;  %v2436_v41 = vld [vmem:[%s3746_s1 + $0x20] sm:$0xff]   ;;  %v78_v45 = vld [vmem:[%s3744_s2 + $0x50] sm:$0xff]  ;;  %v2437_v46 = vld [vmem:[%s3746_s1 + $0x28] sm:$0xff]  }
   0xe   :  { %969 = vperm.xlu0 %2430, %v935_v15   ;;  %2301 = vmatpush3.bf16.msra.mxu0 %v231_v33  ;;  %v76_v43 = vld [vmem:[%s3744_s2 + $0x40] sm:$0xff]  ;;  %v79_v47 = vld [vmem:[%s3744_s2 + $0x58] sm:$0xff]  ;;  %v81_v49 = vld [vmem:[%s3744_s2 + $0x68] sm:$0xff] }
   0xf   :  { %2337 = vmatmul.mubr.msk.f32.vlgmr.msra.gmra.mrb[4].mxu1 %vm330_vm1, %v348_v9  ;;  %984 = vperm.xlu1 %2431, %v938_v18   ;;  %v80_v48 = vld [vmem:[%s3744_s2 + $0x60] sm:$0xff]  ;;  %v82_v50 = vld [vmem:[%s3744_s2 + $0x70] sm:$0xff]  ;;  %v83_v52 = vld [vmem:[%s3744_s2 + $0x78] sm:$0xff] }
  0x10   :  { %2407 = vmatpush3.bf16.msra.mxu1 %v2400_v8  ;;  %2343 = vmatprep.mubr.msk.f32.mxu1 %vm2665_vm0, %v2666_v3  ;;  %v1329_v53 = vld [vmem:[%s3747_s13] sm:$0xff]  ;;  %v1330_v56 = vld [vmem:[%s3747_s13 + $0x8] sm:$0xff]  ;;  %v1331_v62 = vld [vmem:[%s3747_s13 + $0x10] sm:$0xff] }
  0x11   :  { %2302 = vmatprep.mubr.msk.bf16.mxu0 %vm204_vm3, %v2432_v32  ;;  %v1332_v6 = vld [vmem:[%s3747_s13 + $0x18] sm:$0xff]  ;;  %v1333_v10 = vld [vmem:[%s3747_s13 + $0x20] sm:$0xff]  ;;  %v1338_v33 = vld [vmem:[%s3747_s13 + $0x48] sm:$0xff] }
  0x12   :  { %979 = vperm.xlu0 %2430, %v937_v17   ;;  %2303 = vmatmul.mubr.msk.bf16.vlgmr.msra.gmra.mrb[0].mxu0 %vm204_vm3, %v2433_v34  ;;  %v1334_v17 = vld [vmem:[%s3747_s13 + $0x28] sm:$0xff]  ;;  %v1337_v28 = vld [vmem:[%s3747_s13 + $0x40] sm:$0xff] }
  0x13   :  { %2344 = vmatmul.mubr.msk.f32.vlgmr.msra.gmra.mrb[6].mxu1 %vm330_vm1, %v348_v9  ;;  %994 = vperm.xlu1 %2431, %v940_v20   ;;  %v1335_v20 = vld [vmem:[%s3747_s13 + $0x30] sm:$0xff] }
  0x14   :  { %2306 = vmatprep.mubr.msk.bf16.mxu0 %vm204_vm3, %v2434_v36 }
  0x16   :  { %989 = vperm.xlu0 %2430, %v939_v19  }
  0x17   :  { %1004 = vperm.xlu1 %2431, %v942_v22  }
  0x1a   :  { %999 = vperm.xlu0 %2430, %v941_v21   ;;  %2307 = vmatmul.mubr.msk.bf16.gmra.mrb[4].mxu0 %vm204_vm3, %v2435_v40 }
  0x1b   :  { %1014 = vperm.xlu1 %2431, %v944_v24   ;;  %2310 = vmatprep.mubr.msk.bf16.mxu0 %vm204_vm3, %v2436_v41  ;;  %v1342_v41 = vld [vmem:[%s3747_s13 + $0x68] sm:$0xff] }
  0x1e   :  { %1009 = vperm.xlu0 %2430, %v943_v23  }
  0x1f   :  { %1024 = vperm.xlu1 %2431, %v946_v26   ;;  %v1336_v26 = vld [vmem:[%s3747_s13 + $0x38] sm:$0xff] }
  0x22   :  { %1019 = vperm.xlu0 %2430, %v945_v25   ;;  %2311 = vmatmul.mubr.msk.bf16.gmra.mrb[8].mxu0 %vm204_vm3, %v2437_v46  ;;  %v1344_v46 = vld [vmem:[%s3747_s13 + $0x78] sm:$0xff] }
  0x23   :  { %91 = vperm.xlu1 %2431, %v69_v29  }
  0x26   :  { %86 = vperm.xlu0 %2430, %v68_v27  }
  0x27   :  { %101 = vperm.xlu1 %2431, %v71_v35   ;;  %v1339_v35 = vld [vmem:[%s3747_s13 + $0x50] sm:$0xff] }
  0x2a   :  { %96 = vperm.xlu0 %2430, %v70_v30  }
  0x2b   :  { %111 = vperm.xlu1 %2431, %v73_v38  }
  0x2e   :  { %106 = vperm.xlu0 %2430, %v72_v37   ;;  %v1340_v37 = vld [vmem:[%s3747_s13 + $0x58] sm:$0xff] }
  0x2f   :  { %121 = vperm.xlu1 %2431, %v75_v42  }
  0x32   :  { %116 = vperm.xlu0 %2430, %v74_v39   ;;  %v1341_v39 = vld [vmem:[%s3747_s13 + $0x60] sm:$0xff] }
  0x33   :  { %131 = vperm.xlu1 %2431, %v77_v44  }
  0x36   :  { %126 = vperm.xlu0 %2430, %v76_v43   ;;  %v1343_v43 = vld [vmem:[%s3747_s13 + $0x70] sm:$0xff] }
  0x37   :  { %141 = vperm.xlu1 %2431, %v79_v47  }
  0x3a   :  { %136 = vperm.xlu0 %2430, %v78_v45  }
  0x3b   :  { %151 = vperm.xlu1 %2431, %v81_v49  }
  0x3e   :  { %146 = vperm.xlu0 %2430, %v80_v48   ;;  %v1747_v48 = vld [vmem:[%s3748_s8] sm:$0xff] }
  0x3f   :  { %161 = vperm.xlu1 %2431, %v83_v52  }
  0x42   :  { %156 = vperm.xlu0 %2430, %v82_v50  }
  0x43   :  { %1352 = vperm.xlu1 %2431, %v1330_v56   ;;  %v1749_v56 = vld [vmem:[%s3748_s8 + $0x10] sm:$0xff] }
  0x46   :  { %1347 = vperm.xlu0 %2430, %v1329_v53   ;;  %v1748_v53 = vld [vmem:[%s3748_s8 + $0x8] sm:$0xff] }
  0x47   :  { %1362 = vperm.xlu1 %2431, %v1332_v6  }
  0x4a   :  { %1357 = vperm.xlu0 %2430, %v1331_v62   ;;  %v1751_v62 = vld [vmem:[%s3748_s8 + $0x20] sm:$0xff] }
  0x4b   :  { %1372 = vperm.xlu1 %2431, %v1334_v17   ;;  %v1757_v17 = vld [vmem:[%s3748_s8 + $0x50] sm:$0xff] }
  0x4e   :  { %1367 = vperm.xlu0 %2430, %v1333_v10   ;;  %v1755_v10 = vld [vmem:[%s3748_s8 + $0x40] sm:$0xff] }
  0x4f   :  { %1382 = vperm.xlu1 %2431, %v1336_v26   ;;  %v1682_v26 = vld [vmem:[%s3750_s9] sm:$0xff] }
  0x52   :  { %1377 = vperm.xlu0 %2430, %v1335_v20  }
  0x53   :  { %1392 = vperm.xlu1 %2431, %v1338_v33  }
  0x56   :  { %1387 = vperm.xlu0 %2430, %v1337_v28   ;;  %v1758_v28 = vld [vmem:[%s3748_s8 + $0x58] sm:$0xff] }
  0x57   :  { %1402 = vperm.xlu1 %2431, %v1340_v37  }
  0x5a   :  { %1397 = vperm.xlu0 %2430, %v1339_v35  }
  0x5b   :  { %1412 = vperm.xlu1 %2431, %v1342_v41   ;;  %v1760_v41 = vld [vmem:[%s3748_s8 + $0x68] sm:$0xff] }
  0x5e   :  { %1407 = vperm.xlu0 %2430, %v1341_v39  }
  0x5f   :  { %1422 = vperm.xlu1 %2431, %v1344_v46  }
  0x62   :  { %1417 = vperm.xlu0 %2430, %v1343_v43   ;;  %v1684_v43 = vld [vmem:[%s3750_s9 + $0x10] sm:$0xff] }
  0x63   :  { %1776 = vperm.xlu1 %2431, %v1748_v53  }
  0x66   :  { %1771 = vperm.xlu0 %2430, %v1747_v48  }
  0x6a   :  { %1781 = vperm.xlu0 %2430, %v1749_v56  }
  0x6e   :  { %1791 = vperm.xlu0 %2430, %v1751_v62   ;;  %v1762_v62 = vld [vmem:[%s3748_s8 + $0x78] sm:$0xff] }
  0xda   :  { %v2894_v51 = vpop.f32.mrb[0].mxu1 }
  0xdb   :  { %v2324_v54 = vpop.f32.mrb[1].mxu1 }
  0xde   :  { %v2902_v55 = vpop.f32.mrb[2].mxu1 }
  0xdf   :  { %v2909_v57 = vsub.f32 %v2894_v51, %v2902_v55  ;;  %v650_v58 = vrot.slane %v2902_v55, 1  ;;  %v653_v59 = vrot.slane %v2902_v55, 7  ;;  %v660_v60 = vrot.slane %v2902_v55, 6  ;;  %v2331_v61 = vpop.f32.mrb[3].mxu1 }
  0xe0   :  { %v663_v63 = vrot.slane %v2902_v55, 2  ;;  %v2440_v61 = vld [vmem:[%s3749_s10] sm:$0xff]  }
  0xe1   :  { %v640_v0 = vmul.f32 %v2909_v57, %v2909_v57  ;;  %v652_v1 = vmul.f32 %v650_v58, %v2894_v51  ;;  %v655_v2 = vmul.f32 %v653_v59, %v2894_v51  ;;  %v662_v3 = vmul.f32 %v660_v60, %v2894_v51  ;;  %v2438_v58 = vld [vmem:[%s3746_s1 + $0x30] sm:$0xff]   ;;  %v2439_v59 = vld [vmem:[%s3746_s1 + $0x38] sm:$0xff]   ;;  %2348 = vmatprep.mubr.msk.bf16.mxu1 %vm1067_vm10, %v2440_v61 }
  0xe2   :  { %v665_v4 = vmul.f32 %v663_v63, %v2894_v51  ;;  %v2924_v5 = vpop.f32.mrb[4].mxu1  ;;  %v1750_v60 = vld [vmem:[%s3748_s8 + $0x18] sm:$0xff]  ;;  %2314 = vmatprep.mubr.msk.bf16.mxu0 %vm204_vm3, %v2438_v58 }
  0xe3   :  { %v642_v7 = vsel %vm641_vm4, %v640_v0, 0.0  ;;  %v657_v8 = vrot.slane %v655_v2, 1  ;;  %v2338_v9 = vpop.f32.mrb[5].mxu1  ;;  %2315 = vmatmul.mubr.msk.bf16.gmra.mrb[12].mxu0 %vm204_vm3, %v2439_v59  ;;  %1786 = vperm.xlu1 %2431, %v1750_v60  }
  0xe4   :  { %v643_v11 = vrot.slane %v642_v7, 4  ;;  %v667_v12 = vrot.slane %v665_v4, 6 }
  0xe5   :  { %v659_v13 = vsub.f32 %v652_v1, %v657_v8  ;;  %v1752_v1 = vld [vmem:[%s3748_s8 + $0x28] sm:$0xff]  ;;  %v1754_v8 = vld [vmem:[%s3748_s8 + $0x38] sm:$0xff] }
  0xe6   :  { %v644_v14 = vadd.f32 %v643_v11, %v642_v7  ;;  %v669_v15 = vsub.f32 %v662_v3, %v667_v12  ;;  %v2933_v16 = vpop.f32.mrb[6].mxu1  ;;  %v1753_v3 = vld [vmem:[%s3748_s8 + $0x30] sm:$0xff] }
  0xe7   :  { %v671_v18 = vrot.slane %v659_v13, 1  ;;  %v676_v19 = vrot.slane %v659_v13, 6  ;;  %v2345_v21 = vpop.f32.mrb[7].mxu1  ;;  %1796 = vperm.xlu1 %2431, %v1752_v1   ;;  %1801 = vperm.xlu0 %2430, %v1753_v3  }
  0xe8   :  { %v645_v22 = vrot.slane %v644_v14, 2  ;;  %v674_v23 = vrot.slane %v669_v15, 1 }
  0xea   :  { %v646_v24 = vadd.f32 %v645_v22, %v644_v14  ;;  %v679_v25 = vsel %vm678_vm5, %v671_v18, %v674_v23 }
  0xeb   :  { %v2946_v27 = vsel %vm680_vm6, %v679_v25, %v676_v19  ;;  %1806 = vperm.xlu1 %2431, %v1754_v8   ;;  %1811 = vperm.xlu0 %2430, %v1755_v10  }
  0xec   :  { %v647_v29 = vrot.slane %v646_v24, 1  ;;  %v692_v30 = vmul.f32 %v2946_v27, %v2946_v27 }
  0xee   :  { %v648_v31 = vadd.f32 %v647_v29, %v646_v24  ;;  %v694_v32 = vsel %vm693_vm7, %v692_v30, 0.0  ;;  %v1698_v29 = vand.u32 2147483647, %v1682_v26 }
  0xef   :  { %v695_v34 = vrot.slane %v694_v32, 4  ;;  %1821 = vperm.xlu0 %2430, %v1757_v17  }
  0xf0   :  { %2456 = vrsqrt.f32 %v648_v31  ;;  %vm684_vm8 = vcmp.eq.f32.partialorder %v648_v31, inf  ;;  %v687_v49 = vand.u32 2147483648, %v648_v31  ;;  %vm686_vm9 = vcmp.eq.f32.partialorder %v648_v31, 0.0 }
  0xf1   :  { %v696_v36 = vadd.f32 %v695_v34, %v694_v32  ;;  %v1759_v34 = vld [vmem:[%s3748_s8 + $0x60] sm:$0xff]  ;;  %v1714_v35 = vadd.f32 1e-05, %v1698_v29 }
  0xf3   :  { %v697_v38 = vrot.slane %v696_v36, 2  ;;  %1831 = vperm.xlu0 %2430, %v1759_v34  }
  0xf5   :  { %v698_v40 = vadd.f32 %v697_v38, %v696_v36 }
  0xf7   :  { %v699_v42 = vrot.slane %v698_v40, 1 }
  0xf9   :  { %v700_v44 = vadd.f32 %v699_v42, %v698_v40  ;;  %v1683_v42 = vld [vmem:[%s3750_s9 + $0x8] sm:$0xff] }
  0xfa   :  { %v2457_v45 = vpop.eup %2456 }
  0xfb   :  { %v683_v47 = vmul.f32 %v2457_v45, %v648_v31  ;;  %2458 = vrsqrt.f32 %v700_v44  ;;  %vm703_vm11 = vcmp.eq.f32.partialorder %v700_v44, inf  ;;  %vm705_vm12 = vcmp.eq.f32.partialorder %v700_v44, 0.0 }
  0xfc   :  { %v706_v2 = vand.u32 2147483648, %v700_v44 }
  0xfd   :  { %v685_v50 = vsel %vm684_vm8, %v648_v31, %v683_v47  ;;  %v1761_v47 = vld [vmem:[%s3748_s8 + $0x70] sm:$0xff]  ;;  %vm910_vm8 = vcmask 1044480  }
  0xfe   :  { %v688_v52 = vsel %vm686_vm9, %v687_v49, %v685_v50  ;;  %v1699_v50 = vand.u32 2147483647, %v1683_v42  ;;  %1841 = vperm.xlu0 %2430, %v1761_v47   ;;  %vm1092_vm9 = vcmask 1046528  }
  0xff   :  { %v689_v54 = vadd.f32 1.0, %v688_v52  ;;  %v1700_v52 = vand.u32 2147483647, %v1684_v43 }
 0x101   :  { %2460 = vrcp.f32 %v689_v54 }
 0x105   :  { %v2459_v63 = vpop.eup %2458 }
 0x106   :  { %v702_v0 = vmul.f32 %v2459_v63, %v700_v44 }
 0x108   :  { %v704_v4 = vsel %vm703_vm11, %v700_v44, %v702_v0 }
 0x109   :  { %v707_v6 = vsel %vm705_vm12, %v706_v2, %v704_v4 }
 0x10a   :  { %v708_v7 = vadd.f32 1.0, %v707_v6 }
 0x10b   :  { %v2461_v9 = vpop.eup %2460 }
 0x10c   :  { %v3015_v11 = vmul.f32 %v2461_v9, %v2909_v57  ;;  %2462 = vrcp.f32 %v708_v7  ;;  %v1756_v57 = vld [vmem:[%s3748_s8 + $0x48] sm:$0xff] }
 0x10d   :  { %1816 = vperm.xlu1 %2431, %v1756_v57   ;;  %2464 = vrcp.f32 %v1714_v35 }
 0x10e   :  { %v768_v12 = vmul.f32 %v3015_v11, %v2902_v55  ;;  %v794_v13 = vmul.f32 %v3015_v11, %v2924_v5  ;;  %v820_v14 = vmul.f32 %v3015_v11, %v2933_v16  ;;  %v742_v15 = vmul.f32 %v3015_v11, %v2894_v51 }
 0x110   :  { %v769_v18 = vsel %vm693_vm7, %v768_v12, 0.0  ;;  %v795_v19 = vsel %vm693_vm7, %v794_v13, 0.0  ;;  %v821_v20 = vsel %vm693_vm7, %v820_v14, 0.0  ;;  %v743_v21 = vsel %vm693_vm7, %v742_v15, 0.0 }
 0x111   :  { %v770_v22 = vrot.slane %v769_v18, 4  ;;  %v796_v23 = vrot.slane %v795_v19, 4  ;;  %v822_v24 = vrot.slane %v821_v20, 4  ;;  %v744_v25 = vrot.slane %v743_v21, 4  ;;  %1826 = vperm.xlu1 %2431, %v1758_v28  }
 0x113   :  { %v771_v30 = vadd.f32 %v770_v22, %v769_v18  ;;  %v797_v31 = vadd.f32 %v796_v23, %v795_v19  ;;  %v823_v32 = vadd.f32 %v822_v24, %v821_v20  ;;  %v745_v33 = vadd.f32 %v744_v25, %v743_v21 }
 0x115   :  { %v772_v36 = vrot.slane %v771_v30, 2  ;;  %v798_v37 = vrot.slane %v797_v31, 2  ;;  %v824_v38 = vrot.slane %v823_v32, 2  ;;  %v746_v39 = vrot.slane %v745_v33, 2  ;;  %1836 = vperm.xlu1 %2431, %v1760_v41  }
 0x116   :  { %v2463_v40 = vpop.eup %2462 }
 0x117   :  { %v710_v44 = vmul.f32 %v2463_v40, %v2946_v27  ;;  %v799_v45 = vadd.f32 %v798_v37, %v797_v31  ;;  %v825_v46 = vadd.f32 %v824_v38, %v823_v32  ;;  %v747_v48 = vadd.f32 %v746_v39, %v745_v33  ;;  %v3075_v20 = vpop.eup %2464 }
 0x118   :  { %v773_v49 = vadd.f32 %v772_v36, %v771_v30  ;;  %1867 = vperm.xlu0 %2430, %v3075_v20   ;;  %v1685_v30 = vld [vmem:[%s3750_s9 + $0x18] sm:$0xff]  ;;  %v1715_v37 = vadd.f32 1e-05, %v1699_v50  ;;  %v1716_v38 = vadd.f32 1e-05, %v1700_v52 }
 0x119   :  { %v776_v53 = vmul.f32 %v710_v44, %v2902_v55  ;;  %v712_v54 = vrot.slane %v710_v44, 1  ;;  %v715_v56 = vrot.slane %v710_v44, 7  ;;  %v722_v58 = vrot.slane %v710_v44, 6  ;;  %1846 = vperm.xlu1 %2431, %v1762_v62  }
 0x11a   :  { %v725_v59 = vrot.slane %v710_v44, 2  ;;  %v800_v60 = vrot.slane %v799_v45, 1  ;;  %v802_v27 = vmul.f32 %v710_v44, %v2924_v5  ;;  %v826_v61 = vrot.slane %v825_v46, 1 }
 0x11b   :  { %v777_v63 = vsel %vm693_vm7, %v776_v53, 0.0  ;;  %v714_v0 = vmul.f32 %v712_v54, %v3015_v11  ;;  %v717_v1 = vmul.f32 %v715_v56, %v3015_v11  ;;  %v724_v2 = vmul.f32 %v722_v58, %v3015_v11 }
 0x11c   :  { %v778_v3 = vrot.slane %v777_v63, 4  ;;  %v727_v4 = vmul.f32 %v725_v59, %v3015_v11  ;;  %v3067_v6 = vadd.f32 %v800_v60, %v799_v45  ;;  %v803_v7 = vsel %vm693_vm7, %v802_v27, 0.0 }
 0x11d   :  { %v719_v8 = vrot.slane %v717_v1, 1  ;;  %v804_v9 = vrot.slane %v803_v7, 4  ;;  %v3070_v10 = vadd.f32 %v826_v61, %v825_v46  ;;  %v828_v12 = vmul.f32 %v710_v44, %v2933_v16 }
 0x11e   :  { %v779_v13 = vadd.f32 %v778_v3, %v777_v63  ;;  %v729_v14 = vrot.slane %v727_v4, 6  ;;  %v748_v15 = vrot.slane %v747_v48, 1  ;;  %v750_v57 = vmul.f32 %v710_v44, %v2894_v51  ;;  %v1686_v4 = vld [vmem:[%s3750_s9 + $0x20] sm:$0xff] }
 0x11f   :  { %v721_v17 = vsub.f32 %v714_v0, %v719_v8  ;;  %v805_v18 = vadd.f32 %v804_v9, %v803_v7  ;;  %v829_v11 = vsel %vm693_vm7, %v828_v12, 0.0  ;;  %v774_v19 = vrot.slane %v773_v49, 1  ;;  %v1687_v7 = vld [vmem:[%s3750_s9 + $0x28] sm:$0xff] }
 0x120   :  { %v780_v21 = vrot.slane %v779_v13, 2  ;;  %v731_v22 = vsub.f32 %v724_v2, %v729_v14  ;;  %v830_v23 = vrot.slane %v829_v11, 4  ;;  %v3077_v24 = vadd.f32 %v748_v15, %v747_v48 }
 0x121   :  { %v733_v25 = vrot.slane %v721_v17, 1  ;;  %v738_v26 = vrot.slane %v721_v17, 6  ;;  %v806_v28 = vrot.slane %v805_v18, 2  ;;  %v751_v29 = vsel %vm693_vm7, %v750_v57, 0.0 }
 0x122   :  { %v736_v31 = vrot.slane %v731_v22, 1  ;;  %v831_v32 = vadd.f32 %v830_v23, %v829_v11  ;;  %v752_v33 = vrot.slane %v751_v29, 4  ;;  %v775_v34 = vadd.f32 %v774_v19, %v773_v49  ;;  %v1688_v19 = vld [vmem:[%s3750_s9 + $0x30] sm:$0xff] }
 0x123   :  { %v807_v35 = vadd.f32 %v806_v28, %v805_v18  ;;  %v781_v36 = vadd.f32 %v780_v21, %v779_v13  ;;  %v1701_v42 = vand.u32 2147483647, %v1685_v30  ;;  %2466 = vrcp.f32 %v1715_v37 }
 0x124   :  { %v740_v39 = vsel %vm678_vm5, %v733_v25, %v736_v31  ;;  %v832_v40 = vrot.slane %v831_v32, 2  ;;  %v753_v41 = vadd.f32 %v752_v33, %v751_v29  ;;  %2468 = vrcp.f32 %v1716_v38  ;;  %v1689_v25 = vld [vmem:[%s3750_s9 + $0x38] sm:$0xff] }
 0x125   :  { %v741_v43 = vsel %vm680_vm6, %v740_v39, %v738_v26  ;;  %v808_v44 = vrot.slane %v807_v35, 1  ;;  %v782_v45 = vrot.slane %v781_v36, 1  ;;  %v1717_v57 = vadd.f32 1e-05, %v1701_v42  ;;  %v1690_v26 = vld [vmem:[%s3750_s9 + $0x40] sm:$0xff]  ;;  %v1691_v39 = vld [vmem:[%s3750_s9 + $0x48] sm:$0xff] }
 0x126   :  { %v758_v46 = vmul.f32 %v741_v43, %v2894_v51  ;;  %v784_v47 = vmul.f32 %v741_v43, %v2902_v55  ;;  %v810_v48 = vmul.f32 %v741_v43, %v2924_v5  ;;  %v833_v49 = vadd.f32 %v832_v40, %v831_v32 }
 0x127   :  { %v809_v53 = vadd.f32 %v808_v44, %v807_v35  ;;  %v836_v50 = vmul.f32 %v741_v43, %v2933_v16  ;;  %v754_v52 = vrot.slane %v753_v41, 2  ;;  %v783_v54 = vadd.f32 %v782_v45, %v781_v36 }
 0x128   :  { %v759_v56 = vsel %vm693_vm7, %v758_v46, 0.0  ;;  %v785_v58 = vsel %vm693_vm7, %v784_v47, 0.0  ;;  %v811_v59 = vsel %vm693_vm7, %v810_v48, 0.0  ;;  %v834_v60 = vrot.slane %v833_v49, 1 }
 0x129   :  { %v760_v27 = vrot.slane %v759_v56, 4  ;;  %v786_v61 = vrot.slane %v785_v58, 4  ;;  %v812_v51 = vrot.slane %v811_v59, 4  ;;  %v837_v55 = vsel %vm693_vm7, %v836_v50, 0.0 }
 0x12a   :  { %v835_v62 = vadd.f32 %v834_v60, %v833_v49  ;;  %v838_v5 = vrot.slane %v837_v55, 4  ;;  %v755_v63 = vadd.f32 %v754_v52, %v753_v41  ;;  %v792_v0 = vsel %vm678_vm5, %v775_v34, %v783_v54  ;;  %v1693_v60 = vld [vmem:[%s3750_s9 + $0x58] sm:$0xff] }
 0x12b   :  { %v761_v16 = vadd.f32 %v760_v27, %v759_v56  ;;  %v787_v1 = vadd.f32 %v786_v61, %v785_v58  ;;  %v813_v2 = vadd.f32 %v812_v51, %v811_v59  ;;  %v818_v3 = vsel %vm678_vm5, %v3067_v6, %v809_v53  ;;  %v1692_v59 = vld [vmem:[%s3750_s9 + $0x50] sm:$0xff]  ;;  %v1694_v51 = vld [vmem:[%s3750_s9 + $0x60] sm:$0xff] }
 0x12c   :  { %v839_v8 = vadd.f32 %v838_v5, %v837_v55  ;;  %v844_v9 = vsel %vm678_vm5, %v3070_v10, %v835_v62  ;;  %v756_v12 = vrot.slane %v755_v63, 1  ;;  %v1702_v18 = vand.u32 2147483647, %v1686_v4 }
 0x12d   :  { %v762_v13 = vrot.slane %v761_v16, 2  ;;  %v788_v14 = vrot.slane %v787_v1, 2  ;;  %v814_v15 = vrot.slane %v813_v2, 2  ;;  %v1703_v11 = vand.u32 2147483647, %v1687_v7  ;;  %v3108_v21 = vpop.eup %2466 }
 0x12e   :  { %v840_v17 = vrot.slane %v839_v8, 2  ;;  %v757_v6 = vadd.f32 %v756_v12, %v755_v63  ;;  %2470 = vrcp.f32 %v1717_v57  ;;  %1872 = vperm.xlu1 %2431, %v3108_v21   ;;  %v1718_v30 = vadd.f32 1e-05, %v1702_v18  ;;  %v3129_v53 = vpop.eup %2468 }
 0x12f   :  { %v763_v22 = vadd.f32 %v762_v13, %v761_v16  ;;  %v789_v23 = vadd.f32 %v788_v14, %v787_v1  ;;  %v815_v10 = vadd.f32 %v814_v15, %v813_v2  ;;  %v1719_v31 = vadd.f32 1e-05, %v1703_v11  ;;  %1877 = vperm.xlu0 %2430, %v3129_v53  }
 0x130   :  { %v841_v28 = vadd.f32 %v840_v17, %v839_v8  ;;  %v766_v29 = vsel %vm678_vm5, %v3077_v24, %v757_v6  ;;  %v1704_v35 = vand.u32 2147483647, %v1688_v19  ;;  %2472 = vrcp.f32 %v1718_v30  ;;  %v1696_v8 = vld [vmem:[%s3750_s9 + $0x70] sm:$0xff] }
 0x131   :  { %v764_v32 = vrot.slane %v763_v22, 1  ;;  %v790_v33 = vrot.slane %v789_v23, 1  ;;  %v816_v34 = vrot.slane %v815_v10, 1  ;;  %v1705_v37 = vand.u32 2147483647, %v1689_v25 }
 0x132   :  { %v842_v36 = vrot.slane %v841_v28, 1  ;;  %v1706_v38 = vand.u32 2147483647, %v1690_v26  ;;  %2474 = vrcp.f32 %v1719_v31  ;;  %v1720_v43 = vadd.f32 1e-05, %v1704_v35 }
 0x133   :  { %v765_v40 = vadd.f32 %v764_v32, %v763_v22  ;;  %v791_v41 = vadd.f32 %v790_v33, %v789_v23  ;;  %v817_v42 = vadd.f32 %v816_v34, %v815_v10  ;;  %v1721_v44 = vadd.f32 1e-05, %v1705_v37 }
 0x134   :  { %v843_v24 = vadd.f32 %v842_v36, %v841_v28  ;;  %v1722_v45 = vadd.f32 1e-05, %v1706_v38  ;;  %v1707_v49 = vand.u32 2147483647, %v1691_v39  ;;  %2476 = vrcp.f32 %v1720_v43 }
 0x135   :  { %v3123_v46 = vsel %vm680_vm6, %v766_v29, %v765_v40  ;;  %v3126_v47 = vsel %vm680_vm6, %v792_v0, %v791_v41  ;;  %v819_v48 = vsel %vm680_vm6, %v818_v3, %v817_v42  ;;  %2478 = vrcp.f32 %v1721_v44  ;;  %v1695_v0 = vld [vmem:[%s3750_s9 + $0x68] sm:$0xff] }
 0x136   :  { %v845_v50 = vsel %vm680_vm6, %v844_v9, %v843_v24  ;;  %v846_v52 = vmul.f32 %v3123_v46, %v3123_v46  ;;  %v861_v54 = vmul.f32 %v3126_v47, %v3126_v47  ;;  %v3138_v56 = vmul.f32 %v3126_v47, %v3123_v46  ;;  %v1697_v9 = vld [vmem:[%s3750_s9 + $0x78] sm:$0xff] }
 0x137   :  { %v906_v58 = vrot.slane %v845_v50, 5  ;;  %2480 = vrcp.f32 %v1722_v45  ;;  %v1723_v16 = vadd.f32 1e-05, %v1707_v49  ;;  %v1708_v1 = vand.u32 2147483647, %v1692_v59 }
 0x138   :  { %v847_v27 = vsel %vm693_vm7, %v846_v52, 0.0  ;;  %v862_v61 = vsel %vm693_vm7, %v861_v54, 0.0  ;;  %v3152_v55 = vpop.eup %2470  ;;  %v1709_v2 = vand.u32 2147483647, %v1693_v60  ;;  %v1710_v7 = vand.u32 2147483647, %v1694_v51 }
 0x139   :  { %v848_v62 = vrot.slane %v847_v27, 4  ;;  %v863_v5 = vrot.slane %v862_v61, 4  ;;  %v3155_v63 = vsel %vm912_vm13, %v819_v48, %v906_v58  ;;  %1882 = vperm.xlu1 %2431, %v3152_v55   ;;  %2482 = vrcp.f32 %v1723_v16  ;;  %v3203_v16 = vpop.permute.xlu0 %949 }
 0x13a   :  { %v3167_v12 = vpop.eup %2472  ;;  %v1724_v13 = vadd.f32 1e-05, %v1708_v1  ;;  %v1725_v14 = vadd.f32 1e-05, %v1709_v2  ;;  %v1711_v15 = vand.u32 2147483647, %v1695_v0  ;;  %v3205_v2 = vpop.permute.xlu1 %959 }
 0x13b   :  { %v849_v3 = vadd.f32 %v848_v62, %v847_v27  ;;  %v864_v4 = vadd.f32 %v863_v5, %v862_v61  ;;  %1887 = vperm.xlu0 %2430, %v3167_v12   ;;  %v1726_v18 = vadd.f32 1e-05, %v1710_v7  ;;  %v1712_v19 = vand.u32 2147483647, %v1696_v8 }
 0x13c   :  { %v3169_v57 = vpop.eup %2474  ;;  %2484 = vrcp.f32 %v1724_v13  ;;  %v1727_v11 = vadd.f32 1e-05, %v1711_v15  ;;  %v1713_v22 = vand.u32 2147483647, %v1697_v9  ;;  %v877_v38 = vsel %vm693_vm7, %v3138_v56, 0.0 }
 0x13d   :  { %v850_v17 = vrot.slane %v849_v3, 2  ;;  %v865_v6 = vrot.slane %v864_v4, 2  ;;  %1892 = vperm.xlu1 %2431, %v3169_v57   ;;  %2486 = vrcp.f32 %v1725_v14  ;;  %v1728_v25 = vadd.f32 1e-05, %v1712_v19  ;;  %v3209_v7 = vpop.permute.xlu0 %954 }
 0x13e   :  { %v1729_v26 = vadd.f32 1e-05, %v1713_v22  ;;  %v3173_v28 = vpop.eup %2476  ;;  %2488 = vrcp.f32 %v1726_v18  ;;  %v878_v41 = vrot.slane %v877_v38, 4  ;;  %v2025_v52 = vmul.f32 0.3989423, %v3075_v20  ;;  %v3213_v8 = vpop.permute.xlu1 %964 }
 0x13f   :  { %v851_v23 = vadd.f32 %v850_v17, %v849_v3  ;;  %v866_v10 = vadd.f32 %v865_v6, %v864_v4  ;;  %v3175_v31 = vpop.eup %2478  ;;  %1897 = vperm.xlu0 %2430, %v3173_v28   ;;  %2490 = vrcp.f32 %v1727_v11  ;;  %v2026_v60 = vmul.f32 0.3989423, %v3108_v21 }
 0x140   :  { %2492 = vrcp.f32 %v1728_v25  ;;  %v879_v48 = vadd.f32 %v878_v41, %v877_v38  ;;  %v2027_v20 = vmul.f32 0.3989423, %v3129_v53  ;;  %v2028_v0 = vmul.f32 0.3989423, %v3152_v55 }
 0x141   :  { %v852_v29 = vrot.slane %v851_v23, 1  ;;  %v867_v30 = vrot.slane %v866_v10, 1  ;;  %1902 = vperm.xlu1 %2431, %v3175_v31   ;;  %v2481_v34 = vpop.eup %2480  ;;  %2494 = vrcp.f32 %v1729_v26  ;;  %v2029_v21 = vmul.f32 0.3989423, %v3167_v12  ;;  %v3215_v17 = vpop.permute.xlu0 %969 }
 0x142   :  { %v880_v62 = vrot.slane %v879_v48, 2  ;;  %v2030_v3 = vmul.f32 0.3989423, %v3169_v57  ;;  %v2031_v53 = vmul.f32 0.3989423, %v3173_v28  ;;  %v3217_v6 = vpop.permute.xlu1 %974 }
 0x143   :  { %v853_v32 = vadd.f32 %v852_v29, %v851_v23  ;;  %v868_v33 = vadd.f32 %v867_v30, %v866_v10  ;;  %v2483_v35 = vpop.eup %2482  ;;  %1907 = vperm.xlu0 %2430, %v2481_v34   ;;  %v2032_v55 = vmul.f32 0.3989423, %v3175_v31  ;;  %v2033_v13 = vmul.f32 0.3989423, %v2481_v34 }
 0x144   :  { %v881_v1 = vadd.f32 %v880_v62, %v879_v48  ;;  %v2034_v12 = vmul.f32 0.3989423, %v2483_v35  ;;  %v2304_v62 = vpop.f32.mrb[0].mxu0 }
 0x145   :  { %2496 = vrsqrt.f32 %v853_v32  ;;  %1912 = vperm.xlu1 %2431, %v2483_v35   ;;  %vm856_vm14 = vcmp.eq.f32.partialorder %v853_v32, inf  ;;  %v859_v49 = vand.u32 2147483648, %v853_v32  ;;  %vm858_vm15 = vcmp.eq.f32.partialorder %v853_v32, 0.0  ;;  %v3221_v23 = vpop.permute.xlu0 %979 }
 0x146   :  { %2498 = vrsqrt.f32 %v868_v33  ;;  %v3179_v36 = vpop.eup %2484  ;;  %vm871_vm0 = vcmp.eq.f32.partialorder %v868_v33, inf  ;;  %v874_v56 = vand.u32 2147483648, %v868_v33  ;;  %vm873_vm2 = vcmp.eq.f32.partialorder %v868_v33, 0.0  ;;  %v3225_v26 = vpop.permute.xlu1 %984 }
 0x147   :  { %v3181_v37 = vpop.eup %2486  ;;  %1917 = vperm.xlu0 %2430, %v3179_v36   ;;  %v882_v4 = vrot.slane %v881_v1, 1  ;;  %v2035_v18 = vmul.f32 0.3989423, %v3179_v36 }
 0x148   :  { %v3186_v39 = vpop.eup %2488  ;;  %v2036_v11 = vmul.f32 0.3989423, %v3181_v37 }
 0x149   :  { %1922 = vperm.xlu1 %2431, %v3181_v37   ;;  %v3189_v40 = vpop.eup %2490  ;;  %v883_v9 = vadd.f32 %v882_v4, %v881_v1  ;;  %v2037_v10 = vmul.f32 0.3989423, %v3186_v39  ;;  %v3229_v30 = vpop.permute.xlu0 %989 }
 0x14a   :  { %v3191_v42 = vpop.eup %2492  ;;  %v2038_v25 = vmul.f32 0.3989423, %v3189_v40  ;;  %v3231_v31 = vpop.permute.xlu1 %994 }
 0x14b   :  { %v3193_v24 = vpop.eup %2494  ;;  %1927 = vperm.xlu0 %2430, %v3186_v39   ;;  %v2039_v28 = vmul.f32 0.3989423, %v3191_v42  ;;  %v900_v39 = vrot.slane %v3123_v46, 6  ;;  %v2441_v46 = vld [vmem:[%s3749_s10 + $0x8] sm:$0xff]  }
 0x14c   :  { %v2040_v29 = vmul.f32 0.3989423, %v3193_v24 }
 0x14d   :  { %1932 = vperm.xlu1 %2431, %v3189_v40   ;;  %v903_v40 = vrot.slane %v3126_v47, 3  ;;  %v2442_v47 = vld [vmem:[%s3749_s10 + $0x10] sm:$0xff]  }
 0x14e   :  { %v3235_v36 = vpop.permute.xlu1 %1004 }
 0x14f   :  { %v2497_v43 = vpop.eup %2496  ;;  %1937 = vperm.xlu0 %2430, %v3191_v42  }
 0x150   :  { %v2499_v44 = vpop.eup %2498  ;;  %v855_v45 = vmul.f32 %v2497_v43, %v853_v32 }
 0x151   :  { %v870_v50 = vmul.f32 %v2499_v44, %v868_v33  ;;  %1942 = vperm.xlu1 %2431, %v3193_v24  }
 0x152   :  { %v857_v54 = vsel %vm856_vm14, %v853_v32, %v855_v45  ;;  %v3244_v45 = vpop.permute.xlu1 %1014 }
 0x153   :  { %v860_v58 = vsel %vm858_vm15, %v859_v49, %v857_v54  ;;  %v872_v59 = vsel %vm871_vm0, %v868_v33, %v870_v50  ;;  %2043 = vperm.xlu0 %2430, %v2025_v52   ;;  %v3233_v33 = vpop.permute.xlu0 %999  ;;  %v2444_v54 = vld [vmem:[%s3749_s10 + $0x20] sm:$0xff]  }
 0x154   :  { %v875_v27 = vsel %vm873_vm2, %v874_v56, %v872_v59  ;;  %v884_v61 = vadd.f32 1e-05, %v860_v58  ;;  %v2445_v59 = vld [vmem:[%s3749_s10 + $0x28] sm:$0xff]  }
 0x155   :  { %v885_v51 = vadd.f32 1e-05, %v875_v27  ;;  %2048 = vperm.xlu1 %2431, %v2026_v60   ;;  %v2446_v27 = vld [vmem:[%s3749_s10 + $0x30] sm:$0xff]  }
 0x156   :  { %v3255_v50 = vpop.permute.xlu1 %1024 }
 0x157   :  { %v886_v5 = vmul.f32 %v885_v51, %v884_v61  ;;  %2053 = vperm.xlu0 %2430, %v2027_v20   ;;  %v3241_v24 = vpop.permute.xlu0 %1009 }
 0x159   :  { %2500 = vrcp.f32 %v886_v5  ;;  %2058 = vperm.xlu1 %2431, %v2028_v0   ;;  %v267_v5 = vpop.f32.mrb[1].mxu0  ;;  %v2447_v0 = vld [vmem:[%s3749_s10 + $0x38] sm:$0xff]  }
 0x15a   :  { %v92_v56 = vpop.permute.xlu1 %91 }
 0x15b   :  { %2063 = vperm.xlu0 %2430, %v2029_v21   ;;  %v3252_v49 = vpop.permute.xlu0 %1019  ;;  %v2305_v21 = vpop.f32.mrb[2].mxu0 }
 0x15c   :  { %v270_v4 = vpop.f32.mrb[3].mxu0 }
 0x15d   :  { %2068 = vperm.xlu1 %2431, %v2030_v3  }
 0x15e   :  { %v102_v60 = vpop.permute.xlu1 %101 }
 0x15f   :  { %2073 = vperm.xlu0 %2430, %v2031_v53   ;;  %v87_v52 = vpop.permute.xlu0 %86  ;;  %v279_v3 = vadd.f32 %v2305_v21, %v102_v60  ;;  %v2449_v60 = vld [vmem:[%s3752_s12 + $0x30] sm:$0xff]  }
 0x160   :  { %v268_v1 = vadd.f32 %v267_v5, %v87_v52 }
 0x161   :  { %2078 = vperm.xlu1 %2431, %v2032_v55   ;;  %v271_v55 = vadd.f32 %v270_v4, %v92_v56  ;;  %334 = vst.msk [vmem:[%s3751_s14 + $0x18] sm:$0xff] %vm330_vm1, %v279_v3 }
 0x162   :  { %v112_v51 = vpop.permute.xlu1 %111  ;;  %331 = vst.msk [vmem:[%s3751_s14] sm:$0xff] %vm330_vm1, %v268_v1 }
 0x163   :  { %v2501_v14 = vpop.eup %2500  ;;  %2083 = vperm.xlu0 %2430, %v2033_v13   ;;  %v97_v58 = vpop.permute.xlu0 %96  ;;  %332 = vst.msk [vmem:[%s3751_s14 + $0x8] sm:$0xff] %vm330_vm1, %v271_v55 }
 0x164   :  { %v888_v15 = vmul.f32 %v2501_v14, %v883_v9  ;;  %v276_v20 = vadd.f32 %v2304_v62, %v97_v58  ;;  %v2308_v13 = vpop.f32.mrb[4].mxu0 }
 0x165   :  { %2088 = vperm.xlu1 %2431, %v2034_v12   ;;  %v283_v12 = vpop.f32.mrb[5].mxu0 }
 0x166   :  { %v889_v57 = vmul.f32 %v888_v15, %v888_v15  ;;  %333 = vst.msk [vmem:[%s3751_s14 + $0x10] sm:$0xff] %vm330_vm1, %v276_v20  ;;  %v122_v9 = vpop.permute.xlu1 %121 }
 0x167   :  { %2093 = vperm.xlu0 %2430, %v2035_v18   ;;  %v107_v61 = vpop.permute.xlu0 %106  ;;  %v2309_v18 = vpop.f32.mrb[6].mxu0 }
 0x168   :  { %v890_v19 = vsub.f32 1.0, %v889_v57  ;;  %v284_v57 = vadd.f32 %v283_v12, %v107_v61 }
 0x169   :  { %2098 = vperm.xlu1 %2431, %v2036_v11   ;;  %v295_v11 = vadd.f32 %v2309_v18, %v122_v9 }
 0x16a   :  { %v891_v22 = vmax.f32 %v890_v19, 0.0  ;;  %v286_v19 = vpop.f32.mrb[7].mxu0  ;;  %335 = vst.msk [vmem:[%s3751_s14 + $0x20] sm:$0xff] %vm330_vm1, %v284_v57 }
 0x16b   :  { %2103 = vperm.xlu0 %2430, %v2037_v10   ;;  %v117_v53 = vpop.permute.xlu0 %116  ;;  %v287_v10 = vadd.f32 %v286_v19, %v112_v51  ;;  %338 = vst.msk [vmem:[%s3751_s14 + $0x38] sm:$0xff] %vm330_vm1, %v295_v11 }
 0x16c   :  { %2502 = vrsqrt.f32 %v891_v22  ;;  %vm894_vm3 = vcmp.eq.f32.partialorder %v891_v22, inf  ;;  %v897_v35 = vand.u32 2147483648, %v891_v22  ;;  %vm896_vm7 = vcmp.eq.f32.partialorder %v891_v22, 0.0 }
 0x16d   :  { %2108 = vperm.xlu1 %2431, %v2038_v25   ;;  %v292_v14 = vadd.f32 %v2308_v13, %v117_v53  ;;  %336 = vst.msk [vmem:[%s3751_s14 + $0x28] sm:$0xff] %vm330_vm1, %v287_v10 }
 0x16f   :  { %2113 = vperm.xlu0 %2430, %v2039_v28   ;;  %337 = vst.msk [vmem:[%s3751_s14 + $0x30] sm:$0xff] %vm330_vm1, %v292_v14  ;;  %v2312_v28 = vpop.f32.mrb[8].mxu0 }
 0x171   :  { %2118 = vperm.xlu1 %2431, %v2040_v29  }
 0x176   :  { %v2503_v32 = vpop.eup %2502 }
 0x177   :  { %v893_v34 = vmul.f32 %v2503_v32, %v891_v22  ;;  %v299_v32 = vpop.f32.mrb[9].mxu0 }
 0x179   :  { %v895_v37 = vsel %vm894_vm3, %v891_v22, %v893_v34  ;;  %v132_v22 = vpop.permute.xlu1 %131 }
 0x17a   :  { %v898_v38 = vsel %vm896_vm7, %v897_v35, %v895_v37  ;;  %v2313_v37 = vpop.f32.mrb[10].mxu0 }
 0x17b   :  { %v908_v41 = vsel %vm678_vm5, %v898_v38, %v888_v15  ;;  %v127_v15 = vpop.permute.xlu0 %126 }
 0x17c   :  { %v909_v42 = vsel %vm680_vm6, %v908_v41, %v900_v39  ;;  %v300_v35 = vadd.f32 %v299_v32, %v127_v15  ;;  %v302_v39 = vpop.f32.mrb[11].mxu0 }
 0x17d   :  { %v911_v43 = vsel %vm910_vm8, %v909_v42, %v903_v40  ;;  %v142_v34 = vpop.permute.xlu1 %141  ;;  %v303_v40 = vadd.f32 %v302_v39, %v132_v22 }
 0x17e   :  { %v930_v44 = vpack.c.bf16 %v3155_v63, %v911_v43  ;;  %v2443_v63 = vld [vmem:[%s3749_s10 + $0x18] sm:$0xff]   ;;  %v311_v38 = vadd.f32 %v2313_v37, %v142_v34  ;;  %339 = vst.msk [vmem:[%s3751_s14 + $0x40] sm:$0xff] %vm330_vm1, %v300_v35 }
 0x17f   :  { %v137_v25 = vpop.permute.xlu0 %136  ;;  %340 = vst.msk [vmem:[%s3751_s14 + $0x48] sm:$0xff] %vm330_vm1, %v303_v40 }
 0x180   :  { %2425 = vmatprep.subr.msk.bf16.mxu1 %vm1092_vm9, %v930_v44  ;;  %v1094_v48 = vsel %vm1092_vm9, %v930_v44, 0  ;;  %v308_v29 = vadd.f32 %v2312_v28, %v137_v25  ;;  %342 = vst.msk [vmem:[%s3751_s14 + $0x58] sm:$0xff] %vm330_vm1, %v311_v38 }
 0x181   :  { %2347 = vmatpush3.bf16.msra.mxu1 %v1094_v48 }
 0x182   :  { %341 = vst.msk [vmem:[%s3751_s14 + $0x50] sm:$0xff] %vm330_vm1, %v308_v29 }
 0x183   :  { %v147_v41 = vpop.permute.xlu0 %146 }
 0x184   :  { %2349 = vmatmul.mubr.msk.bf16.vlgmr.msra.gmra.mrb[8].mxu1 %vm1067_vm10, %v2441_v46 }
 0x185   :  { %2352 = vmatprep.mubr.msk.bf16.mxu1 %vm1067_vm10, %v2442_v47  ;;  %v152_v47 = vpop.permute.xlu1 %151 }
 0x187   :  { %v157_v42 = vpop.permute.xlu0 %156 }
 0x189   :  { %v162_v52 = vpop.permute.xlu1 %161 }
 0x18c   :  { %2353 = vmatmul.mubr.msk.bf16.gmra.mrb[12].mxu1 %vm1067_vm10, %v2443_v63 }
 0x18d   :  { %2356 = vmatprep.mubr.msk.bf16.mxu1 %vm1067_vm10, %v2444_v54 }
 0x194   :  { %2357 = vmatmul.mubr.msk.bf16.gmra.mrb[16].mxu1 %vm1067_vm10, %v2445_v59  ;;  %v2448_v59 = vld [vmem:[%s3752_s12] sm:$0xff]  }
 0x195   :  { %2360 = vmatprep.mubr.msk.bf16.mxu1 %vm1067_vm10, %v2446_v27  ;;  %2380 = vmatprep.mubr.bf16.mxu0 %v2448_v59 }
 0x19c   :  { %2361 = vmatmul.mubr.msk.bf16.gmra.mrb[20].mxu1 %vm1067_vm10, %v2447_v0 }
 0x19d   :  { %2392 = vmatprep.mubr.bf16.mxu1 %v2449_v60 }
 0x1b6   :  { %v2316_v43 = vpop.f32.mrb[12].mxu0 }
 0x1b7   :  { %v324_v44 = vadd.f32 %v2316_v43, %v157_v42  ;;  %v315_v48 = vpop.f32.mrb[13].mxu0 }
 0x1b8   :  { %v316_v46 = vadd.f32 %v315_v48, %v147_v41  ;;  %v2317_v63 = vpop.f32.mrb[14].mxu0 }
 0x1b9   :  { %345 = vst.msk [vmem:[%s3751_s14 + $0x70] sm:$0xff] %vm330_vm1, %v324_v44  ;;  %v318_v54 = vpop.f32.mrb[15].mxu0  ;;  %v327_v56 = vadd.f32 %v2317_v63, %v162_v52 }
 0x1ba   :  { %343 = vst.msk [vmem:[%s3751_s14 + $0x60] sm:$0xff] %vm330_vm1, %v316_v46  ;;  %v319_v58 = vadd.f32 %v318_v54, %v152_v47 }
 0x1bb   :  { %346 = vst.msk [vmem:[%s3751_s14 + $0x78] sm:$0xff] %vm330_vm1, %v327_v56 }
 0x1bc   :  { %344 = vst.msk [vmem:[%s3751_s14 + $0x68] sm:$0xff] %vm330_vm1, %v319_v58 }
 0x257   :  { %v2350_v27 = vpop.f32.mrb[8].mxu1 }
 0x258   :  { %v3349_v61 = vadd.f32 %v2350_v27, %v3205_v2  ;;  %v1130_v51 = vpop.f32.mrb[9].mxu1 }
 0x259   :  { %v3352_v62 = vadd.f32 %v1130_v51, %v3203_v16  ;;  %v2351_v20 = vpop.f32.mrb[10].mxu1 }
 0x25a   :  { %v2215_v5 = vmul.f32 -1.442695, %v3349_v61  ;;  %v3356_v0 = vadd.f32 %v2351_v20, %v3213_v8  ;;  %v1133_v1 = vpop.f32.mrb[11].mxu1 }
 0x25b   :  { %v2213_v21 = vmul.f32 -1.442695, %v3352_v62  ;;  %v3360_v3 = vadd.f32 %v1133_v1, %v3209_v7 }
 0x25c   :  { %2504 = vpow2.f32 %v2215_v5  ;;  %v2216_v2 = vmul.f32 -1.442695, %v3356_v0 }
 0x25d   :  { %2506 = vpow2.f32 %v2213_v21  ;;  %v2214_v4 = vmul.f32 -1.442695, %v3360_v3 }
 0x25e   :  { %2508 = vpow2.f32 %v2216_v2 }
 0x25f   :  { %2510 = vpow2.f32 %v2214_v4  ;;  %v2354_v16 = vpop.f32.mrb[12].mxu1 }
 0x260   :  { %v3365_v53 = vadd.f32 %v2354_v16, %v3221_v23  ;;  %v1146_v8 = vpop.f32.mrb[13].mxu1 }
 0x261   :  { %v3368_v55 = vadd.f32 %v1146_v8, %v3215_v17  ;;  %v2355_v9 = vpop.f32.mrb[14].mxu1 }
 0x262   :  { %v2219_v7 = vmul.f32 -1.442695, %v3365_v53  ;;  %v3372_v13 = vadd.f32 %v2355_v9, %v3225_v26  ;;  %v1149_v14 = vpop.f32.mrb[15].mxu1 }
 0x263   :  { %v2217_v12 = vmul.f32 -1.442695, %v3368_v55  ;;  %v3376_v15 = vadd.f32 %v1149_v14, %v3217_v6 }
 0x264   :  { %2512 = vpow2.f32 %v2219_v7  ;;  %v2220_v23 = vmul.f32 -1.442695, %v3372_v13 }
 0x265   :  { %2514 = vpow2.f32 %v2217_v12  ;;  %v2218_v57 = vmul.f32 -1.442695, %v3376_v15 }
 0x266   :  { %v2505_v17 = vpop.eup %2504  ;;  %2516 = vpow2.f32 %v2220_v23 }
 0x267   :  { %v2507_v18 = vpop.eup %2506  ;;  %v1243_v11 = vadd.f32 1.0, %v2505_v17  ;;  %2518 = vpow2.f32 %v2218_v57  ;;  %v2358_v19 = vpop.f32.mrb[16].mxu1 }
 0x268   :  { %v2509_v26 = vpop.eup %2508  ;;  %v1241_v22 = vadd.f32 1.0, %v2507_v18  ;;  %v3381_v10 = vadd.f32 %v2358_v19, %v3233_v33  ;;  %v1162_v25 = vpop.f32.mrb[17].mxu1 }
 0x269   :  { %v2511_v6 = vpop.eup %2510  ;;  %2520 = vrcp.f32 %v1243_v11  ;;  %v1244_v28 = vadd.f32 1.0, %v2509_v26  ;;  %v3384_v29 = vadd.f32 %v1162_v25, %v3229_v30  ;;  %v2359_v32 = vpop.f32.mrb[18].mxu1 }
 0x26a   :  { %2522 = vrcp.f32 %v1241_v22  ;;  %v1242_v34 = vadd.f32 1.0, %v2511_v6  ;;  %v2223_v35 = vmul.f32 -1.442695, %v3381_v10  ;;  %v3388_v37 = vadd.f32 %v2359_v32, %v3235_v36  ;;  %v1165_v38 = vpop.f32.mrb[19].mxu1 }
 0x26b   :  { %2524 = vrcp.f32 %v1244_v28  ;;  %v2221_v33 = vmul.f32 -1.442695, %v3384_v29  ;;  %v3392_v39 = vadd.f32 %v1165_v38, %v3231_v31 }
 0x26c   :  { %2526 = vrcp.f32 %v1242_v34  ;;  %v2224_v40 = vmul.f32 -1.442695, %v3388_v37 }
 0x26d   :  { %2528 = vpow2.f32 %v2223_v35  ;;  %v2222_v30 = vmul.f32 -1.442695, %v3392_v39 }
 0x26e   :  { %v2513_v41 = vpop.eup %2512  ;;  %2530 = vpow2.f32 %v2221_v33 }
 0x26f   :  { %v2515_v42 = vpop.eup %2514  ;;  %v1247_v43 = vadd.f32 1.0, %v2513_v41  ;;  %2532 = vpow2.f32 %v2224_v40  ;;  %v2362_v36 = vpop.f32.mrb[20].mxu1 }
 0x270   :  { %v2517_v44 = vpop.eup %2516  ;;  %v1245_v48 = vadd.f32 1.0, %v2515_v42  ;;  %2534 = vpow2.f32 %v2222_v30  ;;  %v3397_v46 = vadd.f32 %v2362_v36, %v3252_v49  ;;  %v1178_v31 = vpop.f32.mrb[21].mxu1 }
 0x271   :  { %v2519_v47 = vpop.eup %2518  ;;  %2536 = vrcp.f32 %v1247_v43  ;;  %v1248_v63 = vadd.f32 1.0, %v2517_v44  ;;  %v3400_v52 = vadd.f32 %v1178_v31, %v3241_v24  ;;  %v2363_v54 = vpop.f32.mrb[22].mxu1 }
 0x272   :  { %2538 = vrcp.f32 %v1245_v48  ;;  %v1246_v56 = vadd.f32 1.0, %v2519_v47  ;;  %v2227_v58 = vmul.f32 -1.442695, %v3397_v46  ;;  %v3404_v59 = vadd.f32 %v2363_v54, %v3255_v50  ;;  %v1181_v60 = vpop.f32.mrb[23].mxu1 }
 0x273   :  { %v2521_v27 = vpop.eup %2520  ;;  %2540 = vrcp.f32 %v1248_v63  ;;  %v2225_v49 = vmul.f32 -1.442695, %v3400_v52  ;;  %v3408_v51 = vadd.f32 %v1181_v60, %v3244_v45  ;;  %v2453_v60 = vld [vmem:[%s3752_s12 + $0x18] sm:$0xff]  }
 0x274   :  { %v2523_v20 = vpop.eup %2522  ;;  %2542 = vrcp.f32 %v1246_v56  ;;  %v2228_v24 = vmul.f32 -1.442695, %v3404_v59  ;;  %v1291_v50 = vmul.f32 %v2521_v27, %v3349_v61  ;;  %v2454_v27 = vld [vmem:[%s3752_s12 + $0x20] sm:$0xff]  }
 0x275   :  { %v2525_v5 = vpop.eup %2524  ;;  %2544 = vpow2.f32 %v2227_v58  ;;  %v2226_v1 = vmul.f32 -1.442695, %v3408_v51  ;;  %v1289_v16 = vmul.f32 %v2523_v20, %v3352_v62  ;;  %v3448_v20 = vpop.permute.xlu1 %1352 }
 0x276   :  { %v2527_v21 = vpop.eup %2526  ;;  %v1292_v2 = vmul.f32 %v2525_v5, %v3356_v0  ;;  %2546 = vpow2.f32 %v2225_v49  ;;  %v2455_v49 = vld [vmem:[%s3752_s12 + $0x28] sm:$0xff]  }
 0x277   :  { %v2529_v4 = vpop.eup %2528  ;;  %v1290_v45 = vmul.f32 %v2527_v21, %v3360_v3  ;;  %2548 = vpow2.f32 %v2228_v24 }
 0x278   :  { %v2531_v8 = vpop.eup %2530  ;;  %v1322_v9 = vpack.c.bf16 %v1292_v2, %v1291_v50  ;;  %v1251_v7 = vadd.f32 1.0, %v2529_v4  ;;  %2550 = vpow2.f32 %v2226_v1 }
 0x279   :  { %v2533_v14 = vpop.eup %2532  ;;  %v1321_v12 = vpack.c.bf16 %v1290_v45, %v1289_v16  ;;  %v1249_v23 = vadd.f32 1.0, %v2531_v8  ;;  %v3452_v5 = vpop.permute.xlu1 %1362 }
 0x27a   :  { %v2535_v57 = vpop.eup %2534  ;;  %2552 = vrcp.f32 %v1251_v7  ;;  %v1252_v17 = vadd.f32 1.0, %v2533_v14 }
 0x27b   :  { %v2537_v61 = vpop.eup %2536  ;;  %2554 = vrcp.f32 %v1249_v23  ;;  %v1250_v0 = vadd.f32 1.0, %v2535_v57  ;;  %2364 = vmatprep.subr.bf16.mxu0 %v1321_v12  ;;  %2408 = vmatprep.subr.bf16.mxu1 %v1321_v12 }
 0x27c   :  { %v2539_v18 = vpop.eup %2538  ;;  %2556 = vrcp.f32 %v1252_v17  ;;  %2365 = vmatpush3.bf16.msra.mxu0 %v1321_v12  ;;  %2416 = vmatpush3.bf16.msra.mxu1 %v1321_v12  ;;  %v1295_v11 = vmul.f32 %v2537_v61, %v3365_v53 }
 0x27d   :  { %v2541_v62 = vpop.eup %2540  ;;  %2558 = vrcp.f32 %v1250_v0  ;;  %2366 = vmatprep.subr.bf16.mxu0 %v1322_v9  ;;  %2409 = vmatprep.subr.bf16.mxu1 %v1322_v9  ;;  %v1293_v22 = vmul.f32 %v2539_v18, %v3368_v55  ;;  %v3456_v21 = vpop.permute.xlu1 %1372 }
 0x27e   :  { %v2543_v3 = vpop.eup %2542  ;;  %v1296_v19 = vmul.f32 %v2541_v62, %v3372_v13 }
 0x27f   :  { %v2545_v26 = vpop.eup %2544  ;;  %v1294_v25 = vmul.f32 %v2543_v3, %v3376_v15 }
 0x280   :  { %v2547_v6 = vpop.eup %2546  ;;  %v1324_v28 = vpack.c.bf16 %v1296_v19, %v1295_v11  ;;  %v1255_v32 = vadd.f32 1.0, %v2545_v26  ;;  %2367 = vmatpush3.bf16.msra.mxu0 %v1322_v9  ;;  %2417 = vmatpush3.bf16.msra.mxu1 %v1322_v9 }
 0x281   :  { %v2549_v34 = vpop.eup %2548  ;;  %v1323_v35 = vpack.c.bf16 %v1294_v25, %v1293_v22  ;;  %v1253_v38 = vadd.f32 1.0, %v2547_v6  ;;  %v3460_v2 = vpop.permute.xlu1 %1382 }
 0x282   :  { %v2551_v33 = vpop.eup %2550  ;;  %2560 = vrcp.f32 %v1255_v32  ;;  %v1256_v40 = vadd.f32 1.0, %v2549_v34 }
 0x283   :  { %2562 = vrcp.f32 %v1253_v38  ;;  %v1254_v53 = vadd.f32 1.0, %v2551_v33  ;;  %2368 = vmatprep.subr.bf16.mxu0 %v1323_v35  ;;  %2410 = vmatprep.subr.bf16.mxu1 %v1323_v35 }
 0x284   :  { %v2553_v13 = vpop.eup %2552  ;;  %2564 = vrcp.f32 %v1256_v40  ;;  %2369 = vmatpush3.bf16.msra.mxu0 %v1323_v35  ;;  %2418 = vmatpush3.bf16.msra.mxu1 %v1323_v35 }
 0x285   :  { %v2555_v55 = vpop.eup %2554  ;;  %2566 = vrcp.f32 %v1254_v53  ;;  %2370 = vmatprep.subr.bf16.mxu0 %v1324_v28  ;;  %2411 = vmatprep.subr.bf16.mxu1 %v1324_v28  ;;  %v1299_v41 = vmul.f32 %v2553_v13, %v3381_v10  ;;  %v3464_v16 = vpop.permute.xlu1 %1392 }
 0x286   :  { %v2557_v15 = vpop.eup %2556  ;;  %v1297_v43 = vmul.f32 %v2555_v55, %v3384_v29 }
 0x287   :  { %v2559_v30 = vpop.eup %2558  ;;  %v1300_v42 = vmul.f32 %v2557_v15, %v3388_v37 }
 0x288   :  { %v1298_v36 = vmul.f32 %v2559_v30, %v3392_v39  ;;  %2371 = vmatpush3.bf16.msra.mxu0 %v1324_v28  ;;  %2419 = vmatpush3.bf16.msra.mxu1 %v1324_v28 }
 0x289   :  { %v1326_v44 = vpack.c.bf16 %v1300_v42, %v1299_v41  ;;  %v3468_v8 = vpop.permute.xlu1 %1402  ;;  %v3497_v42 = vld [vmem:[%s3753_s7] ss:$0 sm:$0xff] }
 0x28a   :  { %v1325_v48 = vpack.c.bf16 %v1298_v36, %v1297_v43 }
 0x28c   :  { %v2561_v31 = vpop.eup %2560  ;;  %2372 = vmatprep.subr.bf16.mxu0 %v1325_v48  ;;  %2412 = vmatprep.subr.bf16.mxu1 %v1325_v48 }
 0x28d   :  { %v2563_v47 = vpop.eup %2562  ;;  %2373 = vmatpush3.bf16.msra.mxu0 %v1325_v48  ;;  %2420 = vmatpush3.bf16.msra.mxu1 %v1325_v48  ;;  %v1303_v37 = vmul.f32 %v2561_v31, %v3397_v46  ;;  %v2450_v46 = vld [vmem:[%s3752_s12 + $0x8] sm:$0xff]   ;;  %v3472_v7 = vpop.permute.xlu1 %1412 }
 0x28e   :  { %v2565_v63 = vpop.eup %2564  ;;  %2374 = vmatprep.subr.bf16.mxu0 %v1326_v44  ;;  %2413 = vmatprep.subr.bf16.mxu1 %v1326_v44  ;;  %v1301_v39 = vmul.f32 %v2563_v47, %v3400_v52  ;;  %v2451_v52 = vld [vmem:[%s3752_s12 + $0x38] sm:$0xff]  }
 0x28f   :  { %v2567_v10 = vpop.eup %2566  ;;  %v1304_v29 = vmul.f32 %v2565_v63, %v3404_v59  ;;  %v2452_v59 = vld [vmem:[%s3752_s12 + $0x10] sm:$0xff]  }
 0x290   :  { %v1302_v54 = vmul.f32 %v2567_v10, %v3408_v51  ;;  %v3446_v51 = vpop.permute.xlu0 %1347 }
 0x291   :  { %v1328_v56 = vpack.c.bf16 %v1304_v29, %v1303_v37  ;;  %2375 = vmatpush3.bf16.msra.mxu0 %v1326_v44  ;;  %2421 = vmatpush3.bf16.msra.mxu1 %v1326_v44  ;;  %v3476_v12 = vpop.permute.xlu1 %1422 }
 0x292   :  { %v1327_v58 = vpack.c.bf16 %v1302_v54, %v1301_v39 }
 0x294   :  { %2376 = vmatprep.subr.bf16.mxu0 %v1327_v58  ;;  %2414 = vmatprep.subr.bf16.mxu1 %v1327_v58  ;;  %v3450_v24 = vpop.permute.xlu0 %1357 }
 0x295   :  { %2377 = vmatpush3.bf16.msra.mxu0 %v1327_v58  ;;  %2422 = vmatpush3.bf16.msra.mxu1 %v1327_v58  ;;  %v1777_v57 = vpop.permute.xlu1 %1776 }
 0x296   :  { %2378 = vmatprep.subr.bf16.mxu0 %v1328_v56  ;;  %2415 = vmatprep.subr.bf16.mxu1 %v1328_v56  ;;  %v1850_v48 = vsub.f32 %v3497_v42, %v1777_v57 }
 0x298   :  { %v3454_v1 = vpop.permute.xlu0 %1367 }
 0x299   :  { %2379 = vmatpush3.bf16.msra.mxu0 %v1328_v56  ;;  %2423 = vmatpush3.bf16.msra.mxu1 %v1328_v56  ;;  %v1787_v61 = vpop.permute.xlu1 %1786 }
 0x29a   :  { %v1852_v47 = vsub.f32 %v3497_v42, %v1787_v61 }
 0x29c   :  { %2381 = vmatmul.mubr.bf16.vlgmr.msra.gmra.mrb[16].mxu0 %v2450_v46  ;;  %2393 = vmatmul.mubr.bf16.vlgmr.msra.gmra.mrb[24].mxu1 %v2451_v52  ;;  %v3458_v50 = vpop.permute.xlu0 %1377 }
 0x29d   :  { %2384 = vmatprep.mubr.bf16.mxu0 %v2452_v59  ;;  %v1797_v18 = vpop.permute.xlu1 %1796 }
 0x29e   :  { %v1854_v39 = vsub.f32 %v3497_v42, %v1797_v18 }
 0x2a0   :  { %v3462_v4 = vpop.permute.xlu0 %1387 }
 0x2a1   :  { %v1807_v3 = vpop.permute.xlu1 %1806 }
 0x2a2   :  { %v1856_v46 = vsub.f32 %v3497_v42, %v1807_v3 }
 0x2a4   :  { %2385 = vmatmul.mubr.bf16.gmra.mrb[20].mxu0 %v2453_v60  ;;  %v3466_v45 = vpop.permute.xlu0 %1397 }
 0x2a5   :  { %2388 = vmatprep.mubr.bf16.mxu0 %v2454_v27  ;;  %v3480_v19 = vpop.permute.xlu1 %1816 }
 0x2a8   :  { %v3470_v9 = vpop.permute.xlu0 %1407 }
 0x2a9   :  { %v3484_v22 = vpop.permute.xlu1 %1826 }
 0x2ac   :  { %2389 = vmatmul.mubr.bf16.gmra.mrb[24].mxu0 %v2455_v49  ;;  %v3474_v14 = vpop.permute.xlu0 %1417 }
 0x2ad   :  { %v1837_v6 = vpop.permute.xlu1 %1836 }
 0x2ae   :  { %v1862_v49 = vsub.f32 %v3497_v42, %v1837_v6 }
 0x2b0   :  { %v1772_v23 = vpop.permute.xlu0 %1771 }
 0x2b1   :  { %v3486_v32 = vpop.permute.xlu1 %1846  ;;  %v1849_v44 = vsub.f32 %v3497_v42, %v1772_v23 }
 0x2b4   :  { %v1782_v17 = vpop.permute.xlu0 %1781 }
 0x2b5   :  { %v1873_v35 = vpop.permute.xlu1 %1872  ;;  %v1851_v31 = vsub.f32 %v3497_v42, %v1782_v17 }
 0x2b6   :  { %v1946_v54 = vmul.f32 %v1873_v35, %v1850_v48 }
 0x2b8   :  { %v1792_v0 = vpop.permute.xlu0 %1791  ;;  %v1962_v23 = vmul.f32 -0.5, %v1946_v54 }
 0x2b9   :  { %v1883_v33 = vpop.permute.xlu1 %1882  ;;  %v1853_v37 = vsub.f32 %v3497_v42, %v1792_v0 }
 0x2ba   :  { %v1948_v52 = vmul.f32 %v1883_v33, %v1852_v47 }
 0x2bc   :  { %v1802_v62 = vpop.permute.xlu0 %1801 }
 0x2bd   :  { %v1893_v53 = vpop.permute.xlu1 %1892  ;;  %v1855_v56 = vsub.f32 %v3497_v42, %v1802_v62  ;;  %v1964_v62 = vmul.f32 -0.5, %v1948_v52 }
 0x2be   :  { %v1950_v57 = vmul.f32 %v1893_v53, %v1854_v39 }
 0x2bf   :  { %v1980_v47 = vmul.f32 %v1964_v62, %v1948_v52 }
 0x2c0   :  { %v3478_v11 = vpop.permute.xlu0 %1811 }
 0x2c1   :  { %v1903_v55 = vpop.permute.xlu1 %1902 }
 0x2c2   :  { %v1952_v35 = vmul.f32 %v1903_v55, %v1856_v46 }
 0x2c4   :  { %v3482_v26 = vpop.permute.xlu0 %1821  ;;  %v1968_v53 = vmul.f32 -0.5, %v1952_v35 }
 0x2c5   :  { %v3490_v30 = vpop.permute.xlu1 %1912 }
 0x2c8   :  { %v1832_v25 = vpop.permute.xlu0 %1831 }
 0x2c9   :  { %v3499_v43 = vpop.permute.xlu1 %1922  ;;  %v1861_v59 = vsub.f32 %v3497_v42, %v1832_v25  ;;  %v1966_v25 = vmul.f32 -0.5, %v1950_v57 }
 0x2cb   :  { %v1982_v55 = vmul.f32 %v1966_v25, %v1950_v57 }
 0x2cc   :  { %v1842_v28 = vpop.permute.xlu0 %1841 }
 0x2cd   :  { %v1933_v63 = vpop.permute.xlu1 %1932  ;;  %v1863_v0 = vsub.f32 %v3497_v42, %v1842_v28  ;;  %v2003_v52 = vmul.f32 1.442695, %v1982_v55 }
 0x2ce   :  { %v1958_v48 = vmul.f32 %v1933_v63, %v1862_v49  ;;  %v1984_v63 = vmul.f32 %v1968_v53, %v1952_v35 }
 0x2d0   :  { %v1868_v34 = vpop.permute.xlu0 %1867  ;;  %v2007_v57 = vmul.f32 1.442695, %v1984_v63 }
 0x2d1   :  { %v1945_v29 = vmul.f32 %v1868_v34, %v1849_v44  ;;  %v1943_v17 = vpop.permute.xlu1 %1942  ;;  %v1978_v44 = vmul.f32 %v1962_v23, %v1946_v54 }
 0x2d3   :  { %v1961_v60 = vmul.f32 -0.5, %v1945_v29 }
 0x2d4   :  { %v1878_v38 = vpop.permute.xlu0 %1877 }
 0x2d5   :  { %v1947_v58 = vmul.f32 %v1878_v38, %v1851_v31  ;;  %v1977_v38 = vmul.f32 %v1961_v60, %v1945_v29  ;;  %v1974_v29 = vmul.f32 -0.5, %v1958_v48 }
 0x2d7   :  { %v1963_v18 = vmul.f32 -0.5, %v1947_v58  ;;  %v1993_v28 = vmul.f32 1.442695, %v1977_v38  ;;  %v1990_v60 = vmul.f32 %v1974_v29, %v1958_v48 }
 0x2d8   :  { %v1888_v40 = vpop.permute.xlu0 %1887 }
 0x2d9   :  { %v1949_v27 = vmul.f32 %v1888_v40, %v1853_v37  ;;  %v1979_v40 = vmul.f32 %v1963_v18, %v1947_v58  ;;  %v3514_v37 = vpop.permute.xlu1 %2048  ;;  %2568 = vpow2.f32 %v1993_v28 }
 0x2db   :  { %v1965_v3 = vmul.f32 -0.5, %v1949_v27  ;;  %v1997_v46 = vmul.f32 1.442695, %v1979_v40 }
 0x2dc   :  { %v1898_v13 = vpop.permute.xlu0 %1897 }
 0x2dd   :  { %v1951_v34 = vmul.f32 %v1898_v13, %v1855_v56  ;;  %v1995_v56 = vmul.f32 1.442695, %v1978_v44  ;;  %v3518_v49 = vpop.permute.xlu1 %2058 }
 0x2df   :  { %v1967_v31 = vmul.f32 -0.5, %v1951_v34  ;;  %2570 = vpow2.f32 %v1995_v56 }
 0x2e0   :  { %v3488_v15 = vpop.permute.xlu0 %1907  ;;  %2572 = vpow2.f32 %v1997_v46 }
 0x2e1   :  { %v3524_v35 = vpop.permute.xlu1 %2068 }
 0x2e4   :  { %v3492_v41 = vpop.permute.xlu0 %1917 }
 0x2e8   :  { %v1928_v36 = vpop.permute.xlu0 %1927 }
 0x2e9   :  { %v1957_v33 = vmul.f32 %v1928_v36, %v1861_v59  ;;  %v1983_v36 = vmul.f32 %v1967_v31, %v1951_v34  ;;  %v1999_v59 = vmul.f32 1.442695, %v1980_v47  ;;  %v1864_v34 = vsub.f32 %v3497_v42, %v3486_v32  ;;  %v3534_v31 = vpop.eup %2568 }
 0x2eb   :  { %v1973_v13 = vmul.f32 -0.5, %v1957_v33  ;;  %2574 = vpow2.f32 %v1999_v59  ;;  %v1960_v44 = vmul.f32 %v1943_v17, %v1864_v34  ;;  %v3542_v17 = vpop.eup %2570 }
 0x2ec   :  { %v1938_v10 = vpop.permute.xlu0 %1937  ;;  %v3552_v29 = vpop.eup %2572 }
 0x2ed   :  { %v1959_v6 = vmul.f32 %v1938_v10, %v1863_v0  ;;  %v1989_v10 = vmul.f32 %v1973_v13, %v1957_v33 }
 0x2ef   :  { %v1975_v54 = vmul.f32 -0.5, %v1959_v6  ;;  %v2017_v18 = vmul.f32 1.442695, %v1989_v10 }
 0x2f0   :  { %v3511_v61 = vpop.permute.xlu0 %2043 }
 0x2f1   :  { %3755 = vst [vmem:[#allocation2_spill] sm:$0xff] %v3511_v61  ;;  %v1981_v61 = vmul.f32 %v1965_v3, %v1949_v27  ;;  %v2005_v27 = vmul.f32 1.442695, %v1983_v36  ;;  %v1991_v0 = vmul.f32 %v1975_v54, %v1959_v6 }
 0x2f3   :  { %v2001_v58 = vmul.f32 1.442695, %v1981_v61  ;;  %v2019_v61 = vmul.f32 1.442695, %v1990_v60  ;;  %v2021_v62 = vmul.f32 1.442695, %v1991_v0 }
 0x2f4   :  { %v3516_v39 = vpop.permute.xlu0 %2053 }
 0x2f5   :  { %2576 = vpow2.f32 %v2001_v58  ;;  %v3562_v59 = vpop.eup %2574 }
 0x2f6   :  { %2578 = vpow2.f32 %v2003_v52  ;;  %v3570_v52 = vpop.permute.xlu1 %2078 }
 0x2f7   :  { %2580 = vpow2.f32 %v2005_v27 }
 0x2f8   :  { %v3520_v23 = vpop.permute.xlu0 %2063  ;;  %2582 = vpow2.f32 %v2007_v57 }
 0x2f9   :  { %2584 = vpow2.f32 %v2017_v18 }
 0x2fa   :  { %2586 = vpow2.f32 %v2019_v61 }
 0x2fb   :  { %2588 = vpow2.f32 %v2021_v62 }
 0x2fc   :  { %v3526_v38 = vpop.permute.xlu0 %2073 }
 0x2ff   :  { %v3565_v63 = vpop.eup %2576 }
 0x300   :  { %v3568_v10 = vpop.eup %2578  ;;  %v3578_v18 = vpop.permute.xlu0 %2083 }
 0x36f   :  { %v2382_v3 = vpop.f32.mrb[16].mxu0  ;;  %v2394_v33 = vpop.f32.mrb[24].mxu1 }
 0x370   :  { %v3529_v25 = vadd.f32 %v2382_v3, %v3450_v24  ;;  %v3532_v48 = vadd.f32 %v2394_v33, %v3474_v14  ;;  %v1507_v32 = vpop.f32.mrb[17].mxu0  ;;  %v1555_v40 = vpop.f32.mrb[25].mxu1 }
 0x371   :  { %v3537_v6 = vadd.f32 %v1507_v32, %v3446_v51  ;;  %v3540_v47 = vadd.f32 %v1555_v40, %v3470_v9  ;;  %v2383_v53 = vpop.f32.mrb[18].mxu0  ;;  %v2395_v28 = vpop.f32.mrb[26].mxu1 }
 0x372   :  { %v2239_v24 = vmul.f32 -1.442695, %v3529_v25  ;;  %v2251_v14 = vmul.f32 -1.442695, %v3532_v48  ;;  %v3547_v13 = vadd.f32 %v2383_v53, %v3452_v5  ;;  %v3550_v56 = vadd.f32 %v2395_v28, %v3476_v12  ;;  %v1510_v55 = vpop.f32.mrb[19].mxu0  ;;  %v1558_v51 = vpop.f32.mrb[27].mxu1 }
 0x373   :  { %v2237_v9 = vmul.f32 -1.442695, %v3537_v6  ;;  %v2249_v46 = vmul.f32 -1.442695, %v3540_v47  ;;  %v3557_v36 = vadd.f32 %v1510_v55, %v3448_v20  ;;  %v3560_v54 = vadd.f32 %v1558_v51, %v3472_v7  ;;  %v3573_v7 = vpop.eup %2580  ;;  %v3602_v55 = vpop.permute.xlu1 %2088 }
 0x374   :  { %v1976_v5 = vmul.f32 -0.5, %v1960_v44  ;;  %2590 = vpow2.f32 %v2239_v24  ;;  %v2240_v12 = vmul.f32 -1.442695, %v3547_v13  ;;  %v2252_v58 = vmul.f32 -1.442695, %v3550_v56  ;;  %v3576_v0 = vpop.eup %2582  ;;  %3756 = vst [vmem:[#allocation3_spill] sm:$0xff] %v3602_v55 }
 0x375   :  { %2592 = vpow2.f32 %v2251_v14  ;;  %v2238_v20 = vmul.f32 -1.442695, %v3557_v36  ;;  %v2250_v60 = vmul.f32 -1.442695, %v3560_v54  ;;  %v3583_v62 = vpop.eup %2584 }
 0x376   :  { %2594 = vpow2.f32 %v2237_v9  ;;  %v1992_v57 = vmul.f32 %v1976_v5, %v1960_v44  ;;  %v3588_v32 = vpop.eup %2586  ;;  %v3608_v5 = vpop.permute.xlu0 %2093 }
 0x377   :  { %2596 = vpow2.f32 %v2249_v46  ;;  %v2386_v27 = vpop.f32.mrb[20].mxu0  ;;  %v3594_v28 = vpop.eup %2588  ;;  %v1858_v46 = vsub.f32 %v3497_v42, %v3480_v19 }
 0x378   :  { %2598 = vpow2.f32 %v2240_v12  ;;  %v3581_v34 = vadd.f32 %v2386_v27, %v3458_v50  ;;  %v1523_v61 = vpop.f32.mrb[21].mxu0  ;;  %v2023_v14 = vmul.f32 1.442695, %v1992_v57 }
 0x379   :  { %2600 = vpow2.f32 %v2252_v58  ;;  %v3586_v3 = vadd.f32 %v1523_v61, %v3454_v1  ;;  %v2387_v33 = vpop.f32.mrb[22].mxu0  ;;  %v1857_v1 = vsub.f32 %v3497_v42, %v3478_v11  ;;  %v1859_v61 = vsub.f32 %v3497_v42, %v3482_v26 }
 0x37a   :  { %2602 = vpow2.f32 %v2238_v20  ;;  %v2243_v40 = vmul.f32 -1.442695, %v3581_v34  ;;  %v3592_v44 = vadd.f32 %v2387_v33, %v3460_v2  ;;  %v1526_v53 = vpop.f32.mrb[23].mxu0  ;;  %v2104_v26 = vpop.permute.xlu0 %2103 }
 0x37b   :  { %2604 = vpow2.f32 %v2250_v60  ;;  %v2241_v50 = vmul.f32 -1.442695, %v3586_v3  ;;  %v3598_v24 = vadd.f32 %v1526_v53, %v3456_v21  ;;  %v1953_v20 = vmul.f32 %v3488_v15, %v1857_v1 }
 0x37c   :  { %2606 = vpow2.f32 %v2243_v40  ;;  %v2244_v51 = vmul.f32 -1.442695, %v3592_v44  ;;  %v1954_v53 = vmul.f32 %v3490_v30, %v1858_v46  ;;  %v1860_v15 = vsub.f32 %v3497_v42, %v3484_v22 }
 0x37d   :  { %2608 = vpow2.f32 %v2241_v50  ;;  %v2242_v2 = vmul.f32 -1.442695, %v3598_v24  ;;  %v3614_v50 = vpop.permute.xlu1 %2098  ;;  %v1955_v55 = vmul.f32 %v3492_v41, %v1859_v61 }
 0x37e   :  { %v2591_v9 = vpop.eup %2590  ;;  %2610 = vpow2.f32 %v2244_v51  ;;  %3757 = vst [vmem:[#allocation4_spill] sm:$0xff] %v3614_v50 }
 0x37f   :  { %v2593_v21 = vpop.eup %2592  ;;  %v1620_v12 = vadd.f32 1.0, %v2591_v9  ;;  %2612 = vpow2.f32 %v2242_v2  ;;  %v2390_v11 = vpop.f32.mrb[24].mxu0 }
 0x380   :  { %v2595_v58 = vpop.eup %2594  ;;  %2614 = vpow2.f32 %v2023_v14  ;;  %v1632_v60 = vadd.f32 1.0, %v2593_v21  ;;  %v1539_v27 = vpop.f32.mrb[25].mxu0  ;;  %v1969_v21 = vmul.f32 -0.5, %v1953_v20  ;;  %v3620_v46 = vadd.f32 %v2390_v11, %v3466_v45 }
 0x381   :  { %v2597_v57 = vpop.eup %2596  ;;  %2616 = vrcp.f32 %v1620_v12  ;;  %v1618_v33 = vadd.f32 1.0, %v2595_v58  ;;  %v2391_v19 = vpop.f32.mrb[26].mxu0  ;;  %v3623_v22 = vadd.f32 %v1539_v27, %v3462_v4 }
 0x382   :  { %v2599_v40 = vpop.eup %2598  ;;  %2618 = vrcp.f32 %v1632_v60  ;;  %v1630_v51 = vadd.f32 1.0, %v2597_v57  ;;  %v1542_v2 = vpop.f32.mrb[27].mxu0  ;;  %v1970_v57 = vmul.f32 -0.5, %v1954_v53  ;;  %v2247_v27 = vmul.f32 -1.442695, %v3620_v46 }
 0x383   :  { %v2601_v9 = vpop.eup %2600  ;;  %2620 = vrcp.f32 %v1618_v33  ;;  %v1621_v1 = vadd.f32 1.0, %v2599_v40  ;;  %v1956_v33 = vmul.f32 %v3499_v43, %v1860_v15  ;;  %v2109_v61 = vpop.permute.xlu1 %2108  ;;  %v3630_v11 = vadd.f32 %v1542_v2, %v3464_v16 }
 0x384   :  { %v2603_v14 = vpop.eup %2602  ;;  %2622 = vrcp.f32 %v1630_v51  ;;  %v1633_v12 = vadd.f32 1.0, %v2601_v9  ;;  %v3627_v51 = vadd.f32 %v2391_v19, %v3468_v8  ;;  %v1985_v43 = vmul.f32 %v1969_v21, %v1953_v20  ;;  %v2114_v15 = vpop.permute.xlu0 %2113 }
 0x385   :  { %v2605_v58 = vpop.eup %2604  ;;  %2624 = vrcp.f32 %v1621_v1  ;;  %v1619_v30 = vadd.f32 1.0, %v2603_v14  ;;  %v1971_v1 = vmul.f32 -0.5, %v1955_v55  ;;  %v2245_v8 = vmul.f32 -1.442695, %v3623_v22 }
 0x386   :  { %v2607_v60 = vpop.eup %2606  ;;  %2626 = vrcp.f32 %v1633_v12  ;;  %v1631_v50 = vadd.f32 1.0, %v2605_v58  ;;  %v1986_v58 = vmul.f32 %v1970_v57, %v1954_v53  ;;  %v2248_v16 = vmul.f32 -1.442695, %v3627_v51  ;;  %v3758_v57 = vld [vmem:[#allocation2_spill] sm:$0xff] }
 0x387   :  { %v2609_v42 = vpop.eup %2608  ;;  %2628 = vrcp.f32 %v1619_v30  ;;  %v1624_v40 = vadd.f32 1.0, %v2607_v60  ;;  %v2123_v30 = vmul.f32 %v3552_v29, %v3516_v39  ;;  %v2246_v20 = vmul.f32 -1.442695, %v3630_v11 }
 0x388   :  { %v2611_v41 = vpop.eup %2610  ;;  %2630 = vrcp.f32 %v1631_v50  ;;  %v1622_v45 = vadd.f32 1.0, %v2609_v42  ;;  %v1972_v50 = vmul.f32 -0.5, %v1956_v33  ;;  %v1987_v42 = vmul.f32 %v1971_v1, %v1955_v55 }
 0x389   :  { %v2613_v9 = vpop.eup %2612  ;;  %2632 = vrcp.f32 %v1624_v40  ;;  %v1625_v4 = vadd.f32 1.0, %v2611_v41  ;;  %v2135_v40 = vmul.f32 %v3594_v28, %v2114_v15  ;;  %v2133_v29 = vmul.f32 %v3583_v62, %v2104_v26 }
 0x38a   :  { %v2615_v14 = vpop.eup %2614  ;;  %2634 = vrcp.f32 %v1622_v45  ;;  %v1623_v12 = vadd.f32 1.0, %v2613_v9  ;;  %v2121_v45 = vmul.f32 %v3534_v31, %v3758_v57  ;;  %v2119_v9 = vpop.permute.xlu1 %2118  ;;  %v2009_v26 = vmul.f32 1.442695, %v1985_v43 }
 0x38b   :  { %v2617_v19 = vpop.eup %2616  ;;  %2636 = vrcp.f32 %v1625_v4  ;;  %v2136_v62 = vmul.f32 %v2615_v14, %v2119_v9  ;;  %v2122_v15 = vmul.f32 %v3542_v17, %v3514_v37  ;;  %v2013_v43 = vmul.f32 1.442695, %v1987_v42 }
 0x38c   :  { %v2619_v2 = vpop.eup %2618  ;;  %v1668_v60 = vmul.f32 %v2617_v19, %v3529_v25  ;;  %2638 = vrcp.f32 %v1623_v12  ;;  %v2134_v19 = vmul.f32 %v3588_v32, %v2109_v61 }
 0x38d   :  { %v2621_v21 = vpop.eup %2620  ;;  %v1680_v41 = vmul.f32 %v2619_v2, %v3532_v48  ;;  %2640 = vpow2.f32 %v2247_v27  ;;  %v2124_v48 = vmul.f32 %v3562_v59, %v3518_v49  ;;  %v1988_v27 = vmul.f32 %v1972_v50, %v1956_v33 }
 0x38e   :  { %v2623_v53 = vpop.eup %2622  ;;  %v2139_v4 = vadd.f32 %v2123_v30, %v1668_v60  ;;  %v1666_v39 = vmul.f32 %v2621_v21, %v3537_v6  ;;  %2642 = vpow2.f32 %v2245_v8  ;;  %v2011_v8 = vmul.f32 1.442695, %v1986_v58 }
 0x38f   :  { %v2625_v25 = vpop.eup %2624  ;;  %v2151_v12 = vadd.f32 %v2135_v40, %v1680_v41  ;;  %v1678_v55 = vmul.f32 %v2623_v53, %v3540_v47  ;;  %2644 = vpow2.f32 %v2248_v16  ;;  %v2127_v50 = vmul.f32 %v3573_v7, %v3526_v38 }
 0x390   :  { %v2627_v28 = vpop.eup %2626  ;;  %2155 = vst.msk [vmem:[%s3754_s15 + $0x10] sm:$0xff] %vm641_vm4, %v2139_v4  ;;  %v2137_v31 = vadd.f32 %v2121_v45, %v1666_v39  ;;  %v1669_v6 = vmul.f32 %v2625_v25, %v3547_v13  ;;  %2646 = vpow2.f32 %v2246_v20  ;;  %v2015_v58 = vmul.f32 1.442695, %v1988_v27 }
 0x391   :  { %v2629_v1 = vpop.eup %2628  ;;  %2167 = vst.msk [vmem:[%s3754_s15 + $0x70] sm:$0xff] %vm641_vm4, %v2151_v12  ;;  %v2149_v47 = vadd.f32 %v2133_v29, %v1678_v55  ;;  %v1681_v49 = vmul.f32 %v2627_v28, %v3550_v56  ;;  %v2125_v16 = vmul.f32 %v3565_v63, %v3520_v23  ;;  %2648 = vpow2.f32 %v2009_v26  ;;  %v3759_v28 = vld [vmem:[#allocation4_spill] sm:$0xff] }
 0x392   :  { %v2631_v59 = vpop.eup %2630  ;;  %2153 = vst.msk [vmem:[%s3754_s15] sm:$0xff] %vm641_vm4, %v2137_v31  ;;  %v2140_v13 = vadd.f32 %v2124_v48, %v1669_v6  ;;  %v1667_v33 = vmul.f32 %v2629_v1, %v3557_v36  ;;  %v2128_v2 = vmul.f32 %v3576_v0, %v3570_v52  ;;  %2650 = vpow2.f32 %v2011_v8  ;;  %v3760_v1 = vld [vmem:[#allocation3_spill] sm:$0xff] }
 0x393   :  { %v2633_v14 = vpop.eup %2632  ;;  %2165 = vst.msk [vmem:[%s3754_s15 + $0x60] sm:$0xff] %vm641_vm4, %v2149_v47  ;;  %v2152_v56 = vadd.f32 %v2136_v62, %v1681_v49  ;;  %v1679_v37 = vmul.f32 %v2631_v59, %v3560_v54  ;;  %v2126_v30 = vmul.f32 %v3568_v10, %v3524_v35  ;;  %2652 = vpow2.f32 %v2013_v43 }
 0x394   :  { %v2635_v17 = vpop.eup %2634  ;;  %2156 = vst.msk [vmem:[%s3754_s15 + $0x18] sm:$0xff] %vm641_vm4, %v2140_v13  ;;  %v2138_v36 = vadd.f32 %v2122_v15, %v1667_v33  ;;  %v1672_v32 = vmul.f32 %v2633_v14, %v3581_v34  ;;  %2654 = vpow2.f32 %v2015_v58 }
 0x395   :  { %v2637_v61 = vpop.eup %2636  ;;  %2168 = vst.msk [vmem:[%s3754_s15 + $0x78] sm:$0xff] %vm641_vm4, %v2152_v56  ;;  %v2150_v54 = vadd.f32 %v2134_v19, %v1679_v37  ;;  %v1670_v38 = vmul.f32 %v2635_v17, %v3586_v3 }
 0x396   :  { %v2639_v7 = vpop.eup %2638  ;;  %2154 = vst.msk [vmem:[%s3754_s15 + $0x8] sm:$0xff] %vm641_vm4, %v2138_v36  ;;  %v2143_v34 = vadd.f32 %v2127_v50, %v1672_v32  ;;  %v1673_v23 = vmul.f32 %v2637_v61, %v3592_v44 }
 0x397   :  { %v2641_v63 = vpop.eup %2640  ;;  %2166 = vst.msk [vmem:[%s3754_s15 + $0x68] sm:$0xff] %vm641_vm4, %v2150_v54  ;;  %v2141_v3 = vadd.f32 %v2125_v16, %v1670_v38  ;;  %v1671_v52 = vmul.f32 %v2639_v7, %v3598_v24 }
 0x398   :  { %v2643_v0 = vpop.eup %2642  ;;  %2159 = vst.msk [vmem:[%s3754_s15 + $0x30] sm:$0xff] %vm641_vm4, %v2143_v34  ;;  %v2144_v44 = vadd.f32 %v2128_v2, %v1673_v23  ;;  %v1628_v60 = vadd.f32 1.0, %v2641_v63 }
 0x399   :  { %v2645_v20 = vpop.eup %2644  ;;  %2157 = vst.msk [vmem:[%s3754_s15 + $0x20] sm:$0xff] %vm641_vm4, %v2141_v3  ;;  %v2142_v35 = vadd.f32 %v2126_v30, %v1671_v52  ;;  %v1626_v10 = vadd.f32 1.0, %v2643_v0 }
 0x39a   :  { %v2647_v21 = vpop.eup %2646  ;;  %2160 = vst.msk [vmem:[%s3754_s15 + $0x38] sm:$0xff] %vm641_vm4, %v2144_v44  ;;  %2656 = vrcp.f32 %v1628_v60  ;;  %v1629_v24 = vadd.f32 1.0, %v2645_v20 }
 0x39b   :  { %2158 = vst.msk [vmem:[%s3754_s15 + $0x28] sm:$0xff] %vm641_vm4, %v2142_v35  ;;  %2658 = vrcp.f32 %v1626_v10  ;;  %v1627_v42 = vadd.f32 1.0, %v2647_v21  ;;  %v2649_v40 = vpop.eup %2648 }
 0x39c   :  { %2660 = vrcp.f32 %v1629_v24  ;;  %v2651_v41 = vpop.eup %2650  ;;  %v2129_v29 = vmul.f32 %v2649_v40, %v3578_v18 }
 0x39d   :  { %2662 = vrcp.f32 %v1627_v42  ;;  %v2653_v53 = vpop.eup %2652  ;;  %v2130_v27 = vmul.f32 %v2651_v41, %v3760_v1 }
 0x39e   :  { %v2655_v57 = vpop.eup %2654  ;;  %v2131_v4 = vmul.f32 %v2653_v53, %v3608_v5 }
 0x39f   :  { %v2132_v48 = vmul.f32 %v2655_v57, %v3759_v28 }
 0x3a4   :  { %v2657_v45 = vpop.eup %2656 }
 0x3a5   :  { %v2659_v9 = vpop.eup %2658  ;;  %v1676_v39 = vmul.f32 %v2657_v45, %v3620_v46 }
 0x3a6   :  { %v2661_v25 = vpop.eup %2660  ;;  %v1674_v12 = vmul.f32 %v2659_v9, %v3623_v22 }
 0x3a7   :  { %v2663_v55 = vpop.eup %2662  ;;  %v2147_v31 = vadd.f32 %v2131_v4, %v1676_v39  ;;  %v1677_v6 = vmul.f32 %v2661_v25, %v3627_v51 }
 0x3a8   :  { %v2145_v62 = vadd.f32 %v2129_v29, %v1674_v12  ;;  %v1675_v47 = vmul.f32 %v2663_v55, %v3630_v11 }
 0x3a9   :  { %2163 = vst.msk [vmem:[%s3754_s15 + $0x50] sm:$0xff] %vm641_vm4, %v2147_v31  ;;  %v2148_v5 = vadd.f32 %v2132_v48, %v1677_v6 }
 0x3aa   :  { %2161 = vst.msk [vmem:[%s3754_s15 + $0x40] sm:$0xff] %vm641_vm4, %v2145_v62  ;;  %v2146_v18 = vadd.f32 %v2130_v27, %v1675_v47 }
 0x3ab   :  { %2164 = vst.msk [vmem:[%s3754_s15 + $0x58] sm:$0xff] %vm641_vm4, %v2148_v5 }
 0x3ac   :  { %2162 = vst.msk [vmem:[%s3754_s15 + $0x48] sm:$0xff] %vm641_vm4, %v2146_v18 }

// kernel: clofnet_forward.7
= control target key start
LH: loop header
LB: loop body
LE: loop exit
PB: predicated region body
PF: predicated region fallthrough
CT: control target
= control target key end

     0   :  { %v5099_v3 = vmov 0   ;;  %vm125_vm0 = vcmask 130048   ;;  %vm5101_vm1 = vmmov 0   ;;  %vm490_vm2 = vcmask 326656   ;;  %s6927_s5 = inlined_call_operand.vmem [shape: f32[16,40], index: 5, kind: input, shape index: {}]   ;;  %s6928_s0 = inlined_call_operand.vmem [shape: f32[128,16], index: 0, kind: input, shape index: {}]   ;;  %s6929_s4 = inlined_call_operand.vmem [shape: f32[16,40], index: 4, kind: input, shape index: {}]   ;;  %s6930_s10 = inlined_call_operand.vmem [shape: f32[128,1], index: 10, kind: input, shape index: {}]   ;;  %s6931_s12 = inlined_call_operand.vmem [shape: f32[128,1], index: 12, kind: input, shape index: {}]   ;;  %s6932_s14 = inlined_call_operand.vmem [shape: f32[128,1], index: 14, kind: input, shape index: {}]   ;;  %s6933_s1 = inlined_call_operand.vmem [shape: f32[8,16], index: 1, kind: input, shape index: {}]   ;;  %s6934_s16 = inlined_call_operand.vmem [shape: f32[128,1], index: 16, kind: input, shape index: {}]   ;;  %s6935_s9 = inlined_call_operand.vmem [shape: bf16[128,128], index: 9, kind: input, shape index: {}]   ;;  %s6936_s19 = inlined_call_operand.vmem [shape: f32[128,1], index: 19, kind: input, shape index: {}]   ;;  %s6937_s8 = inlined_call_operand.vmem [shape: bf16[128,128], index: 8, kind: input, shape index: {}]   ;;  %s6938_s24 = inlined_call_operand.vmem [shape: f32[128,1], index: 24, kind: input, shape index: {}]   ;;  %s6939_s11 = inlined_call_operand.vmem [shape: bf16[128,128], index: 11, kind: input, shape index: {}]   ;;  %s6940_s21 = inlined_call_operand.vmem [shape: f32[8,1], index: 21, kind: input, shape index: {}]   ;;  %s6941_s26 = inlined_call_operand.vmem [shape: f32[128,1], index: 26, kind: input, shape index: {}]   ;;  %s6942_s18 = inlined_call_operand.vmem [shape: bf16[128,128], index: 18, kind: input, shape index: {}]   ;;  %s6943_s3 = inlined_call_operand.vmem [shape: f32[128,40], index: 3, kind: input, shape index: {}]   ;;  %s6944_s13 = inlined_call_operand.vmem [shape: bf16[128,128], index: 13, kind: input, shape index: {}]   ;;  %s6945_s15 = inlined_call_operand.vmem [shape: bf16[128,128], index: 15, kind: input, shape index: {}]   ;;  %s6946_s17 = inlined_call_operand.vmem [shape: bf16[8,128], index: 17, kind: input, shape index: {}]   ;;  %s6947_s6 = inlined_call_operand.vmem [shape: f32[40,16], index: 6, kind: input, shape index: {}]   ;;  %s6948_s20 = inlined_call_operand.vmem [shape: bf16[8,128], index: 20, kind: input, shape index: {}]   ;;  %s6949_s23 = inlined_call_operand.vmem [shape: bf16[128,128], index: 23, kind: input, shape index: {}]   ;;  %s6950_s22 = inlined_call_operand.vmem [shape: bf16[128,128], index: 22, kind: input, shape index: {}]   ;;  %s6951_s7 = inlined_call_operand.vmem [shape: f32[1,16], index: 7, kind: input, shape index: {}]   ;;  %s6952_s2 = inlined_call_operand.vmem [shape: f32[8,16], index: 2, kind: input, shape index: {}]   ;;  %s6953_s28 = inlined_call_operand.vmem [shape: f32[8,16], index: 28, kind: output, shape index: {1}]   ;;  %s6954_s25 = inlined_call_operand.vmem [shape: bf16[128,128], index: 25, kind: input, shape index: {}]   ;;  %s6955_s27 = inlined_call_operand.vmem [shape: f32[128,16], index: 27, kind: output, shape index: {0}]  }
   0x1   :  { %6991 = sst [smem:[#allocation24_spill]] %s6927_s5  ;;  %4680 = vset.pattern.permute.xlu0 %v5099_v3  ;;  %4681 = vset.pattern.permute.xlu1 %v5099_v3  ;;  %vm527_vm3 = vcmask 1040384   ;;  %vm529_vm4 = vcmask 1041408   ;;  %vm542_vm5 = vcmask 321536   ;;  %vm2304_vm10 = vcmask 1042432  }
   0x2   :  { %6992 = sst [smem:[#allocation25_spill]] %s6928_s0  ;;  %vm2842_vm11 = vcmask 1043456  }
   0x3   :  { %6993 = sst [smem:[#allocation26_spill]] %s6929_s4  ;;  %s7005_s0 = sld [smem:[#allocation25_spill]] }
   0x4   :  { %6994 = sst [smem:[#allocation27_spill]] %s6930_s10 }
   0x5   :  { %6995 = sst [smem:[#allocation28_spill]] %s6931_s12 }
   0x6   :  { %6996 = sst [smem:[#allocation29_spill]] %s6932_s14  ;;  %s7013_s12 = sld [smem:[#allocation28_spill]] }
   0x7   :  { %6997 = sst [smem:[#allocation30_spill]] %s6933_s1  ;;  %s7009_s1 = sld [smem:[#allocation26_spill]] }
   0x8   :  { %6998 = sst [smem:[#allocation31_spill]] %s6934_s16  ;;  %s7010_s16 = sld [smem:[#allocation27_spill]] }
   0x9   :  { %6999 = sst [smem:[#allocation32_spill]] %s6935_s9  ;;  %v89_v2 = vld [vmem:[%s7005_s0] sm:$0xff]  ;;  %v90_v5 = vld [vmem:[%s7005_s0 + $0x8] sm:$0xff]  ;;  %v91_v6 = vld [vmem:[%s7005_s0 + $0x10] sm:$0xff]  ;;  %s7017_s29 = sld [smem:[#allocation29_spill]] }
   0xa   :  { %7000 = sst [smem:[#allocation33_spill]] %s6936_s19  ;;  %s7004_s19 = sld [smem:[#allocation24_spill]]  ;;  %v92_v7 = vld [vmem:[%s7005_s0 + $0x18] sm:$0xff]  ;;  %v5268_v8 = vpack.c.bf16 %v90_v5, %v89_v2  ;;  %v93_v9 = vld [vmem:[%s7005_s0 + $0x20] sm:$0xff]  ;;  %v94_v10 = vld [vmem:[%s7005_s0 + $0x28] sm:$0xff] }
   0xb   :  { %7001 = sst [smem:[#allocation34_spill]] %s6937_s8  ;;  %v5277_v11 = vpack.c.bf16 %v92_v7, %v91_v6  ;;  %v5282_v12 = vpack.c.bf16 %v94_v10, %v93_v9  ;;  %v95_v18 = vld [vmem:[%s7005_s0 + $0x30] sm:$0xff]  ;;  %v96_v19 = vld [vmem:[%s7005_s0 + $0x38] sm:$0xff]  ;;  %v97_v21 = vld [vmem:[%s7005_s0 + $0x40] sm:$0xff]  ;;  %v6969_v10 = vmov 0.0|0.0   ;;  %s7019_s10 = sld [smem:[#allocation31_spill]] }
   0xc   :  { %7002 = sst [smem:[#allocation35_spill]] %s6938_s24  ;;  %7006 = vst [vmem:[#allocation2_spill] sm:$0xff] %v5268_v8  ;;  %4206 = vmatprep.mubr.msk.bf16.mxu1 %vm125_vm0, %v5268_v8  ;;  %4188 = vmatprep.mubr.msk.bf16.mxu0 %vm125_vm0, %v5268_v8  ;;  %v98_v22 = vld [vmem:[%s7005_s0 + $0x48] sm:$0xff]  ;;  %v5324_v24 = vpack.c.bf16 %v96_v19, %v95_v18  ;;  %v1258_v26 = vld [vmem:[%s7013_s12] sm:$0xff]  ;;  %v99_v28 = vld [vmem:[%s7005_s0 + $0x50] sm:$0xff]  ;;  %s7020_s14 = sld [smem:[#allocation32_spill]] }
   0xd   :  { %7003 = sst [smem:[#allocation36_spill]] %s6939_s11  ;;  %7007 = vst [vmem:[#allocation3_spill] sm:$0xff] %v5277_v11  ;;  %7008 = vst [vmem:[#allocation4_spill] sm:$0xff] %v5282_v12  ;;  %v107_v13 = vld [vmem:[%s7009_s1] sm:$0xff]  ;;  %v108_v14 = vld [vmem:[%s7009_s1 + $0x8] sm:$0xff]  ;;  %v5326_v25 = vpack.c.bf16 %v98_v22, %v97_v21  ;;  %s7018_s1 = sld [smem:[#allocation30_spill]] }
   0xe   :  { %v1130_v15 = vld [vmem:[%s7010_s16] sm:$0xff]  ;;  %v5297_v16 = vpack.c.bf16 %v108_v14, %v107_v13  ;;  %v1132_v17 = vld [vmem:[%s7010_s16 + $0x10] sm:$0xff]  ;;  %v1131_v20 = vld [vmem:[%s7010_s16 + $0x8] sm:$0xff]  ;;  %7011 = vst [vmem:[#allocation5_spill] sm:$0xff] %v5324_v24  ;;  %s7021_s24 = sld [smem:[#allocation33_spill]]  ;;  %s7024_s8 = sld [smem:[#allocation36_spill]] }
   0xf   :  { %1148 = vperm.xlu0 %4680, %v1130_v15   ;;  %1158 = vperm.xlu1 %4681, %v1132_v17   ;;  %v1133_v23 = vld [vmem:[%s7010_s16 + $0x18] sm:$0xff]  ;;  %7012 = vst [vmem:[#allocation6_spill] sm:$0xff] %v5326_v25  ;;  %v1259_v27 = vld [vmem:[%s7013_s12 + $0x8] sm:$0xff]  ;;  %v1134_v30 = vld [vmem:[%s7010_s16 + $0x20] sm:$0xff]  ;;  %v6971_v17 = vmov 0.0  }
  0x10   :  { %v109_v0 = vld [vmem:[%s7004_s19] sm:$0xff]  ;;  %v110_v1 = vld [vmem:[%s7004_s19 + $0x8] sm:$0xff]  ;;  %4186 = vmatprep.subr.bf16.mxu0 %v5297_v16  ;;  %v100_v29 = vld [vmem:[%s7005_s0 + $0x58] sm:$0xff]  ;;  %s7023_s19 = sld [smem:[#allocation34_spill]] }
  0x11   :  { %v5257_v4 = vpack.c.bf16 %v110_v1, %v109_v0  ;;  %4187 = vmatpush3.bf16.msra.mxu0 %v5297_v16  ;;  %v101_v31 = vld [vmem:[%s7005_s0 + $0x60] sm:$0xff]  ;;  %v102_v32 = vld [vmem:[%s7005_s0 + $0x68] sm:$0xff]  ;;  %v5360_v34 = vpack.c.bf16 %v100_v29, %v99_v28  ;;  %v1260_v36 = vld [vmem:[%s7013_s12 + $0x10] sm:$0xff] }
  0x12   :  { %v1135_v33 = vld [vmem:[%s7010_s16 + $0x28] sm:$0xff]  ;;  %v5362_v35 = vpack.c.bf16 %v102_v32, %v101_v31  ;;  %v1261_v37 = vld [vmem:[%s7013_s12 + $0x18] sm:$0xff]  ;;  %v103_v38 = vld [vmem:[%s7005_s0 + $0x70] sm:$0xff] }
  0x13   :  { %4204 = vmatprep.subr.bf16.mxu1 %v5257_v4  ;;  %1153 = vperm.xlu0 %4680, %v1131_v20   ;;  %7014 = vst [vmem:[#allocation7_spill] sm:$0xff] %v5360_v34  ;;  %v104_v39 = vld [vmem:[%s7005_s0 + $0x78] sm:$0xff]  ;;  %v1136_v40 = vld [vmem:[%s7010_s16 + $0x30] sm:$0xff]  ;;  %v1262_v43 = vld [vmem:[%s7013_s12 + $0x20] sm:$0xff] }
  0x14   :  { %4205 = vmatpush3.bf16.msra.mxu1 %v5257_v4  ;;  %1163 = vperm.xlu1 %4681, %v1133_v23   ;;  %7015 = vst [vmem:[#allocation8_spill] sm:$0xff] %v5362_v35  ;;  %v1137_v41 = vld [vmem:[%s7010_s16 + $0x38] sm:$0xff]  ;;  %v5390_v42 = vpack.c.bf16 %v104_v39, %v103_v38  ;;  %v1263_v44 = vld [vmem:[%s7013_s12 + $0x28] sm:$0xff]  ;;  %v1138_v45 = vld [vmem:[%s7010_s16 + $0x40] sm:$0xff] }
  0x15   :  { %4189 = vmatmul.mubr.msk.bf16.vlgmr.msra.gmra.mrb[0].mxu0 %vm125_vm0, %v5277_v11  ;;  %v1139_v46 = vld [vmem:[%s7010_s16 + $0x48] sm:$0xff]  ;;  %v1264_v47 = vld [vmem:[%s7013_s12 + $0x30] sm:$0xff]  ;;  %v1265_v48 = vld [vmem:[%s7013_s12 + $0x38] sm:$0xff]  ;;  %4599 = vmatprep.subr.bf16.mxu1 %v6969_v10 }
  0x16   :  { %4192 = vmatprep.mubr.msk.bf16.mxu0 %vm125_vm0, %v5282_v12  ;;  %7016 = vst [vmem:[#allocation9_spill] sm:$0xff] %v5390_v42  ;;  %v1140_v49 = vld [vmem:[%s7010_s16 + $0x50] sm:$0xff]  ;;  %v1141_v50 = vld [vmem:[%s7010_s16 + $0x58] sm:$0xff]  ;;  %v1266_v51 = vld [vmem:[%s7013_s12 + $0x40] sm:$0xff] }
  0x17   :  { %4207 = vmatmul.mubr.msk.bf16.vlgmr.msra.gmra.mrb[0].mxu1 %vm125_vm0, %v5277_v11  ;;  %1276 = vperm.xlu0 %4680, %v1258_v26   ;;  %v1267_v52 = vld [vmem:[%s7013_s12 + $0x48] sm:$0xff]  ;;  %v1142_v53 = vld [vmem:[%s7010_s16 + $0x60] sm:$0xff]  ;;  %v1268_v55 = vld [vmem:[%s7013_s12 + $0x50] sm:$0xff] }
  0x18   :  { %4210 = vmatprep.mubr.msk.bf16.mxu1 %vm125_vm0, %v5282_v12  ;;  %1281 = vperm.xlu1 %4681, %v1259_v27   ;;  %v1143_v54 = vld [vmem:[%s7010_s16 + $0x68] sm:$0xff]  ;;  %v1269_v56 = vld [vmem:[%s7013_s12 + $0x58] sm:$0xff]  ;;  %v1144_v57 = vld [vmem:[%s7010_s16 + $0x70] sm:$0xff] }
  0x19   :  { %v1145_v58 = vld [vmem:[%s7010_s16 + $0x78] sm:$0xff]  ;;  %v1270_v59 = vld [vmem:[%s7013_s12 + $0x60] sm:$0xff]  ;;  %v1271_v60 = vld [vmem:[%s7013_s12 + $0x68] sm:$0xff]  ;;  %4601 = vmatpush3.bf16.msra.mxu1 %v5297_v16  ;;  %s7022_s16 = sld [smem:[#allocation35_spill]] }
  0x1a   :  { %v1272_v61 = vld [vmem:[%s7013_s12 + $0x70] sm:$0xff]  ;;  %v1273_v62 = vld [vmem:[%s7013_s12 + $0x78] sm:$0xff]  ;;  %v1506_v63 = vld [vmem:[%s7017_s29] sm:$0xff]  ;;  %4602 = vmatprep.subr.bf16.mxu1 %v6969_v10 }
  0x1b   :  { %1168 = vperm.xlu0 %4680, %v1134_v30   ;;  %v1507_v0 = vld [vmem:[%s7017_s29 + $0x8] sm:$0xff]  ;;  %v1508_v1 = vld [vmem:[%s7017_s29 + $0x10] sm:$0xff]  ;;  %v1509_v2 = vld [vmem:[%s7017_s29 + $0x18] sm:$0xff] }
  0x1c   :  { %1173 = vperm.xlu1 %4681, %v1135_v33   ;;  %v1510_v3 = vld [vmem:[%s7017_s29 + $0x20] sm:$0xff]  ;;  %v1511_v5 = vld [vmem:[%s7017_s29 + $0x28] sm:$0xff]  ;;  %v1512_v6 = vld [vmem:[%s7017_s29 + $0x30] sm:$0xff] }
  0x1d   :  { %4193 = vmatmul.mubr.msk.bf16.gmra.mrb[4].mxu0 %vm125_vm0, %v5324_v24  ;;  %v1513_v7 = vld [vmem:[%s7017_s29 + $0x38] sm:$0xff]  ;;  %v1514_v9 = vld [vmem:[%s7017_s29 + $0x40] sm:$0xff]  ;;  %v1515_v13 = vld [vmem:[%s7017_s29 + $0x48] sm:$0xff] }
  0x1e   :  { %4196 = vmatprep.mubr.msk.bf16.mxu0 %vm125_vm0, %v5326_v25  ;;  %v1516_v14 = vld [vmem:[%s7017_s29 + $0x50] sm:$0xff]  ;;  %v105_v15 = vld [vmem:[%s7018_s1] sm:$0xff]  ;;  %v1517_v16 = vld [vmem:[%s7017_s29 + $0x58] sm:$0xff] }
  0x1f   :  { %4211 = vmatmul.mubr.msk.bf16.gmra.mrb[4].mxu1 %vm125_vm0, %v5324_v24  ;;  %1286 = vperm.xlu0 %4680, %v1260_v36   ;;  %v1518_v18 = vld [vmem:[%s7017_s29 + $0x60] sm:$0xff]  ;;  %v1519_v19 = vld [vmem:[%s7017_s29 + $0x68] sm:$0xff]  ;;  %v1521_v20 = vld [vmem:[%s7017_s29 + $0x78] sm:$0xff] }
  0x20   :  { %4214 = vmatprep.mubr.msk.bf16.mxu1 %vm125_vm0, %v5326_v25  ;;  %1291 = vperm.xlu1 %4681, %v1261_v37   ;;  %v1883_v21 = vld [vmem:[%s7019_s10] sm:$0xff]  ;;  %v1884_v22 = vld [vmem:[%s7019_s10 + $0x8] sm:$0xff]  ;;  %v1885_v23 = vld [vmem:[%s7019_s10 + $0x10] sm:$0xff] }
  0x21   :  { %v4682_v26 = vld [vmem:[%s7020_s14] sm:$0xff]   ;;  %v1886_v27 = vld [vmem:[%s7019_s10 + $0x18] sm:$0xff]  ;;  %v1888_v29 = vld [vmem:[%s7019_s10 + $0x28] sm:$0xff] }
  0x22   :  { %v1887_v28 = vld [vmem:[%s7019_s10 + $0x20] sm:$0xff]  ;;  %v1889_v30 = vld [vmem:[%s7019_s10 + $0x30] sm:$0xff]  ;;  %v1890_v31 = vld [vmem:[%s7019_s10 + $0x38] sm:$0xff] }
  0x23   :  { %1178 = vperm.xlu0 %4680, %v1136_v40   ;;  %v1891_v32 = vld [vmem:[%s7019_s10 + $0x40] sm:$0xff]  ;;  %v1892_v33 = vld [vmem:[%s7019_s10 + $0x48] sm:$0xff]  ;;  %v1893_v36 = vld [vmem:[%s7019_s10 + $0x50] sm:$0xff] }
  0x24   :  { %1183 = vperm.xlu1 %4681, %v1137_v41   ;;  %v1894_v37 = vld [vmem:[%s7019_s10 + $0x58] sm:$0xff]  ;;  %v1895_v38 = vld [vmem:[%s7019_s10 + $0x60] sm:$0xff]  ;;  %v1896_v39 = vld [vmem:[%s7019_s10 + $0x68] sm:$0xff] }
  0x25   :  { %4197 = vmatmul.mubr.msk.bf16.gmra.mrb[8].mxu0 %vm125_vm0, %v5360_v34  ;;  %v1897_v40 = vld [vmem:[%s7019_s10 + $0x70] sm:$0xff]  ;;  %v1898_v41 = vld [vmem:[%s7019_s10 + $0x78] sm:$0xff] }
  0x26   :  { %4200 = vmatprep.mubr.msk.bf16.mxu0 %vm125_vm0, %v5362_v35 }
  0x27   :  { %4215 = vmatmul.mubr.msk.bf16.gmra.mrb[8].mxu1 %vm125_vm0, %v5360_v34  ;;  %1296 = vperm.xlu0 %4680, %v1262_v43   ;;  %v2403_v43 = vld [vmem:[%s7021_s24] sm:$0xff] }
  0x28   :  { %4218 = vmatprep.mubr.msk.bf16.mxu1 %vm125_vm0, %v5362_v35  ;;  %1301 = vperm.xlu1 %4681, %v1263_v44   ;;  %v2404_v44 = vld [vmem:[%s7021_s24 + $0x8] sm:$0xff] }
  0x2b   :  { %1188 = vperm.xlu0 %4680, %v1138_v45   ;;  %v2405_v45 = vld [vmem:[%s7021_s24 + $0x10] sm:$0xff] }
  0x2c   :  { %1193 = vperm.xlu1 %4681, %v1139_v46   ;;  %v2406_v46 = vld [vmem:[%s7021_s24 + $0x18] sm:$0xff] }
  0x2d   :  { %4201 = vmatmul.mubr.msk.bf16.gmra.mrb[12].mxu0 %vm125_vm0, %v5390_v42 }
  0x2e   :  { %4252 = vmatprep.mubr.bf16.mxu0 %v4682_v26 }
  0x2f   :  { %4219 = vmatmul.mubr.msk.bf16.gmra.mrb[12].mxu1 %vm125_vm0, %v5390_v42  ;;  %1306 = vperm.xlu0 %4680, %v1264_v47   ;;  %v2407_v47 = vld [vmem:[%s7021_s24 + $0x20] sm:$0xff] }
  0x30   :  { %1311 = vperm.xlu1 %4681, %v1265_v48   ;;  %4226 = vmatprep.mubr.msk.f32.mxu1 %vm5101_vm1, %v6971_v17  ;;  %v2408_v48 = vld [vmem:[%s7021_s24 + $0x28] sm:$0xff] }
  0x33   :  { %1198 = vperm.xlu0 %4680, %v1140_v49   ;;  %v2409_v49 = vld [vmem:[%s7021_s24 + $0x30] sm:$0xff] }
  0x34   :  { %1203 = vperm.xlu1 %4681, %v1141_v50   ;;  %v2410_v50 = vld [vmem:[%s7021_s24 + $0x38] sm:$0xff] }
  0x37   :  { %1316 = vperm.xlu0 %4680, %v1266_v51   ;;  %4227 = vmatmul.mubr.msk.f32.vlgmr.msra.gmra.mrb[16].mxu1 %vm125_vm0, %v105_v15  ;;  %v2411_v51 = vld [vmem:[%s7021_s24 + $0x40] sm:$0xff] }
  0x38   :  { %1321 = vperm.xlu1 %4681, %v1267_v52   ;;  %4604 = vmatpush3.bf16.msra.mxu1 %v5257_v4  ;;  %v1520_v4 = vld [vmem:[%s7017_s29 + $0x70] sm:$0xff]  ;;  %v2412_v52 = vld [vmem:[%s7021_s24 + $0x48] sm:$0xff] }
  0x39   :  { %4233 = vmatprep.mubr.msk.f32.mxu1 %vm5101_vm1, %v6971_v17 }
  0x3b   :  { %1208 = vperm.xlu0 %4680, %v1142_v53   ;;  %4234 = vmatmul.mubr.msk.f32.vlgmr.msra.gmra.mrb[18].mxu1 %vm125_vm0, %v105_v15  ;;  %v2413_v53 = vld [vmem:[%s7021_s24 + $0x50] sm:$0xff]  ;;  %v3286_v15 = vld [vmem:[%s7022_s16 + $0x68] sm:$0xff] }
  0x3c   :  { %1213 = vperm.xlu1 %4681, %v1143_v54   ;;  %v2414_v54 = vld [vmem:[%s7021_s24 + $0x58] sm:$0xff] }
  0x3f   :  { %1326 = vperm.xlu0 %4680, %v1268_v55   ;;  %v2415_v55 = vld [vmem:[%s7021_s24 + $0x60] sm:$0xff] }
  0x40   :  { %1331 = vperm.xlu1 %4681, %v1269_v56   ;;  %v2416_v56 = vld [vmem:[%s7021_s24 + $0x68] sm:$0xff] }
  0x43   :  { %1218 = vperm.xlu0 %4680, %v1144_v57   ;;  %v2417_v57 = vld [vmem:[%s7021_s24 + $0x70] sm:$0xff] }
  0x44   :  { %1223 = vperm.xlu1 %4681, %v1145_v58   ;;  %v2418_v58 = vld [vmem:[%s7021_s24 + $0x78] sm:$0xff] }
  0x47   :  { %1336 = vperm.xlu0 %4680, %v1270_v59   ;;  %v3273_v59 = vld [vmem:[%s7022_s16] sm:$0xff] }
  0x48   :  { %1341 = vperm.xlu1 %4681, %v1271_v60   ;;  %v3274_v60 = vld [vmem:[%s7022_s16 + $0x8] sm:$0xff] }
  0x4b   :  { %1346 = vperm.xlu0 %4680, %v1272_v61   ;;  %v3275_v61 = vld [vmem:[%s7022_s16 + $0x10] sm:$0xff] }
  0x4c   :  { %1351 = vperm.xlu1 %4681, %v1273_v62   ;;  %v3276_v62 = vld [vmem:[%s7022_s16 + $0x18] sm:$0xff] }
  0x4f   :  { %1524 = vperm.xlu0 %4680, %v1506_v63   ;;  %v3277_v63 = vld [vmem:[%s7022_s16 + $0x20] sm:$0xff] }
  0x50   :  { %1529 = vperm.xlu1 %4681, %v1507_v0   ;;  %v3278_v0 = vld [vmem:[%s7022_s16 + $0x28] sm:$0xff] }
  0x53   :  { %1534 = vperm.xlu0 %4680, %v1508_v1   ;;  %v3279_v1 = vld [vmem:[%s7022_s16 + $0x30] sm:$0xff] }
  0x54   :  { %1539 = vperm.xlu1 %4681, %v1509_v2   ;;  %v3280_v2 = vld [vmem:[%s7022_s16 + $0x38] sm:$0xff] }
  0x57   :  { %1544 = vperm.xlu0 %4680, %v1510_v3   ;;  %v3281_v3 = vld [vmem:[%s7022_s16 + $0x40] sm:$0xff] }
  0x58   :  { %1549 = vperm.xlu1 %4681, %v1511_v5   ;;  %v3282_v5 = vld [vmem:[%s7022_s16 + $0x48] sm:$0xff] }
  0x5b   :  { %1554 = vperm.xlu0 %4680, %v1512_v6   ;;  %v3283_v6 = vld [vmem:[%s7022_s16 + $0x50] sm:$0xff] }
  0x5c   :  { %1559 = vperm.xlu1 %4681, %v1513_v7  }
  0x5f   :  { %1564 = vperm.xlu0 %4680, %v1514_v9  }
  0x60   :  { %1569 = vperm.xlu1 %4681, %v1515_v13   ;;  %v3284_v13 = vld [vmem:[%s7022_s16 + $0x58] sm:$0xff] }
  0x63   :  { %1574 = vperm.xlu0 %4680, %v1516_v14   ;;  %v3285_v14 = vld [vmem:[%s7022_s16 + $0x60] sm:$0xff] }
  0x64   :  { %1579 = vperm.xlu1 %4681, %v1517_v16   ;;  %v3287_v16 = vld [vmem:[%s7022_s16 + $0x70] sm:$0xff] }
  0x67   :  { %1584 = vperm.xlu0 %4680, %v1518_v18  }
  0x68   :  { %1589 = vperm.xlu1 %4681, %v1519_v19  }
  0x6b   :  { %1594 = vperm.xlu0 %4680, %v1520_v4   ;;  %v3288_v4 = vld [vmem:[%s7022_s16 + $0x78] sm:$0xff] }
  0x6c   :  { %1599 = vperm.xlu1 %4681, %v1521_v20   ;;  %v2765_v20 = vld [vmem:[%s6940_s21] sm:$0xff] }
  0x6f   :  { %1901 = vperm.xlu0 %4680, %v1883_v21  }
  0x70   :  { %1906 = vperm.xlu1 %4681, %v1884_v22  }
  0x73   :  { %1911 = vperm.xlu0 %4680, %v1885_v23  }
  0x74   :  { %1916 = vperm.xlu1 %4681, %v1886_v27   ;;  %v3521_v27 = vld [vmem:[%s6941_s26] sm:$0xff] }
  0x77   :  { %1921 = vperm.xlu0 %4680, %v1887_v28   ;;  %v3522_v28 = vld [vmem:[%s6941_s26 + $0x8] sm:$0xff] }
  0x78   :  { %1926 = vperm.xlu1 %4681, %v1888_v29  }
  0x7b   :  { %1931 = vperm.xlu0 %4680, %v1889_v30  }
  0x7c   :  { %1936 = vperm.xlu1 %4681, %v1890_v31  }
  0x7f   :  { %1941 = vperm.xlu0 %4680, %v1891_v32  }
  0x80   :  { %1946 = vperm.xlu1 %4681, %v1892_v33  }
  0x83   :  { %1951 = vperm.xlu0 %4680, %v1893_v36  }
  0x84   :  { %1956 = vperm.xlu1 %4681, %v1894_v37   ;;  %v3523_v37 = vld [vmem:[%s6941_s26 + $0x10] sm:$0xff] }
  0x87   :  { %1961 = vperm.xlu0 %4680, %v1895_v38   ;;  %v3524_v38 = vld [vmem:[%s6941_s26 + $0x18] sm:$0xff] }
  0x88   :  { %1966 = vperm.xlu1 %4681, %v1896_v39  }
  0x8b   :  { %1971 = vperm.xlu0 %4680, %v1897_v40  }
  0x8c   :  { %1976 = vperm.xlu1 %4681, %v1898_v41  }
  0x8e   :  { %v5653_v7 = vpop.permute.xlu0 %1148  ;;  %v5655_v9 = vpop.permute.xlu1 %1158 }
  0x8f   :  { %2421 = vperm.xlu0 %4680, %v2403_v43  }
  0x90   :  { %2426 = vperm.xlu1 %4681, %v2404_v44   ;;  %v3525_v44 = vld [vmem:[%s6941_s26 + $0x20] sm:$0xff] }
  0x92   :  { %v5669_v18 = vpop.permute.xlu0 %1153 }
  0x93   :  { %2431 = vperm.xlu0 %4680, %v2405_v45   ;;  %v5671_v19 = vpop.permute.xlu1 %1163  ;;  %v3526_v45 = vld [vmem:[%s6941_s26 + $0x28] sm:$0xff] }
  0x94   :  { %2436 = vperm.xlu1 %4681, %v2406_v46  }
  0x96   :  { %v5679_v22 = vpop.permute.xlu0 %1276 }
  0x97   :  { %2441 = vperm.xlu0 %4680, %v2407_v47   ;;  %v5681_v26 = vpop.permute.xlu1 %1281 }
  0x98   :  { %2446 = vperm.xlu1 %4681, %v2408_v48  }
  0x9a   :  { %v5689_v36 = vpop.permute.xlu0 %1168 }
  0x9b   :  { %2451 = vperm.xlu0 %4680, %v2409_v49   ;;  %v5697_v40 = vpop.permute.xlu1 %1173 }
  0x9c   :  { %2456 = vperm.xlu1 %4681, %v2410_v50  }
  0x9f   :  { %2461 = vperm.xlu0 %4680, %v2411_v51  }
  0xa0   :  { %2466 = vperm.xlu1 %4681, %v2412_v52  }
  0xa3   :  { %2471 = vperm.xlu0 %4680, %v2413_v53  }
  0xa4   :  { %2476 = vperm.xlu1 %4681, %v2414_v54  }
  0xa7   :  { %2481 = vperm.xlu0 %4680, %v2415_v55   ;;  %v5709_v55 = vpop.permute.xlu0 %1286 }
  0xa8   :  { %2486 = vperm.xlu1 %4681, %v2416_v56   ;;  %v3527_v56 = vld [vmem:[%s6941_s26 + $0x30] sm:$0xff] }
  0xab   :  { %2491 = vperm.xlu0 %4680, %v2417_v57   ;;  %v3528_v57 = vld [vmem:[%s6941_s26 + $0x38] sm:$0xff] }
  0xac   :  { %2496 = vperm.xlu1 %4681, %v2418_v58  }
  0xaf   :  { %3291 = vperm.xlu0 %4680, %v3273_v59   ;;  %v5717_v59 = vpop.permute.xlu1 %1291 }
  0xb0   :  { %3296 = vperm.xlu1 %4681, %v3274_v60  }
  0xb3   :  { %3301 = vperm.xlu0 %4680, %v3275_v61  }
  0xb4   :  { %3306 = vperm.xlu1 %4681, %v3276_v62   ;;  %v3529_v62 = vld [vmem:[%s6941_s26 + $0x40] sm:$0xff] }
  0xb7   :  { %3311 = vperm.xlu0 %4680, %v3277_v63  }
  0xb8   :  { %3316 = vperm.xlu1 %4681, %v3278_v0  }
  0xbb   :  { %3321 = vperm.xlu0 %4680, %v3279_v1  }
  0xbc   :  { %3326 = vperm.xlu1 %4681, %v3280_v2   ;;  %v3530_v2 = vld [vmem:[%s6941_s26 + $0x48] sm:$0xff] }
  0xbf   :  { %3331 = vperm.xlu0 %4680, %v3281_v3  }
  0xc0   :  { %3336 = vperm.xlu1 %4681, %v3282_v5  }
  0xc3   :  { %3341 = vperm.xlu0 %4680, %v3283_v6  }
  0xc4   :  { %3346 = vperm.xlu1 %4681, %v3284_v13  }
  0xc7   :  { %3351 = vperm.xlu0 %4680, %v3285_v14  }
  0xc8   :  { %3356 = vperm.xlu1 %4681, %v3286_v15   ;;  %v5727_v15 = vpop.permute.xlu0 %1178 }
  0xcb   :  { %3361 = vperm.xlu0 %4680, %v3287_v16  }
  0xcc   :  { %3366 = vperm.xlu1 %4681, %v3288_v4   ;;  %v3531_v4 = vld [vmem:[%s6941_s26 + $0x50] sm:$0xff] }
  0xcf   :  { %2768 = vperm.xlu0 %4680, %v2765_v20   ;;  %v3532_v20 = vld [vmem:[%s6941_s26 + $0x58] sm:$0xff] }
  0xd0   :  { %3539 = vperm.xlu1 %4681, %v3521_v27  }
  0xd3   :  { %3544 = vperm.xlu0 %4680, %v3522_v28  }
  0xd4   :  { %3549 = vperm.xlu1 %4681, %v3523_v37  }
  0xd7   :  { %3554 = vperm.xlu0 %4680, %v3524_v38  }
  0xd8   :  { %3559 = vperm.xlu1 %4681, %v3525_v44  }
  0xdb   :  { %3564 = vperm.xlu0 %4680, %v3526_v45  }
  0xdc   :  { %3569 = vperm.xlu1 %4681, %v3527_v56  }
  0xdf   :  { %3574 = vperm.xlu0 %4680, %v3528_v57   ;;  %v4683_v57 = vld [vmem:[%s7020_s14 + $0x8] sm:$0xff]  }
  0xe0   :  { %3579 = vperm.xlu1 %4681, %v3529_v62   ;;  %v4686_v62 = vld [vmem:[%s7020_s14 + $0x20] sm:$0xff]  }
  0xe3   :  { %3584 = vperm.xlu0 %4680, %v3530_v2   ;;  %v946_v2 = vld [vmem:[%s6943_s3 + $0x8] sm:$0xff] }
  0xe4   :  { %3589 = vperm.xlu1 %4681, %v3531_v4   ;;  %v949_v4 = vld [vmem:[%s6943_s3 + $0x20] sm:$0xff] }
  0xe7   :  { %3594 = vperm.xlu0 %4680, %v3532_v20   ;;  %v950_v20 = vld [vmem:[%s6943_s3 + $0x28] sm:$0xff] }
  0xe8   :  { %v4190_v33 = vpop.f32.mrb[0].mxu0 }
  0xe9   :  { %v184_v39 = vpop.f32.mrb[1].mxu0 }
  0xea   :  { %v4208_v21 = vpop.f32.mrb[0].mxu1  ;;  %v4191_v43 = vpop.f32.mrb[2].mxu0 }
  0xeb   :  { %v282_v23 = vpop.f32.mrb[1].mxu1  ;;  %v5705_v47 = vpack.c.bf16 %v4191_v43, %v4190_v33  ;;  %v187_v48 = vpop.f32.mrb[3].mxu0  ;;  %v3534_v33 = vld [vmem:[%s6941_s26 + $0x68] sm:$0xff] }
  0xec   :  { %v4209_v29 = vpop.f32.mrb[2].mxu1  ;;  %v5707_v50 = vpack.c.bf16 %v187_v48, %v184_v39  ;;  %v5743_v39 = vpop.permute.xlu0 %1296  ;;  %3604 = vperm.xlu0 %4680, %v3534_v33   ;;  %v3536_v48 = vld [vmem:[%s6941_s26 + $0x78] sm:$0xff]  ;;  %v954_v33 = vld [vmem:[%s6943_s3 + $0x48] sm:$0xff] }
  0xed   :  { %v632_v30 = vpack.c.bf16 %v4209_v29, %v4208_v21  ;;  %v285_v31 = vpop.f32.mrb[3].mxu1  ;;  %v3533_v29 = vld [vmem:[%s6941_s26 + $0x60] sm:$0xff] }
  0xee   :  { %v631_v32 = vpack.c.bf16 %v285_v31, %v282_v23  ;;  %v5735_v23 = vpop.permute.xlu1 %1183  ;;  %3599 = vperm.xlu1 %4681, %v3533_v29   ;;  %v4693_v29 = vld [vmem:[%s7023_s19 + $0x18] sm:$0xff]  }
  0xf0   :  { %4236 = vmatprep.subr.bf16.mxu0 %v631_v32  ;;  %v4194_v54 = vpop.f32.mrb[4].mxu0 }
  0xf1   :  { %4237 = vmatpush3.bf16.msra.mxu0 %v631_v32  ;;  %v200_v58 = vpop.f32.mrb[5].mxu0 }
  0xf2   :  { %v4212_v41 = vpop.f32.mrb[4].mxu1  ;;  %4238 = vmatprep.subr.bf16.mxu0 %v632_v30  ;;  %v4195_v61 = vpop.f32.mrb[6].mxu0 }
  0xf3   :  { %v298_v46 = vpop.f32.mrb[5].mxu1  ;;  %v5722_v0 = vpack.c.bf16 %v4195_v61, %v4194_v54  ;;  %v203_v1 = vpop.f32.mrb[7].mxu0  ;;  %v4685_v61 = vld [vmem:[%s7020_s14 + $0x18] sm:$0xff]  }
  0xf4   :  { %v4213_v49 = vpop.f32.mrb[6].mxu1  ;;  %v609_v5 = vpack.c.bf16 %v203_v1, %v200_v58  ;;  %v4690_v1 = vld [vmem:[%s7023_s19] sm:$0xff]  }
  0xf5   :  { %v634_v51 = vpack.c.bf16 %v4213_v49, %v4212_v41  ;;  %v301_v52 = vpop.f32.mrb[7].mxu1  ;;  %4239 = vmatpush3.bf16.msra.mxu0 %v632_v30 }
  0xf6   :  { %v633_v53 = vpack.c.bf16 %v301_v52, %v298_v46  ;;  %v3535_v46 = vld [vmem:[%s6941_s26 + $0x70] sm:$0xff] }
  0xf8   :  { %4240 = vmatprep.subr.bf16.mxu0 %v633_v53  ;;  %v4198_v16 = vpop.f32.mrb[8].mxu0 }
  0xf9   :  { %4241 = vmatpush3.bf16.msra.mxu0 %v633_v53  ;;  %v216_v21 = vpop.f32.mrb[9].mxu0  ;;  %v5753_v53 = vpop.permute.xlu0 %1188  ;;  %3614 = vperm.xlu0 %4680, %v3536_v48   ;;  %v958_v48 = vld [vmem:[%s6943_s3 + $0x68] sm:$0xff] }
  0xfa   :  { %v4216_v60 = vpop.f32.mrb[8].mxu1  ;;  %4242 = vmatprep.subr.bf16.mxu0 %v634_v51  ;;  %v4199_v28 = vpop.f32.mrb[10].mxu0 }
  0xfb   :  { %v314_v63 = vpop.f32.mrb[9].mxu1  ;;  %v612_v31 = vpack.c.bf16 %v4199_v28, %v4198_v16  ;;  %v219_v32 = vpop.f32.mrb[11].mxu0  ;;  %v952_v28 = vld [vmem:[%s6943_s3 + $0x38] sm:$0xff] }
  0xfc   :  { %v4217_v3 = vpop.f32.mrb[10].mxu1  ;;  %v611_v38 = vpack.c.bf16 %v219_v32, %v216_v21  ;;  %v963_v21 = vpack.c.bf16 %v950_v20, %v949_v4  ;;  %v953_v32 = vld [vmem:[%s6943_s3 + $0x40] sm:$0xff] }
  0xfd   :  { %v636_v6 = vpack.c.bf16 %v4217_v3, %v4216_v60  ;;  %v317_v13 = vpop.f32.mrb[11].mxu1  ;;  %4243 = vmatpush3.bf16.msra.mxu0 %v634_v51  ;;  %v5751_v51 = vpop.permute.xlu1 %1301  ;;  %3609 = vperm.xlu1 %4681, %v3535_v46   ;;  %v4684_v60 = vld [vmem:[%s7020_s14 + $0x10] sm:$0xff]   ;;  %v957_v46 = vld [vmem:[%s6943_s3 + $0x60] sm:$0xff] }
  0xfe   :  { %v635_v14 = vpack.c.bf16 %v317_v13, %v314_v63  ;;  %v4689_v63 = vld [vmem:[%s7020_s14 + $0x38] sm:$0xff]   ;;  %v4691_v13 = vld [vmem:[%s7023_s19 + $0x8] sm:$0xff]  }
 0x100   :  { %4244 = vmatprep.subr.bf16.mxu0 %v635_v14  ;;  %v4202_v45 = vpop.f32.mrb[12].mxu0 }
 0x101   :  { %4245 = vmatpush3.bf16.msra.mxu0 %v635_v14  ;;  %v232_v49 = vpop.f32.mrb[13].mxu0  ;;  %v4692_v14 = vld [vmem:[%s7023_s19 + $0x10] sm:$0xff]  }
 0x102   :  { %v4220_v27 = vpop.f32.mrb[12].mxu1  ;;  %4246 = vmatprep.subr.bf16.mxu0 %v636_v6  ;;  %v4203_v52 = vpop.f32.mrb[14].mxu0 }
 0x103   :  { %v330_v30 = vpop.f32.mrb[13].mxu1  ;;  %v614_v54 = vpack.c.bf16 %v4203_v52, %v4202_v45  ;;  %v235_v56 = vpop.f32.mrb[15].mxu0  ;;  %v959_v52 = vld [vmem:[%s6943_s3 + $0x70] sm:$0xff] }
 0x104   :  { %v4221_v37 = vpop.f32.mrb[14].mxu1  ;;  %v613_v58 = vpack.c.bf16 %v235_v56, %v232_v49  ;;  %v967_v49 = vpack.c.bf16 %v958_v48, %v957_v46  ;;  %v4697_v56 = vld [vmem:[%s7023_s19 + $0x38] sm:$0xff]  }
 0x105   :  { %v638_v41 = vpack.c.bf16 %v4221_v37, %v4220_v27  ;;  %v333_v43 = vpop.f32.mrb[15].mxu1  ;;  %4247 = vmatpush3.bf16.msra.mxu0 %v636_v6  ;;  %v948_v6 = vld [vmem:[%s6943_s3 + $0x18] sm:$0xff]  ;;  %v951_v27 = vld [vmem:[%s6943_s3 + $0x30] sm:$0xff]  ;;  %v965_v37 = vpack.c.bf16 %v954_v33, %v953_v32 }
 0x106   :  { %v637_v44 = vpack.c.bf16 %v333_v43, %v330_v30  ;;  %v4694_v30 = vld [vmem:[%s7023_s19 + $0x20] sm:$0xff]   ;;  %v4695_v43 = vld [vmem:[%s7023_s19 + $0x28] sm:$0xff]   ;;  %v4704_v32 = vld [vmem:[%s7024_s8 + $0x30] sm:$0xff]  }
 0x107   :  { %v4705_v48 = vld [vmem:[%s7024_s8 + $0x38] sm:$0xff]  }
 0x108   :  { %4248 = vmatprep.subr.bf16.mxu0 %v637_v44 }
 0x109   :  { %4249 = vmatpush3.bf16.msra.mxu0 %v637_v44  ;;  %v4696_v44 = vld [vmem:[%s7023_s19 + $0x30] sm:$0xff]  }
 0x10a   :  { %4250 = vmatprep.subr.bf16.mxu0 %v638_v41 }
 0x10d   :  { %4251 = vmatpush3.bf16.msra.mxu0 %v638_v41  ;;  %v956_v41 = vld [vmem:[%s6943_s3 + $0x58] sm:$0xff] }
 0x10e   :  { %4268 = vmatprep.subr.bf16.mxu0 %v5707_v50 }
 0x110   :  { %4253 = vmatmul.mubr.bf16.vlgmr.msra.gmra.mrb[16].mxu0 %v4683_v57  ;;  %v4698_v57 = vld [vmem:[%s7024_s8] sm:$0xff]  }
 0x111   :  { %4269 = vmatpush3.bf16.msra.mxu0 %v5707_v50  ;;  %4256 = vmatprep.mubr.bf16.mxu0 %v4684_v60  ;;  %v4687_v50 = vld [vmem:[%s7020_s14 + $0x28] sm:$0xff]  }
 0x112   :  { %4270 = vmatprep.subr.bf16.mxu0 %v5705_v47  ;;  %v4699_v60 = vld [vmem:[%s7024_s8 + $0x8] sm:$0xff]  }
 0x115   :  { %4271 = vmatpush3.bf16.msra.mxu0 %v5705_v47  ;;  %v4688_v47 = vld [vmem:[%s7020_s14 + $0x30] sm:$0xff]  }
 0x116   :  { %4272 = vmatprep.subr.bf16.mxu0 %v609_v5 }
 0x118   :  { %4257 = vmatmul.mubr.bf16.gmra.mrb[20].mxu0 %v4685_v61  ;;  %v4700_v61 = vld [vmem:[%s7024_s8 + $0x10] sm:$0xff]  }
 0x119   :  { %4273 = vmatpush3.bf16.msra.mxu0 %v609_v5  ;;  %4260 = vmatprep.mubr.bf16.mxu0 %v4686_v62  ;;  %v947_v5 = vld [vmem:[%s6943_s3 + $0x10] sm:$0xff]  ;;  %v414_v62 = vpop.f32.mrb[16].mxu1 }
 0x11a   :  { %4274 = vmatprep.subr.bf16.mxu0 %v5722_v0  ;;  %v962_v16 = vpack.c.bf16 %v948_v6, %v947_v5 }
 0x11d   :  { %4275 = vmatpush3.bf16.msra.mxu0 %v5722_v0  ;;  %v945_v0 = vld [vmem:[%s6943_s3] sm:$0xff] }
 0x11e   :  { %4276 = vmatprep.subr.bf16.mxu0 %v611_v38  ;;  %v961_v3 = vpack.c.bf16 %v946_v2, %v945_v0 }
 0x120   :  { %4261 = vmatmul.mubr.bf16.gmra.mrb[24].mxu0 %v4687_v50  ;;  %v4228_v50 = vpop.f32.mrb[17].mxu1 }
 0x121   :  { %4277 = vmatpush3.bf16.msra.mxu0 %v611_v38  ;;  %4264 = vmatprep.mubr.bf16.mxu0 %v4688_v47  ;;  %v955_v38 = vld [vmem:[%s6943_s3 + $0x50] sm:$0xff]  ;;  %v4701_v47 = vld [vmem:[%s7024_s8 + $0x18] sm:$0xff]  }
 0x122   :  { %4278 = vmatprep.subr.bf16.mxu0 %v612_v31  ;;  %v966_v45 = vpack.c.bf16 %v956_v41, %v955_v38  ;;  %v4708_v50 = vld [vmem:[%s6942_s18 + $0x10] sm:$0xff]  }
 0x125   :  { %4279 = vmatpush3.bf16.msra.mxu0 %v612_v31  ;;  %v964_v31 = vpack.c.bf16 %v952_v28, %v951_v27 }
 0x126   :  { %4280 = vmatprep.subr.bf16.mxu0 %v613_v58 }
 0x128   :  { %4265 = vmatmul.mubr.bf16.gmra.mrb[28].mxu0 %v4689_v63  ;;  %v4702_v63 = vld [vmem:[%s7024_s8 + $0x20] sm:$0xff]  }
 0x129   :  { %4281 = vmatpush3.bf16.msra.mxu0 %v613_v58  ;;  %4284 = vmatprep.mubr.bf16.mxu0 %v4690_v1  ;;  %v484_v1 = vpop.f32.mrb[18].mxu1 }
 0x12a   :  { %4282 = vmatprep.subr.bf16.mxu0 %v614_v54  ;;  %v5874_v0 = vsub.f32 %v414_v62, %v484_v1  ;;  %v499_v2 = vrot.slane %v484_v1, 1  ;;  %v509_v5 = vrot.slane %v484_v1, 6  ;;  %v4235_v6 = vpop.f32.mrb[19].mxu1 }
 0x12c   :  { %v511_v20 = vmul.f32 %v509_v5, %v414_v62 }
 0x12d   :  { %4283 = vmatpush3.bf16.msra.mxu0 %v614_v54  ;;  %v960_v54 = vld [vmem:[%s6943_s3 + $0x78] sm:$0xff] }
 0x12e   :  { %4300 = vmatprep.subr.bf16.mxu0 %v961_v3  ;;  %v968_v58 = vpack.c.bf16 %v960_v54, %v959_v52  ;;  %v4706_v52 = vld [vmem:[%s6942_s18] sm:$0xff]  }
 0x130   :  { %4285 = vmatmul.mubr.bf16.vlgmr.msra.gmra.mrb[16].mxu0 %v4691_v13  ;;  %v512_v13 = vrot.slane %v484_v1, 2 }
 0x131   :  { %4301 = vmatpush3.bf16.msra.mxu0 %v961_v3  ;;  %4288 = vmatprep.mubr.bf16.mxu0 %v4692_v14  ;;  %v502_v3 = vrot.slane %v484_v1, 7  ;;  %v489_v14 = vmul.f32 %v5874_v0, %v5874_v0 }
 0x132   :  { %4302 = vmatprep.subr.bf16.mxu0 %v962_v16 }
 0x133   :  { %v504_v4 = vmul.f32 %v502_v3, %v414_v62  ;;  %v491_v27 = vsel %vm490_vm2, %v489_v14, 0.0  ;;  %v4710_v14 = vld [vmem:[%s6942_s18 + $0x20] sm:$0xff]  }
 0x135   :  { %4303 = vmatpush3.bf16.msra.mxu0 %v962_v16  ;;  %v501_v16 = vmul.f32 %v499_v2, %v414_v62  ;;  %v506_v28 = vrot.slane %v504_v4, 1 }
 0x136   :  { %4304 = vmatprep.subr.bf16.mxu0 %v963_v21 }
 0x137   :  { %v508_v33 = vsub.f32 %v501_v16, %v506_v28  ;;  %v4712_v28 = vld [vmem:[%s6942_s18 + $0x30] sm:$0xff]  }
 0x138   :  { %4289 = vmatmul.mubr.bf16.gmra.mrb[20].mxu0 %v4693_v29  ;;  %v4703_v29 = vld [vmem:[%s7024_s8 + $0x28] sm:$0xff]  }
 0x139   :  { %4305 = vmatpush3.bf16.msra.mxu0 %v963_v21  ;;  %4292 = vmatprep.mubr.bf16.mxu0 %v4694_v30  ;;  %v514_v21 = vmul.f32 %v512_v13, %v414_v62  ;;  %v492_v30 = vrot.slane %v491_v27, 4  ;;  %v525_v46 = vrot.slane %v508_v33, 6  ;;  %v4707_v62 = vld [vmem:[%s6942_s18 + $0x8] sm:$0xff]   ;;  %v4709_v13 = vld [vmem:[%s6942_s18 + $0x18] sm:$0xff]  }
 0x13a   :  { %4306 = vmatprep.subr.bf16.mxu0 %v964_v31 }
 0x13d   :  { %4307 = vmatpush3.bf16.msra.mxu0 %v964_v31  ;;  %v516_v31 = vrot.slane %v514_v21, 6 }
 0x13e   :  { %4308 = vmatprep.subr.bf16.mxu0 %v965_v37 }
 0x13f   :  { %v518_v38 = vsub.f32 %v511_v20, %v516_v31 }
 0x140   :  { %4293 = vmatmul.mubr.bf16.gmra.mrb[24].mxu0 %v4695_v43  ;;  %v520_v43 = vrot.slane %v508_v33, 1  ;;  %v4713_v33 = vld [vmem:[%s6942_s18 + $0x38] sm:$0xff]  }
 0x141   :  { %4309 = vmatpush3.bf16.msra.mxu0 %v965_v37  ;;  %4296 = vmatprep.mubr.bf16.mxu0 %v4696_v44  ;;  %v493_v37 = vadd.f32 %v492_v30, %v491_v27  ;;  %v523_v44 = vrot.slane %v518_v38, 1  ;;  %v4711_v27 = vld [vmem:[%s6942_s18 + $0x28] sm:$0xff]  }
 0x142   :  { %4310 = vmatprep.subr.bf16.mxu0 %v966_v45 }
 0x143   :  { %v494_v41 = vrot.slane %v493_v37, 2  ;;  %v528_v54 = vsel %vm527_vm3, %v520_v43, %v523_v44 }
 0x145   :  { %4311 = vmatpush3.bf16.msra.mxu0 %v966_v45  ;;  %v495_v45 = vadd.f32 %v494_v41, %v493_v37 }
 0x146   :  { %4312 = vmatprep.subr.bf16.mxu0 %v967_v49 }
 0x148   :  { %4297 = vmatmul.mubr.bf16.gmra.mrb[28].mxu0 %v4697_v56 }
 0x149   :  { %4313 = vmatpush3.bf16.msra.mxu0 %v967_v49  ;;  %4316 = vmatprep.mubr.bf16.mxu0 %v4698_v57  ;;  %v496_v49 = vrot.slane %v495_v45, 1  ;;  %v530_v57 = vsel %vm529_vm4, %v528_v54, %v525_v46 }
 0x14a   :  { %4314 = vmatprep.subr.bf16.mxu0 %v968_v58 }
 0x14b   :  { %v5900_v56 = vadd.f32 %v496_v49, %v495_v45 }
 0x14d   :  { %4315 = vmatpush3.bf16.msra.mxu0 %v968_v58  ;;  %v541_v58 = vmul.f32 %v530_v57, %v530_v57  ;;  %4754 = vrsqrt.f32 %v5900_v56  ;;  %vm533_vm6 = vcmp.eq.f32.partialorder %v5900_v56, inf  ;;  %v536_v3 = vand.u32 2147483648, %v5900_v56 }
 0x14e   :  { %4429 = vmatprep.subr.bf16.mxu0 %v5268_v8  ;;  %vm535_vm7 = vcmp.eq.f32.partialorder %v5900_v56, 0.0 }
 0x150   :  { %4317 = vmatmul.mubr.bf16.vlgmr.msra.gmra.mrb[16].mxu0 %v4699_v60  ;;  %v543_v60 = vsel %vm542_vm5, %v541_v58, 0.0 }
 0x151   :  { %4430 = vmatpush3.bf16.msra.mxu0 %v5268_v8  ;;  %4320 = vmatprep.mubr.bf16.mxu0 %v4700_v61  ;;  %v544_v61 = vrot.slane %v543_v60, 4 }
 0x152   :  { %4431 = vmatprep.subr.bf16.mxu0 %v5277_v11 }
 0x155   :  { %4432 = vmatpush3.bf16.msra.mxu0 %v5277_v11 }
 0x156   :  { %4433 = vmatprep.subr.bf16.mxu0 %v5282_v12 }
 0x157   :  { %v4755_v2 = vpop.eup %4754 }
 0x158   :  { %4321 = vmatmul.mubr.bf16.gmra.mrb[20].mxu0 %v4701_v47  ;;  %v545_v47 = vadd.f32 %v544_v61, %v543_v60  ;;  %v532_v5 = vmul.f32 %v4755_v2, %v5900_v56  ;;  %v5946_v2 = vpop.permute.xlu1 %1193 }
 0x159   :  { %4434 = vmatpush3.bf16.msra.mxu0 %v5282_v12  ;;  %4324 = vmatprep.mubr.bf16.mxu0 %v4702_v63 }
 0x15a   :  { %4435 = vmatprep.subr.bf16.mxu0 %v5324_v24  ;;  %v546_v63 = vrot.slane %v545_v47, 2  ;;  %v534_v16 = vsel %vm533_vm6, %v5900_v56, %v532_v5 }
 0x15b   :  { %v537_v20 = vsel %vm535_vm7, %v536_v3, %v534_v16 }
 0x15c   :  { %v547_v1 = vadd.f32 %v546_v63, %v545_v47  ;;  %v538_v21 = vadd.f32 1.0, %v537_v20 }
 0x15d   :  { %4436 = vmatpush3.bf16.msra.mxu0 %v5324_v24 }
 0x15e   :  { %4437 = vmatprep.subr.bf16.mxu0 %v5326_v25  ;;  %v548_v6 = vrot.slane %v547_v1, 1 }
 0x160   :  { %4325 = vmatmul.mubr.bf16.gmra.mrb[24].mxu0 %v4703_v29  ;;  %v549_v4 = vadd.f32 %v548_v6, %v547_v1  ;;  %v5952_v6 = vpop.permute.xlu0 %1306 }
 0x161   :  { %4438 = vmatpush3.bf16.msra.mxu0 %v5326_v25  ;;  %4328 = vmatprep.mubr.bf16.mxu0 %v4704_v32 }
 0x162   :  { %4439 = vmatprep.subr.bf16.mxu0 %v5360_v34  ;;  %4756 = vrsqrt.f32 %v549_v4  ;;  %vm552_vm8 = vcmp.eq.f32.partialorder %v549_v4, inf  ;;  %v555_v31 = vand.u32 2147483648, %v549_v4  ;;  %vm554_vm9 = vcmp.eq.f32.partialorder %v549_v4, 0.0 }
 0x163   :  { %4758 = vrcp.f32 %v538_v21 }
 0x165   :  { %4440 = vmatpush3.bf16.msra.mxu0 %v5360_v34 }
 0x166   :  { %4441 = vmatprep.subr.bf16.mxu0 %v5362_v35 }
 0x168   :  { %4329 = vmatmul.mubr.bf16.gmra.mrb[28].mxu0 %v4705_v48 }
 0x169   :  { %4442 = vmatpush3.bf16.msra.mxu0 %v5362_v35  ;;  %4445 = vmatprep.mubr.bf16.mxu0 %v4706_v52 }
 0x16a   :  { %4443 = vmatprep.subr.bf16.mxu0 %v5390_v42 }
 0x16c   :  { %v4757_v29 = vpop.eup %4756 }
 0x16d   :  { %4444 = vmatpush3.bf16.msra.mxu0 %v5390_v42  ;;  %v551_v30 = vmul.f32 %v4757_v29, %v549_v4  ;;  %v4759_v32 = vpop.eup %4758 }
 0x16e   :  { %v5934_v37 = vmul.f32 %v4759_v32, %v5874_v0 }
 0x16f   :  { %v553_v38 = vsel %vm552_vm8, %v549_v4, %v551_v30 }
 0x170   :  { %4446 = vmatmul.mubr.bf16.vlgmr.msra.gmra.mrb[32].mxu0 %v4707_v62  ;;  %7025 = vst [vmem:[#allocation10_spill] sm:$0xff] %v5934_v37  ;;  %v556_v41 = vsel %vm554_vm9, %v555_v31, %v553_v38 }
 0x171   :  { %4449 = vmatprep.mubr.bf16.mxu0 %v4708_v50  ;;  %v557_v43 = vadd.f32 1.0, %v556_v41 }
 0x173   :  { %4760 = vrcp.f32 %v557_v43 }
 0x178   :  { %4450 = vmatmul.mubr.bf16.gmra.mrb[36].mxu0 %v4709_v13  ;;  %v5954_v13 = vpop.permute.xlu1 %1311 }
 0x179   :  { %4453 = vmatprep.mubr.bf16.mxu0 %v4710_v14  ;;  %v5956_v14 = vpop.permute.xlu0 %1198 }
 0x17c   :  { %v5958_v16 = vpop.permute.xlu1 %1203 }
 0x17d   :  { %v4761_v44 = vpop.eup %4760  ;;  %v5960_v4 = vpop.permute.xlu0 %1316 }
 0x17e   :  { %v5936_v45 = vmul.f32 %v4761_v44, %v530_v57 }
 0x180   :  { %4454 = vmatmul.mubr.bf16.gmra.mrb[40].mxu0 %v4711_v27  ;;  %7026 = vst [vmem:[#allocation11_spill] sm:$0xff] %v5936_v45  ;;  %v564_v46 = vrot.slane %v5936_v45, 7  ;;  %v574_v48 = vrot.slane %v5936_v45, 2  ;;  %v561_v49 = vrot.slane %v5936_v45, 1  ;;  %v571_v52 = vrot.slane %v5936_v45, 6  ;;  %v5962_v20 = vpop.permute.xlu1 %1321 }
 0x181   :  { %4457 = vmatprep.mubr.bf16.mxu0 %v4712_v28  ;;  %v5964_v21 = vpop.permute.xlu0 %1208 }
 0x182   :  { %v566_v54 = vmul.f32 %v564_v46, %v5934_v37  ;;  %v576_v0 = vmul.f32 %v574_v48, %v5934_v37  ;;  %v563_v58 = vmul.f32 %v561_v49, %v5934_v37  ;;  %v573_v60 = vmul.f32 %v571_v52, %v5934_v37 }
 0x183   :  { %v1226_v37 = vmul.f32 %v5653_v7, %v5900_v56 }
 0x184   :  { %v568_v61 = vrot.slane %v566_v54, 1  ;;  %v578_v62 = vrot.slane %v576_v0, 6  ;;  %v5966_v27 = vpop.permute.xlu1 %1213 }
 0x185   :  { %v5968_v28 = vpop.permute.xlu0 %1326 }
 0x186   :  { %v570_v57 = vsub.f32 %v563_v58, %v568_v61  ;;  %v580_v50 = vsub.f32 %v573_v60, %v578_v62  ;;  %v4714_v60 = vld [vmem:[%s6944_s13] sm:$0xff]  }
 0x187   :  { %4348 = vmatprep.mubr.bf16.mxu1 %v4714_v60 }
 0x188   :  { %4458 = vmatmul.mubr.bf16.gmra.mrb[44].mxu0 %v4713_v33  ;;  %v582_v47 = vrot.slane %v570_v57, 1  ;;  %v585_v63 = vrot.slane %v580_v50, 1  ;;  %v587_v1 = vrot.slane %v570_v57, 6  ;;  %v5970_v29 = vpop.permute.xlu1 %1331 }
 0x189   :  { %v5972_v30 = vpop.permute.xlu0 %1218 }
 0x18a   :  { %v589_v3 = vsel %vm527_vm3, %v582_v47, %v585_v63 }
 0x18b   :  { %v5950_v5 = vsel %vm529_vm4, %v589_v3, %v587_v1 }
 0x18c   :  { %7027 = vst [vmem:[#allocation12_spill] sm:$0xff] %v5950_v5  ;;  %v5974_v31 = vpop.permute.xlu1 %1223  ;;  %v1228_v5 = vmul.f32 %v5655_v9, %v5900_v56 }
 0x18d   :  { %v5976_v32 = vpop.permute.xlu0 %1336 }
 0x190   :  { %v5978_v33 = vpop.permute.xlu1 %1341 }
 0x191   :  { %v5980_v38 = vpop.permute.xlu0 %1346 }
 0x194   :  { %v5982_v41 = vpop.permute.xlu1 %1351 }
 0x195   :  { %v5984_v43 = vpop.permute.xlu0 %1524 }
 0x198   :  { %v5986_v44 = vpop.permute.xlu1 %1529 }
 0x199   :  { %v5988_v46 = vpop.permute.xlu0 %1534 }
 0x19c   :  { %v5990_v48 = vpop.permute.xlu1 %1539 }
 0x19d   :  { %v5992_v49 = vpop.permute.xlu0 %1544 }
 0x1a0   :  { %v5994_v52 = vpop.permute.xlu1 %1549 }
 0x1a1   :  { %v5996_v54 = vpop.permute.xlu0 %1554 }
 0x1a4   :  { %v5998_v0 = vpop.permute.xlu1 %1559 }
 0x1a5   :  { %v6000_v58 = vpop.permute.xlu0 %1564 }
 0x1a8   :  { %v6005_v61 = vpop.permute.xlu1 %1569 }
 0x1a9   :  { %v6007_v62 = vpop.permute.xlu0 %1574 }
 0x1ac   :  { %v6009_v57 = vpop.permute.xlu1 %1579 }
 0x1ad   :  { %v6011_v50 = vpop.permute.xlu0 %1584 }
 0x1b0   :  { %v6013_v47 = vpop.permute.xlu1 %1589 }
 0x1b1   :  { %v6015_v63 = vpop.permute.xlu0 %1594 }
 0x1b4   :  { %v6017_v1 = vpop.permute.xlu1 %1599 }
 0x1b5   :  { %v6019_v3 = vpop.permute.xlu0 %1901 }
 0x1b8   :  { %v6021_v10 = vpop.permute.xlu1 %1906 }
 0x1b9   :  { %7028 = vst [vmem:[#allocation13_spill] sm:$0xff] %v6021_v10  ;;  %v6023_v17 = vpop.permute.xlu0 %1911 }
 0x1bc   :  { %v6025_v42 = vpop.permute.xlu1 %1916 }
 0x1bd   :  { %7029 = vst [vmem:[#allocation14_spill] sm:$0xff] %v6025_v42  ;;  %v6027_v60 = vpop.permute.xlu0 %1921 }
 0x1be   :  { %7030 = vst [vmem:[#allocation15_spill] sm:$0xff] %v6027_v60 }
 0x1c0   :  { %v6029_v35 = vpop.permute.xlu1 %1926 }
 0x1c1   :  { %7031 = vst [vmem:[#allocation16_spill] sm:$0xff] %v6029_v35  ;;  %v6031_v34 = vpop.permute.xlu0 %1931 }
 0x1c2   :  { %7032 = vst [vmem:[#allocation17_spill] sm:$0xff] %v6031_v34 }
 0x1c4   :  { %v6033_v25 = vpop.permute.xlu1 %1936 }
 0x1c5   :  { %7033 = vst [vmem:[#allocation18_spill] sm:$0xff] %v6033_v25  ;;  %v6035_v24 = vpop.permute.xlu0 %1941  ;;  %v1229_v25 = vmul.f32 %v5671_v19, %v5900_v56 }
 0x1c6   :  { %7034 = vst [vmem:[#allocation19_spill] sm:$0xff] %v6035_v24 }
 0x1c8   :  { %v6037_v12 = vpop.permute.xlu1 %1946 }
 0x1c9   :  { %7035 = vst [vmem:[#allocation20_spill] sm:$0xff] %v6037_v12  ;;  %v6039_v11 = vpop.permute.xlu0 %1951 }
 0x1ca   :  { %7036 = vst [vmem:[#allocation21_spill] sm:$0xff] %v6039_v11  ;;  %v1227_v11 = vmul.f32 %v5669_v18, %v5900_v56 }
 0x1cc   :  { %v6041_v8 = vpop.permute.xlu1 %1956 }
 0x1cd   :  { %7037 = vst [vmem:[#allocation22_spill] sm:$0xff] %v6041_v8  ;;  %v6049_v34 = vpop.permute.xlu0 %1961 }
 0x223   :  { %v4318_v45 = vpop.f32.mrb[16].mxu0 }
 0x224   :  { %v1244_v35 = vadd.f32 %v4318_v45, %v1228_v5  ;;  %v1051_v60 = vpop.f32.mrb[17].mxu0  ;;  %v6059_v45 = vpop.permute.xlu1 %1966 }
 0x225   :  { %v1242_v24 = vadd.f32 %v1226_v37, %v1051_v60  ;;  %v4319_v12 = vpop.f32.mrb[18].mxu0  ;;  %7038 = vst [vmem:[#allocation23_spill] sm:$0xff] %v6059_v45 }
 0x226   :  { %v6054_v8 = vadd.f32 %v5709_v55, %v1244_v35  ;;  %v1245_v9 = vadd.f32 %v4319_v12, %v1229_v25  ;;  %v1054_v10 = vpop.f32.mrb[19].mxu0  ;;  %v6072_v25 = vpop.permute.xlu0 %1971 }
 0x227   :  { %v6057_v42 = vadd.f32 %v5679_v22, %v1242_v24  ;;  %v1243_v7 = vadd.f32 %v1227_v11, %v1054_v10  ;;  %v1232_v24 = vmul.f32 %v5727_v15, %v5900_v56  ;;  %v1230_v10 = vmul.f32 %v5689_v36, %v5900_v56 }
 0x228   :  { %v3846_v19 = vmul.f32 -1.442695, %v6054_v8  ;;  %v6063_v5 = vadd.f32 %v5717_v59, %v1245_v9  ;;  %v1231_v15 = vmul.f32 %v5697_v40, %v5900_v56  ;;  %v6081_v9 = vpop.permute.xlu1 %1976 }
 0x229   :  { %v3844_v37 = vmul.f32 -1.442695, %v6057_v42  ;;  %v6067_v18 = vadd.f32 %v5681_v26, %v1243_v7  ;;  %v1233_v26 = vmul.f32 %v5735_v23, %v5900_v56 }
 0x22a   :  { %4762 = vpow2.f32 %v3846_v19  ;;  %v3847_v12 = vmul.f32 -1.442695, %v6063_v5 }
 0x22b   :  { %4764 = vpow2.f32 %v3844_v37  ;;  %v3845_v11 = vmul.f32 -1.442695, %v6067_v18  ;;  %v4322_v35 = vpop.f32.mrb[20].mxu0 }
 0x22c   :  { %4766 = vpow2.f32 %v3847_v12  ;;  %v1248_v22 = vadd.f32 %v4322_v35, %v1232_v24  ;;  %v1067_v55 = vpop.f32.mrb[21].mxu0 }
 0x22d   :  { %4768 = vpow2.f32 %v3845_v11  ;;  %v1246_v59 = vadd.f32 %v1230_v10, %v1067_v55  ;;  %v4323_v60 = vpop.f32.mrb[22].mxu0  ;;  %v6093_v11 = vpop.permute.xlu0 %2421 }
 0x22e   :  { %v6084_v7 = vadd.f32 %v5952_v6, %v1248_v22  ;;  %v1249_v19 = vadd.f32 %v4323_v60, %v1233_v26  ;;  %v1070_v37 = vpop.f32.mrb[23].mxu0  ;;  %v6105_v26 = vpop.permute.xlu1 %2426  ;;  %v1237_v60 = vmul.f32 %v5958_v16, %v5900_v56 }
 0x22f   :  { %v6087_v36 = vadd.f32 %v5743_v39, %v1246_v59  ;;  %v1247_v12 = vadd.f32 %v1231_v15, %v1070_v37  ;;  %v1236_v39 = vmul.f32 %v5956_v14, %v5900_v56 }
 0x230   :  { %v3850_v24 = vmul.f32 -1.442695, %v6084_v7  ;;  %v6091_v23 = vadd.f32 %v5954_v13, %v1249_v19  ;;  %v1234_v13 = vmul.f32 %v5753_v53, %v5900_v56 }
 0x231   :  { %v3848_v40 = vmul.f32 -1.442695, %v6087_v36  ;;  %v6097_v35 = vadd.f32 %v5751_v51, %v1247_v12  ;;  %v1235_v12 = vmul.f32 %v5946_v2, %v5900_v56 }
 0x232   :  { %4770 = vpow2.f32 %v3850_v24  ;;  %v3851_v6 = vmul.f32 -1.442695, %v6091_v23 }
 0x233   :  { %4772 = vpow2.f32 %v3848_v40  ;;  %v3849_v10 = vmul.f32 -1.442695, %v6097_v35  ;;  %v4326_v22 = vpop.f32.mrb[24].mxu0 }
 0x234   :  { %v4763_v55 = vpop.eup %4762  ;;  %4774 = vpow2.f32 %v3851_v6  ;;  %v1252_v59 = vadd.f32 %v4326_v22, %v1236_v39  ;;  %v1083_v51 = vpop.f32.mrb[25].mxu0 }
 0x235   :  { %v4765_v15 = vpop.eup %4764  ;;  %v1420_v19 = vadd.f32 1.0, %v4763_v55  ;;  %4776 = vpow2.f32 %v3849_v10  ;;  %v1250_v14 = vadd.f32 %v1234_v13, %v1083_v51  ;;  %v4327_v37 = vpop.f32.mrb[26].mxu0 }
 0x236   :  { %v4767_v24 = vpop.eup %4766  ;;  %v1418_v40 = vadd.f32 1.0, %v4765_v15  ;;  %v6112_v53 = vadd.f32 %v5968_v28, %v1252_v59  ;;  %v1253_v45 = vadd.f32 %v4327_v37, %v1237_v60  ;;  %v1086_v6 = vpop.f32.mrb[27].mxu0  ;;  %v1240_v15 = vmul.f32 %v5972_v30, %v5900_v56 }
 0x237   :  { %v4769_v39 = vpop.eup %4768  ;;  %v6114_v22 = vpop.permute.xlu0 %2431  ;;  %4778 = vrcp.f32 %v1420_v19  ;;  %v1421_v16 = vadd.f32 1.0, %v4767_v24  ;;  %v6117_v55 = vadd.f32 %v5960_v4, %v1250_v14  ;;  %v1251_v10 = vadd.f32 %v1235_v12, %v1086_v6 }
 0x238   :  { %4780 = vrcp.f32 %v1418_v40  ;;  %v1419_v13 = vadd.f32 1.0, %v4769_v39  ;;  %v3854_v2 = vmul.f32 -1.442695, %v6112_v53  ;;  %v6121_v51 = vadd.f32 %v5970_v29, %v1253_v45  ;;  %v6127_v60 = vpop.permute.xlu1 %2436 }
 0x239   :  { %4782 = vrcp.f32 %v1421_v16  ;;  %v3852_v28 = vmul.f32 -1.442695, %v6117_v55  ;;  %v6125_v59 = vadd.f32 %v5962_v20, %v1251_v10  ;;  %v1238_v29 = vmul.f32 %v5964_v21, %v5900_v56 }
 0x23a   :  { %4784 = vrcp.f32 %v1419_v13  ;;  %v3855_v4 = vmul.f32 -1.442695, %v6121_v51  ;;  %v1241_v12 = vmul.f32 %v5974_v31, %v5900_v56  ;;  %v1239_v16 = vmul.f32 %v5966_v27, %v5900_v56 }
 0x23b   :  { %4786 = vpow2.f32 %v3854_v2  ;;  %v3853_v19 = vmul.f32 -1.442695, %v6125_v59  ;;  %v4330_v14 = vpop.f32.mrb[28].mxu0  ;;  %v6137_v40 = vpop.permute.xlu0 %2441 }
 0x23c   :  { %v4771_v45 = vpop.eup %4770  ;;  %4788 = vpow2.f32 %v3852_v28  ;;  %v1256_v37 = vadd.f32 %v4330_v14, %v1240_v15  ;;  %v1099_v20 = vpop.f32.mrb[29].mxu0 }
 0x23d   :  { %v4773_v24 = vpop.eup %4772  ;;  %v1424_v6 = vadd.f32 1.0, %v4771_v45  ;;  %4790 = vpow2.f32 %v3855_v4  ;;  %v1254_v30 = vadd.f32 %v1238_v29, %v1099_v20  ;;  %v4331_v39 = vpop.f32.mrb[30].mxu0 }
 0x23e   :  { %v4775_v10 = vpop.eup %4774  ;;  %v1422_v13 = vadd.f32 1.0, %v4773_v24  ;;  %4792 = vpow2.f32 %v3853_v19  ;;  %v6142_v21 = vadd.f32 %v5980_v38, %v1256_v37  ;;  %v1257_v2 = vadd.f32 %v4331_v39, %v1241_v12  ;;  %v1102_v28 = vpop.f32.mrb[31].mxu0 }
 0x23f   :  { %v4777_v15 = vpop.eup %4776  ;;  %4794 = vrcp.f32 %v1424_v6  ;;  %v1425_v31 = vadd.f32 1.0, %v4775_v10  ;;  %v6145_v14 = vadd.f32 %v5976_v32, %v1254_v30  ;;  %v1255_v4 = vadd.f32 %v1239_v16, %v1102_v28  ;;  %v6147_v29 = vpop.permute.xlu1 %2446 }
 0x240   :  { %4796 = vrcp.f32 %v1422_v13  ;;  %v1423_v45 = vadd.f32 1.0, %v4777_v15  ;;  %v3858_v56 = vmul.f32 -1.442695, %v6142_v21  ;;  %v6151_v27 = vadd.f32 %v5982_v41, %v1257_v2  ;;  %v2452_v24 = vpop.permute.xlu0 %2451 }
 0x241   :  { %v4779_v38 = vpop.eup %4778  ;;  %4798 = vrcp.f32 %v1425_v31  ;;  %v3856_v19 = vmul.f32 -1.442695, %v6145_v14  ;;  %v6155_v37 = vadd.f32 %v5978_v33, %v1255_v4 }
 0x242   :  { %v4781_v20 = vpop.eup %4780  ;;  %4800 = vrcp.f32 %v1423_v45  ;;  %v3859_v32 = vmul.f32 -1.442695, %v6151_v27  ;;  %v1468_v45 = vmul.f32 %v4779_v38, %v6054_v8 }
 0x243   :  { %v4783_v12 = vpop.eup %4782  ;;  %4802 = vpow2.f32 %v3858_v56  ;;  %v3857_v6 = vmul.f32 -1.442695, %v6155_v37  ;;  %v4447_v30 = vpop.f32.mrb[32].mxu0  ;;  %v1466_v13 = vmul.f32 %v4781_v20, %v6057_v42 }
 0x244   :  { %v4785_v39 = vpop.eup %4784  ;;  %v1469_v41 = vmul.f32 %v4783_v12, %v6063_v5  ;;  %4804 = vpow2.f32 %v3856_v19  ;;  %v6161_v16 = vadd.f32 %v4447_v30, %v6114_v22  ;;  %v2581_v10 = vpop.f32.mrb[33].mxu0 }
 0x245   :  { %v4787_v33 = vpop.eup %4786  ;;  %v1467_v2 = vmul.f32 %v4785_v39, %v6067_v18  ;;  %4806 = vpow2.f32 %v3859_v32  ;;  %v6166_v28 = vadd.f32 %v2581_v10, %v6093_v11  ;;  %v4448_v15 = vpop.f32.mrb[34].mxu0 }
 0x246   :  { %v4789_v31 = vpop.eup %4788  ;;  %v2457_v4 = vpop.permute.xlu1 %2456  ;;  %v1428_v5 = vadd.f32 1.0, %v4787_v33  ;;  %4808 = vpow2.f32 %v3857_v6  ;;  %v6170_v22 = vadd.f32 %v4448_v15, %v6127_v60  ;;  %v3921_v32 = vmul.f32 -1.442695, %v6161_v16 }
 0x247   :  { %v2584_v56 = vpop.f32.mrb[35].mxu0  ;;  %v4791_v19 = vpop.eup %4790  ;;  %v1426_v12 = vadd.f32 1.0, %v4789_v31  ;;  %v1498_v18 = vpack.c.bf16 %v1467_v2, %v1466_v13  ;;  %v1499_v30 = vpack.c.bf16 %v1469_v41, %v1468_v45  ;;  %v3919_v60 = vmul.f32 -1.442695, %v6166_v28 }
 0x248   :  { %v6173_v42 = vadd.f32 %v2584_v56, %v6105_v26  ;;  %v4793_v20 = vpop.eup %4792  ;;  %4810 = vrcp.f32 %v1428_v5  ;;  %v1429_v11 = vadd.f32 1.0, %v4791_v19  ;;  %v6176_v8 = vpop.permute.xlu0 %2461  ;;  %v3922_v26 = vmul.f32 -1.442695, %v6170_v22 }
 0x249   :  { %v4795_v39 = vpop.eup %4794  ;;  %4812 = vrcp.f32 %v1426_v12  ;;  %v1427_v38 = vadd.f32 1.0, %v4793_v20  ;;  %4332 = vmatprep.subr.bf16.mxu1 %v1498_v18 }
 0x24a   :  { %v4797_v6 = vpop.eup %4796  ;;  %4814 = vrcp.f32 %v1429_v11  ;;  %4333 = vmatpush3.bf16.msra.mxu1 %v1498_v18  ;;  %v3920_v33 = vmul.f32 -1.442695, %v6173_v42  ;;  %v6181_v2 = vpop.permute.xlu1 %2466 }
 0x24b   :  { %v4799_v10 = vpop.eup %4798  ;;  %4816 = vrcp.f32 %v1427_v38  ;;  %4334 = vmatprep.subr.bf16.mxu1 %v1499_v30  ;;  %v4451_v13 = vpop.f32.mrb[36].mxu0  ;;  %v1470_v20 = vmul.f32 %v4797_v6, %v6087_v36 }
 0x24c   :  { %v4801_v41 = vpop.eup %4800  ;;  %4818 = vpow2.f32 %v3921_v32  ;;  %v6183_v15 = vadd.f32 %v4451_v13, %v2452_v24  ;;  %v2597_v31 = vpop.f32.mrb[37].mxu0  ;;  %v1473_v5 = vmul.f32 %v4799_v10, %v6091_v23  ;;  %v1472_v23 = vmul.f32 %v4795_v39, %v6084_v7 }
 0x24d   :  { %v4803_v45 = vpop.eup %4802  ;;  %v1471_v56 = vmul.f32 %v4801_v41, %v6097_v35  ;;  %4820 = vpow2.f32 %v3919_v60  ;;  %v6188_v19 = vadd.f32 %v2597_v31, %v6137_v40  ;;  %v4452_v12 = vpop.f32.mrb[38].mxu0 }
 0x24e   :  { %v4805_v18 = vpop.eup %4804  ;;  %v1432_v11 = vadd.f32 1.0, %v4803_v45  ;;  %4822 = vpow2.f32 %v3922_v26  ;;  %v6191_v38 = vadd.f32 %v4452_v12, %v2457_v4  ;;  %4335 = vmatpush3.bf16.msra.mxu1 %v1499_v30  ;;  %v2600_v24 = vpop.f32.mrb[39].mxu0  ;;  %v3925_v36 = vmul.f32 -1.442695, %v6183_v15 }
 0x24f   :  { %v4807_v32 = vpop.eup %4806  ;;  %v2472_v13 = vpop.permute.xlu0 %2471  ;;  %v1430_v10 = vadd.f32 1.0, %v4805_v18  ;;  %4824 = vpow2.f32 %v3920_v33  ;;  %v6195_v35 = vadd.f32 %v2600_v24, %v6147_v29  ;;  %v1500_v6 = vpack.c.bf16 %v1471_v56, %v1470_v20 }
 0x250   :  { %v4809_v40 = vpop.eup %4808  ;;  %4826 = vrcp.f32 %v1432_v11  ;;  %v1433_v60 = vadd.f32 1.0, %v4807_v32  ;;  %v3923_v30 = vmul.f32 -1.442695, %v6188_v19  ;;  %v1501_v26 = vpack.c.bf16 %v1473_v5, %v1472_v23  ;;  %v2477_v31 = vpop.permute.xlu1 %2476 }
 0x251   :  { %4828 = vrcp.f32 %v1430_v10  ;;  %v1431_v4 = vadd.f32 1.0, %v4809_v40  ;;  %v3926_v7 = vmul.f32 -1.442695, %v6191_v38  ;;  %4336 = vmatprep.subr.bf16.mxu1 %v1500_v6  ;;  %v3924_v29 = vmul.f32 -1.442695, %v6195_v35 }
 0x252   :  { %v4811_v41 = vpop.eup %4810  ;;  %4830 = vrcp.f32 %v1433_v60  ;;  %4337 = vmatpush3.bf16.msra.mxu1 %v1500_v6 }
 0x253   :  { %v4813_v39 = vpop.eup %4812  ;;  %4832 = vrcp.f32 %v1431_v4  ;;  %v4455_v33 = vpop.f32.mrb[40].mxu0  ;;  %4338 = vmatprep.subr.bf16.mxu1 %v1501_v26  ;;  %v1476_v6 = vmul.f32 %v4811_v41, %v6112_v53 }
 0x254   :  { %v4815_v45 = vpop.eup %4814  ;;  %4834 = vpow2.f32 %v3925_v36  ;;  %v6201_v56 = vadd.f32 %v4455_v33, %v2472_v13  ;;  %v2613_v12 = vpop.f32.mrb[41].mxu0  ;;  %v1474_v20 = vmul.f32 %v4813_v39, %v6117_v55 }
 0x255   :  { %v4817_v18 = vpop.eup %4816  ;;  %v2482_v5 = vpop.permute.xlu0 %2481  ;;  %v1477_v11 = vmul.f32 %v4815_v45, %v6121_v51  ;;  %4836 = vpow2.f32 %v3923_v30  ;;  %v6206_v24 = vadd.f32 %v2613_v12, %v6176_v8 }
 0x256   :  { %v4456_v32 = vpop.f32.mrb[42].mxu0  ;;  %v4819_v23 = vpop.eup %4818  ;;  %v1475_v10 = vmul.f32 %v4817_v18, %v6125_v59  ;;  %4838 = vpow2.f32 %v3926_v7  ;;  %v3929_v40 = vmul.f32 -1.442695, %v6201_v56  ;;  %4339 = vmatpush3.bf16.msra.mxu1 %v1501_v26 }
 0x257   :  { %v6210_v13 = vadd.f32 %v4456_v32, %v2477_v31  ;;  %v2616_v60 = vpop.f32.mrb[43].mxu0  ;;  %v4821_v36 = vpop.eup %4820  ;;  %v2694_v55 = vadd.f32 1.0, %v4819_v23  ;;  %4840 = vpow2.f32 %v3924_v29  ;;  %v3927_v31 = vmul.f32 -1.442695, %v6206_v24 }
 0x258   :  { %v6214_v51 = vadd.f32 %v2616_v60, %v6181_v2  ;;  %v4823_v8 = vpop.eup %4822  ;;  %v2487_v4 = vpop.permute.xlu1 %2486  ;;  %v2692_v30 = vadd.f32 1.0, %v4821_v36  ;;  %4842 = vpow2.f32 %v3929_v40  ;;  %v1502_v59 = vpack.c.bf16 %v1475_v10, %v1474_v20 }
 0x259   :  { %v4825_v7 = vpop.eup %4824  ;;  %4844 = vrcp.f32 %v2694_v55  ;;  %v2695_v39 = vadd.f32 1.0, %v4823_v8  ;;  %v1503_v33 = vpack.c.bf16 %v1477_v11, %v1476_v6  ;;  %v3930_v41 = vmul.f32 -1.442695, %v6210_v13  ;;  %v2492_v2 = vpop.permute.xlu0 %2491 }
 0x25a   :  { %v4827_v45 = vpop.eup %4826  ;;  %4846 = vrcp.f32 %v2692_v30  ;;  %v2693_v53 = vadd.f32 1.0, %v4825_v7  ;;  %4340 = vmatprep.subr.bf16.mxu1 %v1502_v59  ;;  %v3928_v29 = vmul.f32 -1.442695, %v6214_v51 }
 0x25b   :  { %v4829_v26 = vpop.eup %4828  ;;  %4848 = vrcp.f32 %v2695_v39  ;;  %4341 = vmatpush3.bf16.msra.mxu1 %v1502_v59  ;;  %v4459_v12 = vpop.f32.mrb[44].mxu0  ;;  %v1480_v7 = vmul.f32 %v4827_v45, %v6142_v21 }
 0x25c   :  { %v4831_v18 = vpop.eup %4830  ;;  %4850 = vrcp.f32 %v2693_v53  ;;  %4342 = vmatprep.subr.bf16.mxu1 %v1503_v33  ;;  %v6219_v20 = vadd.f32 %v4459_v12, %v2492_v2  ;;  %v2629_v32 = vpop.f32.mrb[45].mxu0  ;;  %v1478_v23 = vmul.f32 %v4829_v26, %v6145_v14 }
 0x25d   :  { %v4833_v11 = vpop.eup %4832  ;;  %v1481_v10 = vmul.f32 %v4831_v18, %v6151_v27  ;;  %4852 = vpow2.f32 %v3927_v31  ;;  %v4460_v40 = vpop.f32.mrb[46].mxu0  ;;  %v6225_v8 = vadd.f32 %v2629_v32, %v2482_v5 }
 0x25e   :  { %v4835_v60 = vpop.eup %4834  ;;  %v2497_v36 = vpop.permute.xlu1 %2496  ;;  %v1479_v6 = vmul.f32 %v4833_v11, %v6155_v37  ;;  %4854 = vpow2.f32 %v3930_v41  ;;  %v3933_v55 = vmul.f32 -1.442695, %v6219_v20 }
 0x25f   :  { %v2632_v30 = vpop.f32.mrb[47].mxu0  ;;  %v4837_v59 = vpop.eup %4836  ;;  %v2698_v39 = vadd.f32 1.0, %v4835_v60  ;;  %4856 = vpow2.f32 %v3928_v29  ;;  %v6228_v14 = vadd.f32 %v4460_v40, %v2497_v36  ;;  %4343 = vmatpush3.bf16.msra.mxu1 %v1503_v33  ;;  %v1505_v5 = vpack.c.bf16 %v1481_v10, %v1480_v7  ;;  %v4715_v40 = vld [vmem:[%s6944_s13 + $0x8] sm:$0xff]  }
 0x260   :  { %v4839_v27 = vpop.eup %4838  ;;  %v2696_v31 = vadd.f32 1.0, %v4837_v59  ;;  %4858 = vpow2.f32 %v3933_v55  ;;  %v6230_v53 = vadd.f32 %v2632_v30, %v2487_v4  ;;  %v1504_v37 = vpack.c.bf16 %v1479_v6, %v1478_v23 }
 0x261   :  { %v4841_v41 = vpop.eup %4840  ;;  %4860 = vrcp.f32 %v2698_v39  ;;  %v2699_v26 = vadd.f32 1.0, %v4839_v27  ;;  %v3931_v21 = vmul.f32 -1.442695, %v6225_v8  ;;  %v3934_v33 = vmul.f32 -1.442695, %v6228_v14 }
 0x262   :  { %v4843_v2 = vpop.eup %4842  ;;  %4862 = vrcp.f32 %v2696_v31  ;;  %v2697_v12 = vadd.f32 1.0, %v4841_v41  ;;  %4344 = vmatprep.subr.bf16.mxu1 %v1504_v37  ;;  %v3932_v4 = vmul.f32 -1.442695, %v6230_v53 }
 0x263   :  { %v4845_v45 = vpop.eup %4844  ;;  %4864 = vrcp.f32 %v2699_v26  ;;  %4345 = vmatpush3.bf16.msra.mxu1 %v1504_v37  ;;  %v2702_v32 = vadd.f32 1.0, %v4843_v2 }
 0x264   :  { %v4847_v29 = vpop.eup %4846  ;;  %4866 = vrcp.f32 %v2697_v12  ;;  %4346 = vmatprep.subr.bf16.mxu1 %v1505_v5  ;;  %v6236_v23 = vmul.f32 %v4845_v45, %v6161_v16  ;;  %v4716_v16 = vld [vmem:[%s6944_s13 + $0x10] sm:$0xff]   ;;  %v4717_v12 = vld [vmem:[%s6944_s13 + $0x18] sm:$0xff]  }
 0x265   :  { %v4849_v18 = vpop.eup %4848  ;;  %4868 = vpow2.f32 %v3931_v21  ;;  %v6245_v36 = vmul.f32 %v4847_v29, %v6166_v28 }
 0x266   :  { %v4851_v11 = vpop.eup %4850  ;;  %v6239_v10 = vmul.f32 %v4849_v18, %v6170_v22  ;;  %4870 = vpow2.f32 %v3934_v33  ;;  %v4718_v33 = vld [vmem:[%s6944_s13 + $0x20] sm:$0xff]  }
 0x267   :  { %v4853_v60 = vpop.eup %4852  ;;  %v6248_v6 = vmul.f32 %v4851_v11, %v6173_v42  ;;  %4347 = vmatpush3.bf16.msra.mxu1 %v1505_v5  ;;  %4872 = vpow2.f32 %v3932_v4 }
 0x268   :  { %v4855_v22 = vpop.eup %4854  ;;  %v2758_v55 = vpack.c.bf16 %v6239_v10, %v6236_v23  ;;  %v2700_v30 = vadd.f32 1.0, %v4853_v60  ;;  %4874 = vrcp.f32 %v2702_v32 }
 0x269   :  { %v4857_v59 = vpop.eup %4856  ;;  %v2757_v28 = vpack.c.bf16 %v6248_v6, %v6245_v36  ;;  %v2703_v7 = vadd.f32 1.0, %v4855_v22 }
 0x26a   :  { %v4859_v42 = vpop.eup %4858  ;;  %4876 = vrcp.f32 %v2700_v30  ;;  %v2701_v39 = vadd.f32 1.0, %v4857_v59  ;;  %4349 = vmatmul.mubr.bf16.vlgmr.msra.gmra.mrb[20].mxu1 %v4715_v40  ;;  %v4719_v59 = vld [vmem:[%s6944_s13 + $0x28] sm:$0xff]  }
 0x26b   :  { %v4861_v27 = vpop.eup %4860  ;;  %4878 = vrcp.f32 %v2703_v7  ;;  %4352 = vmatprep.mubr.bf16.mxu1 %v4716_v16  ;;  %v2706_v2 = vadd.f32 1.0, %v4859_v42 }
 0x26c   :  { %v4863_v31 = vpop.eup %4862  ;;  %4880 = vrcp.f32 %v2701_v39  ;;  %v6258_v26 = vmul.f32 %v4861_v27, %v6183_v15  ;;  %v4720_v39 = vld [vmem:[%s6944_s13 + $0x30] sm:$0xff]  }
 0x26d   :  { %v4865_v37 = vpop.eup %4864  ;;  %v6267_v21 = vmul.f32 %v4863_v31, %v6188_v19  ;;  %4882 = vrcp.f32 %v2706_v2 }
 0x26e   :  { %v4867_v41 = vpop.eup %4866  ;;  %v6261_v5 = vmul.f32 %v4865_v37, %v6191_v38 }
 0x26f   :  { %v6270_v45 = vmul.f32 %v4867_v41, %v6195_v35  ;;  %v4869_v15 = vpop.eup %4868 }
 0x270   :  { %v4871_v29 = vpop.eup %4870  ;;  %v2704_v18 = vadd.f32 1.0, %v4869_v15  ;;  %v7055_v36 = vpack.c.bf16 %v6261_v5, %v6258_v26 }
 0x271   :  { %v2759_v4 = vpack.c.bf16 %v6270_v45, %v6267_v21  ;;  %v4873_v32 = vpop.eup %4872  ;;  %v2707_v19 = vadd.f32 1.0, %v4871_v29  ;;  %v4730_v21 = vld [vmem:[%s6949_s23] sm:$0xff]   ;;  %v6629_v45 = vpop.permute.xlu0 %3291 }
 0x272   :  { %4353 = vmatmul.mubr.bf16.gmra.mrb[24].mxu1 %v4717_v12  ;;  %v4875_v11 = vpop.eup %4874  ;;  %4884 = vrcp.f32 %v2704_v18  ;;  %v2705_v35 = vadd.f32 1.0, %v4873_v32  ;;  %4519 = vmatprep.mubr.bf16.mxu0 %v4730_v21  ;;  %v4739_v21 = vld [vmem:[%s6950_s22 + $0x8] sm:$0xff]  }
 0x273   :  { %4356 = vmatprep.mubr.bf16.mxu1 %v4718_v33  ;;  %4886 = vrcp.f32 %v2707_v19  ;;  %v6280_v22 = vmul.f32 %v4875_v11, %v6201_v56 }
 0x274   :  { %v4877_v40 = vpop.eup %4876  ;;  %4888 = vrcp.f32 %v2705_v35 }
 0x275   :  { %v4879_v60 = vpop.eup %4878  ;;  %v6289_v7 = vmul.f32 %v4877_v40, %v6206_v24  ;;  %v4721_v24 = vld [vmem:[%s6944_s13 + $0x38] sm:$0xff]  }
 0x276   :  { %v4881_v16 = vpop.eup %4880  ;;  %v6283_v30 = vmul.f32 %v4879_v60, %v6210_v13 }
 0x277   :  { %v6292_v42 = vmul.f32 %v4881_v16, %v6214_v51  ;;  %v4883_v27 = vpop.eup %4882 }
 0x278   :  { %v6305_v41 = vmul.f32 %v4883_v27, %v6219_v20  ;;  %v4722_v20 = vld [vmem:[%s6945_s15] sm:$0xff]   ;;  %v7057_v23 = vpack.c.bf16 %v6283_v30, %v6280_v22 }
 0x279   :  { %v7056_v6 = vpack.c.bf16 %v6292_v42, %v6289_v7 }
 0x27a   :  { %4357 = vmatmul.mubr.bf16.gmra.mrb[28].mxu1 %v4719_v59 }
 0x27b   :  { %4360 = vmatprep.mubr.bf16.mxu1 %v4720_v39 }
 0x27c   :  { %v4885_v31 = vpop.eup %4884 }
 0x27d   :  { %v4887_v37 = vpop.eup %4886  ;;  %v6311_v12 = vmul.f32 %v4885_v31, %v6225_v8 }
 0x27e   :  { %v4889_v51 = vpop.eup %4888  ;;  %v6308_v2 = vmul.f32 %v4887_v37, %v6228_v14 }
 0x27f   :  { %v6314_v33 = vmul.f32 %v4889_v51, %v6230_v53 }
 0x281   :  { %v7058_v10 = vpack.c.bf16 %v6314_v33, %v6311_v12 }
 0x282   :  { %4361 = vmatmul.mubr.bf16.gmra.mrb[32].mxu1 %v4721_v24 }
 0x283   :  { %4380 = vmatprep.mubr.bf16.mxu1 %v4722_v20 }
 0x33d   :  { %v4350_v14 = vpop.f32.mrb[20].mxu1 }
 0x33e   :  { %v6324_v18 = vadd.f32 %v4350_v14, %v5988_v46  ;;  %v1684_v8 = vpop.f32.mrb[21].mxu1 }
 0x33f   :  { %v6327_v53 = vadd.f32 %v1684_v8, %v5984_v43  ;;  %v4351_v32 = vpop.f32.mrb[22].mxu1 }
 0x340   :  { %v3870_v19 = vmul.f32 -1.442695, %v6324_v18  ;;  %v6331_v11 = vadd.f32 %v4351_v32, %v5990_v48  ;;  %v1687_v35 = vpop.f32.mrb[23].mxu1 }
 0x341   :  { %v3868_v40 = vmul.f32 -1.442695, %v6327_v53  ;;  %v6335_v60 = vadd.f32 %v1687_v35, %v5986_v44 }
 0x342   :  { %4890 = vpow2.f32 %v3870_v19  ;;  %v3871_v46 = vmul.f32 -1.442695, %v6331_v11 }
 0x343   :  { %4892 = vpow2.f32 %v3868_v40  ;;  %v3869_v16 = vmul.f32 -1.442695, %v6335_v60 }
 0x344   :  { %4894 = vpow2.f32 %v3871_v46 }
 0x345   :  { %4896 = vpow2.f32 %v3869_v16  ;;  %v4354_v43 = vpop.f32.mrb[24].mxu1 }
 0x346   :  { %v6340_v59 = vadd.f32 %v4354_v43, %v5996_v54  ;;  %v1700_v48 = vpop.f32.mrb[25].mxu1 }
 0x347   :  { %v6343_v39 = vadd.f32 %v1700_v48, %v5992_v49  ;;  %v4355_v27 = vpop.f32.mrb[26].mxu1 }
 0x348   :  { %v3874_v44 = vmul.f32 -1.442695, %v6340_v59  ;;  %v6347_v31 = vadd.f32 %v4355_v27, %v5998_v0  ;;  %v1703_v37 = vpop.f32.mrb[27].mxu1 }
 0x349   :  { %v3872_v24 = vmul.f32 -1.442695, %v6343_v39  ;;  %v6351_v51 = vadd.f32 %v1703_v37, %v5994_v52 }
 0x34a   :  { %4898 = vpow2.f32 %v3874_v44  ;;  %v3875_v54 = vmul.f32 -1.442695, %v6347_v31 }
 0x34b   :  { %4900 = vpow2.f32 %v3872_v24  ;;  %v3873_v20 = vmul.f32 -1.442695, %v6351_v51 }
 0x34c   :  { %v4891_v49 = vpop.eup %4890  ;;  %4902 = vpow2.f32 %v3875_v54 }
 0x34d   :  { %v4893_v14 = vpop.eup %4892  ;;  %v1797_v8 = vadd.f32 1.0, %v4891_v49  ;;  %4904 = vpow2.f32 %v3873_v20  ;;  %v4358_v32 = vpop.f32.mrb[28].mxu1 }
 0x34e   :  { %v4895_v0 = vpop.eup %4894  ;;  %v1795_v19 = vadd.f32 1.0, %v4893_v14  ;;  %v6356_v35 = vadd.f32 %v4358_v32, %v6007_v62  ;;  %v1716_v40 = vpop.f32.mrb[29].mxu1 }
 0x34f   :  { %v4897_v52 = vpop.eup %4896  ;;  %4906 = vrcp.f32 %v1797_v8  ;;  %v1798_v46 = vadd.f32 1.0, %v4895_v0  ;;  %v6359_v16 = vadd.f32 %v1716_v40, %v6000_v58  ;;  %v4359_v43 = vpop.f32.mrb[30].mxu1 }
 0x350   :  { %4908 = vrcp.f32 %v1795_v19  ;;  %v1796_v48 = vadd.f32 1.0, %v4897_v52  ;;  %v3878_v27 = vmul.f32 -1.442695, %v6356_v35  ;;  %v6363_v44 = vadd.f32 %v4359_v43, %v6009_v57  ;;  %v1719_v37 = vpop.f32.mrb[31].mxu1 }
 0x351   :  { %4910 = vrcp.f32 %v1798_v46  ;;  %v3876_v62 = vmul.f32 -1.442695, %v6359_v16  ;;  %v6367_v24 = vadd.f32 %v1719_v37, %v6005_v61 }
 0x352   :  { %4912 = vrcp.f32 %v1796_v48  ;;  %v3879_v54 = vmul.f32 -1.442695, %v6363_v44 }
 0x353   :  { %4914 = vpow2.f32 %v3878_v27  ;;  %v3877_v58 = vmul.f32 -1.442695, %v6367_v24 }
 0x354   :  { %v4899_v20 = vpop.eup %4898  ;;  %4916 = vpow2.f32 %v3876_v62 }
 0x355   :  { %v4901_v49 = vpop.eup %4900  ;;  %v1801_v14 = vadd.f32 1.0, %v4899_v20  ;;  %4918 = vpow2.f32 %v3879_v54  ;;  %v4362_v57 = vpop.f32.mrb[32].mxu1 }
 0x356   :  { %v4903_v8 = vpop.eup %4902  ;;  %v1799_v32 = vadd.f32 1.0, %v4901_v49  ;;  %4920 = vpow2.f32 %v3877_v58  ;;  %v6372_v0 = vadd.f32 %v4362_v57, %v6015_v63  ;;  %v1732_v61 = vpop.f32.mrb[33].mxu1 }
 0x357   :  { %v4905_v19 = vpop.eup %4904  ;;  %4922 = vrcp.f32 %v1801_v14  ;;  %v1802_v40 = vadd.f32 1.0, %v4903_v8  ;;  %v6375_v52 = vadd.f32 %v1732_v61, %v6011_v50  ;;  %v4363_v46 = vpop.f32.mrb[34].mxu1 }
 0x358   :  { %4924 = vrcp.f32 %v1799_v32  ;;  %v1800_v43 = vadd.f32 1.0, %v4905_v19  ;;  %v3882_v48 = vmul.f32 -1.442695, %v6372_v0  ;;  %v6379_v27 = vadd.f32 %v4363_v46, %v6017_v1  ;;  %v1735_v37 = vpop.f32.mrb[35].mxu1 }
 0x359   :  { %v4907_v62 = vpop.eup %4906  ;;  %4926 = vrcp.f32 %v1802_v40  ;;  %v3880_v63 = vmul.f32 -1.442695, %v6375_v52  ;;  %v6383_v54 = vadd.f32 %v1735_v37, %v6013_v47 }
 0x35a   :  { %v4909_v58 = vpop.eup %4908  ;;  %4928 = vrcp.f32 %v1800_v43  ;;  %v3883_v50 = vmul.f32 -1.442695, %v6379_v27  ;;  %v1845_v1 = vmul.f32 %v4907_v62, %v6324_v18 }
 0x35b   :  { %v4911_v20 = vpop.eup %4910  ;;  %4930 = vpow2.f32 %v3882_v48  ;;  %v3881_v49 = vmul.f32 -1.442695, %v6383_v54  ;;  %v1843_v32 = vmul.f32 %v4909_v58, %v6327_v53 }
 0x35c   :  { %v4913_v14 = vpop.eup %4912  ;;  %v1846_v57 = vmul.f32 %v4911_v20, %v6331_v11  ;;  %4932 = vpow2.f32 %v3880_v63 }
 0x35d   :  { %v4915_v8 = vpop.eup %4914  ;;  %v1844_v47 = vmul.f32 %v4913_v14, %v6335_v60  ;;  %4934 = vpow2.f32 %v3883_v50 }
 0x35e   :  { %v4917_v61 = vpop.eup %4916  ;;  %v1805_v19 = vadd.f32 1.0, %v4915_v8  ;;  %4936 = vpow2.f32 %v3881_v49  ;;  %v6391_v40 = vpack.c.bf16 %v1846_v57, %v1845_v1 }
 0x35f   :  { %v4919_v46 = vpop.eup %4918  ;;  %v1803_v43 = vadd.f32 1.0, %v4917_v61  ;;  %v6393_v48 = vpack.c.bf16 %v1844_v47, %v1843_v32 }
 0x360   :  { %v4921_v37 = vpop.eup %4920  ;;  %4938 = vrcp.f32 %v1805_v19  ;;  %v1806_v18 = vadd.f32 1.0, %v4919_v46 }
 0x361   :  { %v4923_v11 = vpop.eup %4922  ;;  %4940 = vrcp.f32 %v1803_v43  ;;  %v1804_v62 = vadd.f32 1.0, %v4921_v37  ;;  %4364 = vmatprep.subr.bf16.mxu1 %v6393_v48 }
 0x362   :  { %v4925_v53 = vpop.eup %4924  ;;  %4942 = vrcp.f32 %v1806_v18  ;;  %4365 = vmatpush3.bf16.msra.mxu1 %v6393_v48  ;;  %v1849_v58 = vmul.f32 %v4923_v11, %v6340_v59 }
 0x363   :  { %v4927_v60 = vpop.eup %4926  ;;  %4944 = vrcp.f32 %v1804_v62  ;;  %4366 = vmatprep.subr.bf16.mxu1 %v6391_v40  ;;  %v1847_v49 = vmul.f32 %v4925_v53, %v6343_v39 }
 0x364   :  { %v4929_v63 = vpop.eup %4928  ;;  %v1850_v50 = vmul.f32 %v4927_v60, %v6347_v31 }
 0x365   :  { %v4931_v20 = vpop.eup %4930  ;;  %v1848_v14 = vmul.f32 %v4929_v63, %v6351_v51 }
 0x366   :  { %v4933_v1 = vpop.eup %4932  ;;  %v1809_v57 = vadd.f32 1.0, %v4931_v20  ;;  %4367 = vmatpush3.bf16.msra.mxu1 %v6391_v40  ;;  %v6403_v8 = vpack.c.bf16 %v1850_v50, %v1849_v58 }
 0x367   :  { %v4935_v32 = vpop.eup %4934  ;;  %v1807_v47 = vadd.f32 1.0, %v4933_v1  ;;  %v6405_v61 = vpack.c.bf16 %v1848_v14, %v1847_v49  ;;  %v4726_v1 = vld [vmem:[%s6945_s15 + $0x20] sm:$0xff]  }
 0x368   :  { %v4937_v19 = vpop.eup %4936  ;;  %4946 = vrcp.f32 %v1809_v57  ;;  %v1810_v59 = vadd.f32 1.0, %v4935_v32  ;;  %v4727_v57 = vld [vmem:[%s6945_s15 + $0x28] sm:$0xff]   ;;  %v4728_v32 = vld [vmem:[%s6945_s15 + $0x30] sm:$0xff]  }
 0x369   :  { %4948 = vrcp.f32 %v1807_v47  ;;  %v1808_v31 = vadd.f32 1.0, %v4937_v19  ;;  %4368 = vmatprep.subr.bf16.mxu1 %v6405_v61  ;;  %v4729_v47 = vld [vmem:[%s6945_s15 + $0x38] sm:$0xff]  }
 0x36a   :  { %v4939_v39 = vpop.eup %4938  ;;  %4950 = vrcp.f32 %v1810_v59  ;;  %4369 = vmatpush3.bf16.msra.mxu1 %v6405_v61 }
 0x36b   :  { %v4941_v51 = vpop.eup %4940  ;;  %4952 = vrcp.f32 %v1808_v31  ;;  %4370 = vmatprep.subr.bf16.mxu1 %v6403_v8  ;;  %v1853_v37 = vmul.f32 %v4939_v39, %v6356_v35 }
 0x36c   :  { %v4943_v46 = vpop.eup %4942  ;;  %v1851_v11 = vmul.f32 %v4941_v51, %v6359_v16 }
 0x36d   :  { %v4945_v43 = vpop.eup %4944  ;;  %v1854_v18 = vmul.f32 %v4943_v46, %v6363_v44 }
 0x36e   :  { %v1852_v62 = vmul.f32 %v4945_v43, %v6367_v24  ;;  %4371 = vmatpush3.bf16.msra.mxu1 %v6403_v8  ;;  %v7040_v43 = vld [vmem:[#allocation14_spill] sm:$0xff] }
 0x36f   :  { %v6415_v53 = vpack.c.bf16 %v1854_v18, %v1853_v37 }
 0x370   :  { %v6417_v60 = vpack.c.bf16 %v1852_v62, %v1851_v11  ;;  %v7041_v62 = vld [vmem:[#allocation13_spill] sm:$0xff] }
 0x372   :  { %v4947_v63 = vpop.eup %4946  ;;  %4372 = vmatprep.subr.bf16.mxu1 %v6417_v60 }
 0x373   :  { %v4949_v58 = vpop.eup %4948  ;;  %4373 = vmatpush3.bf16.msra.mxu1 %v6417_v60  ;;  %v1857_v16 = vmul.f32 %v4947_v63, %v6372_v0  ;;  %v4723_v0 = vld [vmem:[%s6945_s15 + $0x8] sm:$0xff]  }
 0x374   :  { %v4951_v50 = vpop.eup %4950  ;;  %4374 = vmatprep.subr.bf16.mxu1 %v6415_v53  ;;  %v1855_v24 = vmul.f32 %v4949_v58, %v6375_v52  ;;  %v4724_v52 = vld [vmem:[%s6945_s15 + $0x10] sm:$0xff]  }
 0x375   :  { %v4953_v35 = vpop.eup %4952  ;;  %v1858_v44 = vmul.f32 %v4951_v50, %v6379_v27  ;;  %v7039_v27 = vmov 0.0   ;;  %v7042_v50 = vld [vmem:[#allocation17_spill] sm:$0xff] }
 0x376   :  { %v1856_v20 = vmul.f32 %v4953_v35, %v6383_v54  ;;  %v4725_v54 = vld [vmem:[%s6945_s15 + $0x18] sm:$0xff]  }
 0x377   :  { %4375 = vmatpush3.bf16.msra.mxu1 %v6415_v53  ;;  %v6427_v49 = vpack.c.bf16 %v1858_v44, %v1857_v16  ;;  %v7043_v44 = vld [vmem:[#allocation15_spill] sm:$0xff] }
 0x378   :  { %v6429_v14 = vpack.c.bf16 %v1856_v20, %v1855_v24 }
 0x37a   :  { %4376 = vmatprep.subr.bf16.mxu1 %v6429_v14 }
 0x37b   :  { %4377 = vmatpush3.bf16.msra.mxu1 %v6429_v14 }
 0x37c   :  { %4378 = vmatprep.subr.bf16.mxu1 %v6427_v49 }
 0x37f   :  { %4379 = vmatpush3.bf16.msra.mxu1 %v6427_v49 }
 0x380   :  { %4396 = vmatprep.subr.bf16.mxu1 %v7039_v27 }
 0x382   :  { %4381 = vmatmul.mubr.bf16.vlgmr.msra.gmra.mrb[36].mxu1 %v4723_v0 }
 0x383   :  { %4384 = vmatprep.mubr.bf16.mxu1 %v4724_v52  ;;  %v7044_v52 = vld [vmem:[#allocation18_spill] sm:$0xff] }
 0x38a   :  { %4385 = vmatmul.mubr.bf16.gmra.mrb[40].mxu1 %v4725_v54 }
 0x38b   :  { %4388 = vmatprep.mubr.bf16.mxu1 %v4726_v1 }
 0x392   :  { %4389 = vmatmul.mubr.bf16.gmra.mrb[44].mxu1 %v4727_v57 }
 0x393   :  { %4392 = vmatprep.mubr.bf16.mxu1 %v4728_v32  ;;  %v7045_v32 = vld [vmem:[#allocation16_spill] sm:$0xff] }
 0x39a   :  { %4393 = vmatmul.mubr.bf16.gmra.mrb[48].mxu1 %v4729_v47 }
 0x39b   :  { %4412 = vmatprep.mubr.msk.bf16.mxu1 %vm5101_vm1, %v7039_v27 }
 0x455   :  { %v4382_v19 = vpop.f32.mrb[36].mxu1 }
 0x456   :  { %v6460_v59 = vadd.f32 %v4382_v19, %v6023_v17  ;;  %v2061_v31 = vpop.f32.mrb[37].mxu1 }
 0x457   :  { %v6463_v39 = vadd.f32 %v2061_v31, %v6019_v3  ;;  %v4383_v51 = vpop.f32.mrb[38].mxu1 }
 0x458   :  { %v3894_v46 = vmul.f32 -1.442695, %v6460_v59  ;;  %v6467_v37 = vadd.f32 %v4383_v51, %v7040_v43  ;;  %v2064_v18 = vpop.f32.mrb[39].mxu1 }
 0x459   :  { %v3892_v11 = vmul.f32 -1.442695, %v6463_v39  ;;  %v6471_v63 = vadd.f32 %v2064_v18, %v7041_v62 }
 0x45a   :  { %4954 = vpow2.f32 %v3894_v46  ;;  %v3895_v17 = vmul.f32 -1.442695, %v6467_v37 }
 0x45b   :  { %4956 = vpow2.f32 %v3892_v11  ;;  %v3893_v58 = vmul.f32 -1.442695, %v6471_v63 }
 0x45c   :  { %4958 = vpow2.f32 %v3895_v17  ;;  %v7046_v17 = vld [vmem:[#allocation21_spill] sm:$0xff] }
 0x45d   :  { %4960 = vpow2.f32 %v3893_v58  ;;  %v4386_v3 = vpop.f32.mrb[40].mxu1 }
 0x45e   :  { %v6476_v35 = vadd.f32 %v4386_v3, %v7042_v50  ;;  %v2077_v16 = vpop.f32.mrb[41].mxu1 }
 0x45f   :  { %v6479_v24 = vadd.f32 %v2077_v16, %v7043_v44  ;;  %v4387_v20 = vpop.f32.mrb[42].mxu1  ;;  %v7047_v44 = vld [vmem:[#allocation19_spill] sm:$0xff] }
 0x460   :  { %v3898_v0 = vmul.f32 -1.442695, %v6476_v35  ;;  %v6483_v54 = vadd.f32 %v4387_v20, %v7044_v52  ;;  %v2080_v1 = vpop.f32.mrb[43].mxu1 }
 0x461   :  { %v3896_v57 = vmul.f32 -1.442695, %v6479_v24  ;;  %v6487_v47 = vadd.f32 %v2080_v1, %v7045_v32 }
 0x462   :  { %4962 = vpow2.f32 %v3898_v0  ;;  %v3899_v19 = vmul.f32 -1.442695, %v6483_v54 }
 0x463   :  { %4964 = vpow2.f32 %v3896_v57  ;;  %v3897_v31 = vmul.f32 -1.442695, %v6487_v47  ;;  %v7048_v57 = vld [vmem:[#allocation22_spill] sm:$0xff] }
 0x464   :  { %v4955_v51 = vpop.eup %4954  ;;  %4966 = vpow2.f32 %v3899_v19 }
 0x465   :  { %v4957_v46 = vpop.eup %4956  ;;  %v2174_v43 = vadd.f32 1.0, %v4955_v51  ;;  %4968 = vpow2.f32 %v3897_v31  ;;  %v4390_v18 = vpop.f32.mrb[44].mxu1  ;;  %v7049_v51 = vld [vmem:[#allocation20_spill] sm:$0xff] }
 0x466   :  { %v4959_v11 = vpop.eup %4958  ;;  %v2172_v62 = vadd.f32 1.0, %v4957_v46  ;;  %v6492_v58 = vadd.f32 %v4390_v18, %v7046_v17  ;;  %v2093_v3 = vpop.f32.mrb[45].mxu1 }
 0x467   :  { %v4961_v50 = vpop.eup %4960  ;;  %4970 = vrcp.f32 %v2174_v43  ;;  %v2175_v16 = vadd.f32 1.0, %v4959_v11  ;;  %v6495_v20 = vadd.f32 %v2093_v3, %v7047_v44  ;;  %v4391_v0 = vpop.f32.mrb[46].mxu1 }
 0x468   :  { %4972 = vrcp.f32 %v2172_v62  ;;  %v2173_v52 = vadd.f32 1.0, %v4961_v50  ;;  %v3902_v1 = vmul.f32 -1.442695, %v6492_v58  ;;  %v6499_v32 = vadd.f32 %v4391_v0, %v7048_v57  ;;  %v2096_v19 = vpop.f32.mrb[47].mxu1 }
 0x469   :  { %4974 = vrcp.f32 %v2175_v16  ;;  %v3900_v31 = vmul.f32 -1.442695, %v6495_v20  ;;  %v6503_v46 = vadd.f32 %v2096_v19, %v7049_v51 }
 0x46a   :  { %4976 = vrcp.f32 %v2173_v52  ;;  %v3903_v43 = vmul.f32 -1.442695, %v6499_v32 }
 0x46b   :  { %4978 = vpow2.f32 %v3902_v1  ;;  %v3901_v18 = vmul.f32 -1.442695, %v6503_v46 }
 0x46c   :  { %v4963_v11 = vpop.eup %4962  ;;  %4980 = vpow2.f32 %v3900_v31 }
 0x46d   :  { %v4965_v62 = vpop.eup %4964  ;;  %v2178_v17 = vadd.f32 1.0, %v4963_v11  ;;  %4982 = vpow2.f32 %v3903_v43  ;;  %v4394_v3 = vpop.f32.mrb[48].mxu1 }
 0x46e   :  { %v4967_v50 = vpop.eup %4966  ;;  %v2176_v44 = vadd.f32 1.0, %v4965_v62  ;;  %4984 = vpow2.f32 %v3901_v18  ;;  %v6508_v16 = vadd.f32 %v4394_v3, %v6072_v25  ;;  %v2109_v0 = vpop.f32.mrb[49].mxu1  ;;  %v7050_v62 = vld [vmem:[#allocation23_spill] sm:$0xff] }
 0x46f   :  { %v4969_v57 = vpop.eup %4968  ;;  %4986 = vrcp.f32 %v2178_v17  ;;  %v2179_v52 = vadd.f32 1.0, %v4967_v50  ;;  %v6511_v1 = vadd.f32 %v2109_v0, %v6049_v34  ;;  %v4395_v19 = vpop.f32.mrb[50].mxu1 }
 0x470   :  { %4988 = vrcp.f32 %v2176_v44  ;;  %v2177_v31 = vadd.f32 1.0, %v4969_v57  ;;  %v3906_v51 = vmul.f32 -1.442695, %v6508_v16  ;;  %v6515_v43 = vadd.f32 %v4395_v19, %v6081_v9  ;;  %v2112_v11 = vpop.f32.mrb[51].mxu1 }
 0x471   :  { %v4971_v18 = vpop.eup %4970  ;;  %4990 = vrcp.f32 %v2179_v52  ;;  %v3904_v25 = vmul.f32 -1.442695, %v6511_v1  ;;  %v6519_v3 = vadd.f32 %v2112_v11, %v7050_v62 }
 0x472   :  { %v4973_v17 = vpop.eup %4972  ;;  %4992 = vrcp.f32 %v2177_v31  ;;  %v3907_v34 = vmul.f32 -1.442695, %v6515_v43  ;;  %v2222_v9 = vmul.f32 %v4971_v18, %v6460_v59 }
 0x473   :  { %v4975_v50 = vpop.eup %4974  ;;  %4994 = vpow2.f32 %v3906_v51  ;;  %v3905_v44 = vmul.f32 -1.442695, %v6519_v3  ;;  %v2220_v19 = vmul.f32 %v4973_v17, %v6463_v39 }
 0x474   :  { %v4977_v0 = vpop.eup %4976  ;;  %v2223_v57 = vmul.f32 %v4975_v50, %v6467_v37  ;;  %4996 = vpow2.f32 %v3904_v25 }
 0x475   :  { %v4979_v52 = vpop.eup %4978  ;;  %v2221_v11 = vmul.f32 %v4977_v0, %v6471_v63  ;;  %4998 = vpow2.f32 %v3907_v34 }
 0x476   :  { %v4981_v62 = vpop.eup %4980  ;;  %v2238_v31 = vpack.c.bf16 %v2223_v57, %v2222_v9  ;;  %v2182_v15 = vadd.f32 1.0, %v4979_v52  ;;  %5000 = vpow2.f32 %v3905_v44 }
 0x477   :  { %v4983_v29 = vpop.eup %4982  ;;  %v2237_v51 = vpack.c.bf16 %v2221_v11, %v2220_v19  ;;  %v2180_v56 = vadd.f32 1.0, %v4981_v62 }
 0x478   :  { %v4985_v13 = vpop.eup %4984  ;;  %5002 = vrcp.f32 %v2182_v15  ;;  %v2183_v38 = vadd.f32 1.0, %v4983_v29 }
 0x479   :  { %v4987_v59 = vpop.eup %4986  ;;  %5004 = vrcp.f32 %v2180_v56  ;;  %v2181_v37 = vadd.f32 1.0, %v4985_v13  ;;  %4397 = vmatpush3.bf16.msra.mxu1 %v2237_v51 }
 0x47a   :  { %v4989_v18 = vpop.eup %4988  ;;  %5006 = vrcp.f32 %v2183_v38  ;;  %4398 = vmatprep.subr.bf16.mxu1 %v7039_v27  ;;  %v2226_v25 = vmul.f32 %v4987_v59, %v6476_v35 }
 0x47b   :  { %v4991_v39 = vpop.eup %4990  ;;  %5008 = vrcp.f32 %v2181_v37  ;;  %v2224_v50 = vmul.f32 %v4989_v18, %v6479_v24 }
 0x47c   :  { %v4993_v63 = vpop.eup %4992  ;;  %v2227_v17 = vmul.f32 %v4991_v39, %v6483_v54 }
 0x47d   :  { %v4995_v34 = vpop.eup %4994  ;;  %v2225_v15 = vmul.f32 %v4993_v63, %v6487_v47  ;;  %4399 = vmatpush3.bf16.msra.mxu1 %v2238_v31 }
 0x47e   :  { %v4997_v56 = vpop.eup %4996  ;;  %v2240_v13 = vpack.c.bf16 %v2227_v17, %v2226_v25  ;;  %v2186_v29 = vadd.f32 1.0, %v4995_v34  ;;  %4400 = vmatprep.subr.bf16.mxu1 %v7039_v27  ;;  %v2236_v34 = vld [vmem:[%s6946_s17] sm:$0xf] }
 0x47f   :  { %v4999_v38 = vpop.eup %4998  ;;  %v2239_v44 = vpack.c.bf16 %v2225_v15, %v2224_v50  ;;  %v2184_v0 = vadd.f32 1.0, %v4997_v56  ;;  %v113_v50 = vld [vmem:[%s6947_s6 + $0x10] sm:$0xff]  ;;  %v114_v15 = vld [vmem:[%s6947_s6 + $0x18] sm:$0xff] }
 0x480   :  { %v5001_v9 = vpop.eup %5000  ;;  %5010 = vrcp.f32 %v2186_v29  ;;  %v2187_v57 = vadd.f32 1.0, %v4999_v38  ;;  %v4609_v56 = vpack.c.bf16 %v114_v15, %v113_v50  ;;  %v2285_v29 = vlaneseq }
 0x481   :  { %5012 = vrcp.f32 %v2184_v0  ;;  %v2185_v35 = vadd.f32 1.0, %v5001_v9  ;;  %4401 = vmatpush3.bf16.msra.mxu1 %v2239_v44 }
 0x482   :  { %v5003_v54 = vpop.eup %5002  ;;  %5014 = vrcp.f32 %v2187_v57  ;;  %4402 = vmatprep.subr.bf16.mxu1 %v7039_v27  ;;  %v2286_v38 = vshrl.u32 %v2285_v29, 7 }
 0x483   :  { %v5005_v24 = vpop.eup %5004  ;;  %5016 = vrcp.f32 %v2185_v35  ;;  %v2230_v19 = vmul.f32 %v5003_v54, %v6492_v58 }
 0x484   :  { %v5007_v47 = vpop.eup %5006  ;;  %v2228_v62 = vmul.f32 %v5005_v24, %v6495_v20  ;;  %v2287_v44 = vsub.s32 0, %v2286_v38  ;;  %v2292_v0 = vsub.s32 1, %v2286_v38  ;;  %v2298_v9 = vsub.s32 2, %v2286_v38 }
 0x485   :  { %v5009_v52 = vpop.eup %5008  ;;  %v2231_v11 = vmul.f32 %v5007_v47, %v6499_v32  ;;  %4403 = vmatpush3.bf16.msra.mxu1 %v2240_v13  ;;  %v115_v13 = vld [vmem:[%s6947_s6 + $0x20] sm:$0xff] }
 0x486   :  { %v2229_v31 = vmul.f32 %v5009_v52, %v6503_v46  ;;  %4404 = vmatprep.subr.bf16.mxu1 %v7039_v27  ;;  %v2817_v26 = vpack.c.bf16 %v115_v13, %v115_v13 }
 0x487   :  { %v2242_v51 = vpack.c.bf16 %v2231_v11, %v2230_v19  ;;  %v7052_v19 = vld [vmem:[#allocation10_spill] sm:$0xff] }
 0x488   :  { %v2241_v59 = vpack.c.bf16 %v2229_v31, %v2228_v62  ;;  %v7053_v62 = vld [vmem:[#allocation11_spill] sm:$0xff]  ;;  %v2844_v5 = vsel %vm2842_vm11, %v2817_v26, 0 }
 0x48a   :  { %v5011_v37 = vpop.eup %5010  ;;  %4405 = vmatpush3.bf16.msra.mxu1 %v2241_v59 }
 0x48b   :  { %v5013_v18 = vpop.eup %5012  ;;  %4406 = vmatprep.subr.bf16.mxu1 %v7039_v27  ;;  %v2234_v58 = vmul.f32 %v5011_v37, %v6508_v16  ;;  %v7051_v16 = vmov 0.0|0.0  }
 0x48c   :  { %v5015_v39 = vpop.eup %5014  ;;  %v2232_v25 = vmul.f32 %v5013_v18, %v6511_v1  ;;  %v111_v1 = vld [vmem:[%s6947_s6] sm:$0xff] }
 0x48d   :  { %v5017_v63 = vpop.eup %5016  ;;  %v2235_v32 = vmul.f32 %v5015_v39, %v6515_v43  ;;  %v112_v43 = vld [vmem:[%s6947_s6 + $0x8] sm:$0xff] }
 0x48e   :  { %v2233_v20 = vmul.f32 %v5017_v63, %v6519_v3  ;;  %4407 = vmatpush3.bf16.msra.mxu1 %v2242_v51  ;;  %v4606_v3 = vpack.c.bf16 %v112_v43, %v111_v1  ;;  %v7054_v51 = vld [vmem:[#allocation12_spill] sm:$0xff] }
 0x48f   :  { %v2244_v46 = vpack.c.bf16 %v2235_v32, %v2234_v58  ;;  %4408 = vmatprep.subr.bf16.mxu1 %v7039_v27 }
 0x490   :  { %v2243_v17 = vpack.c.bf16 %v2233_v20, %v2232_v25 }
 0x492   :  { %4409 = vmatpush3.bf16.msra.mxu1 %v2243_v17 }
 0x493   :  { %4410 = vmatprep.subr.bf16.mxu1 %v7039_v27 }
 0x496   :  { %4411 = vmatpush3.bf16.msra.mxu1 %v2244_v46 }
 0x497   :  { %4605 = vmatprep.subr.bf16.mxu1 %v7051_v16 }
 0x499   :  { %4413 = vmatmul.mubr.bf16.vlgmr.msra.gmra.mrb[52].mxu1 %v2236_v34 }
 0x49a   :  { %4426 = vmatprep.mubr.msk.f32.mxu1 %vm5101_vm1, %v7039_v27  ;;  %4607 = vmatpush3.bf16.msra.mxu1 %v4606_v3 }
 0x49b   :  { %4608 = vmatprep.subr.bf16.mxu1 %v7051_v16 }
 0x49e   :  { %4610 = vmatpush3.bf16.msra.mxu1 %v4609_v56 }
 0x49f   :  { %4424 = vmatprep.subr.mxu1 %v7039_v27 }
 0x4a2   :  { %4425 = vmatpush3.msra.mxu1 %v115_v13 }
 0x4a3   :  { %4461 = vmatprep.subr.bf16.mxu1 %v7039_v27 }
 0x56c   :  { %v2279_v57 = vpop.f32.mrb[52].mxu1 }
 0x56d   :  { %v2288_v35 = vrot.slane %v2279_v57, %v2287_v44  ;;  %v2293_v54 = vrot.slane %v2279_v57, %v2292_v0  ;;  %v2299_v24 = vrot.slane %v2279_v57, %v2298_v9  ;;  %v4414_v47 = vpop.f32.mrb[53].mxu1 }
 0x56e   :  { %v2282_v52 = vpop.f32.mrb[54].mxu1 }
 0x56f   :  { %v2289_v11 = vmul.f32 %v2288_v35, %v7052_v19  ;;  %v2294_v31 = vmul.f32 %v2293_v54, %v7053_v62  ;;  %v2300_v59 = vmul.f32 %v2299_v24, %v7054_v51  ;;  %v4415_v37 = vpop.f32.mrb[55].mxu1  ;;  %v4732_v51 = vld [vmem:[%s6949_s23 + $0x10] sm:$0xff]  }
 0x570   :  { %v7061_v37 = vld [vmem:[#allocation3_spill] sm:$0xff] }
 0x571   :  { %v2295_v18 = vadd.f32 %v2294_v31, %v2289_v11  ;;  %v4731_v31 = vld [vmem:[%s6949_s23 + $0x8] sm:$0xff]  }
 0x573   :  { %v2301_v39 = vadd.f32 %v2300_v59, %v2295_v18  ;;  %v7060_v59 = vld [vmem:[#allocation2_spill] sm:$0xff]  ;;  %v4733_v18 = vld [vmem:[%s6949_s23 + $0x18] sm:$0xff]  }
 0x575   :  { %v3908_v63 = vclamps-f32 %v2301_v39, 100.0  ;;  %v4734_v39 = vld [vmem:[%s6949_s23 + $0x20] sm:$0xff]  }
 0x577   :  { %v2305_v58 = vsel %vm2304_vm10, %v3908_v63, 0.0  ;;  %v7062_v63 = vld [vmem:[#allocation4_spill] sm:$0xff] }
 0x578   :  { %4427 = vmatmul.mubr.msk.f32.vlgmr.msra.gmra.mrb[56].mxu1 %vm490_vm2, %v2305_v58  ;;  %v7063_v58 = vld [vmem:[#allocation5_spill] sm:$0xff] }
 0x579   :  { %4462 = vmatpush3.bf16.msra.mxu1 %v2757_v28  ;;  %4477 = vmatprep.mubr.msk.bf16.mxu1 %vm5101_vm1, %v7039_v27  ;;  %v2756_v28 = vld [vmem:[%s6948_s20] sm:$0xf] }
 0x57a   :  { %4463 = vmatprep.subr.bf16.mxu1 %v7039_v27 }
 0x57d   :  { %4464 = vmatpush3.bf16.msra.mxu1 %v2758_v55  ;;  %v7059_v55 = vpack.c.bf16 %v6308_v2, %v6305_v41 }
 0x57e   :  { %4465 = vmatprep.subr.bf16.mxu1 %v7039_v27 }
 0x581   :  { %4466 = vmatpush3.bf16.msra.mxu1 %v2759_v4  ;;  %v6631_v4 = vpop.permute.xlu0 %3301 }
 0x582   :  { %4467 = vmatprep.subr.bf16.mxu1 %v7039_v27 }
 0x585   :  { %4468 = vmatpush3.bf16.msra.mxu1 %v7055_v36  ;;  %v6633_v22 = vpop.permute.xlu0 %3311  ;;  %v4735_v36 = vld [vmem:[%s6949_s23 + $0x28] sm:$0xff]  }
 0x586   :  { %4469 = vmatprep.subr.bf16.mxu1 %v7039_v27 }
 0x589   :  { %4470 = vmatpush3.bf16.msra.mxu1 %v7056_v6  ;;  %v6635_v42 = vpop.permute.xlu0 %3321  ;;  %v4736_v6 = vld [vmem:[%s6949_s23 + $0x30] sm:$0xff]  }
 0x58a   :  { %4471 = vmatprep.subr.bf16.mxu1 %v7039_v27 }
 0x58d   :  { %4472 = vmatpush3.bf16.msra.mxu1 %v7057_v23  ;;  %v6637_v41 = vpop.permute.xlu0 %3331  ;;  %v7064_v23 = vld [vmem:[#allocation6_spill] sm:$0xff] }
 0x58e   :  { %4473 = vmatprep.subr.bf16.mxu1 %v7039_v27 }
 0x591   :  { %4474 = vmatpush3.bf16.msra.mxu1 %v7058_v10  ;;  %v6639_v2 = vpop.permute.xlu0 %3341  ;;  %v7065_v10 = vld [vmem:[#allocation7_spill] sm:$0xff] }
 0x592   :  { %4475 = vmatprep.subr.bf16.mxu1 %v7039_v27  ;;  %v5082_v27 = vld [vmem:[%s7018_s1] sm:$0xff] }
 0x595   :  { %4476 = vmatpush3.bf16.msra.mxu1 %v7059_v55  ;;  %v6641_v12 = vpop.permute.xlu0 %3351  ;;  %v4737_v55 = vld [vmem:[%s6949_s23 + $0x38] sm:$0xff]  }
 0x596   :  { %4481 = vmatprep.subr.bf16.mxu1 %v4606_v3 }
 0x598   :  { %4478 = vmatmul.mubr.bf16.vlgmr.msra.gmra.mrb[60].mxu1 %v2756_v28  ;;  %v4738_v28 = vld [vmem:[%s6950_s22] sm:$0xff]  }
 0x599   :  { %4482 = vmatpush3.bf16.msra.mxu1 %v4606_v3  ;;  %4487 = vmatprep.mubr.msk.bf16.mxu1 %vm490_vm2, %v6393_v48  ;;  %v6643_v33 = vpop.permute.xlu0 %3361 }
 0x59a   :  { %4483 = vmatprep.subr.bf16.mxu1 %v4609_v56 }
 0x59d   :  { %4484 = vmatpush3.bf16.msra.mxu1 %v4609_v56 }
 0x59e   :  { %4675 = vmatprep.subr.msk.bf16.mxu1 %vm2842_vm11, %v2817_v26  ;;  %v7066_v26 = vld [vmem:[#allocation8_spill] sm:$0xff] }
 0x5a1   :  { %4486 = vmatpush3.bf16.msra.mxu1 %v2844_v5  ;;  %v7067_v5 = vld [vmem:[#allocation9_spill] sm:$0xff] }
 0x5a4   :  { %4488 = vmatmul.mubr.msk.bf16.vlgmr.msra.gmra.mrb[64].mxu1 %vm490_vm2, %v6391_v40  ;;  %v3910_v40 = vld [vmem:[%s6951_s7] ss:$0 sm:$0xff] }
 0x5a5   :  { %4491 = vmatprep.mubr.msk.bf16.mxu1 %vm490_vm2, %v6405_v61  ;;  %v106_v61 = vld [vmem:[%s6952_s2] sm:$0xff] }
 0x5ac   :  { %4492 = vmatmul.mubr.msk.bf16.gmra.mrb[68].mxu1 %vm490_vm2, %v6403_v8  ;;  %v2769_v8 = vpop.permute.xlu0 %2768 }
 0x5ad   :  { %4495 = vmatprep.mubr.msk.bf16.mxu1 %vm490_vm2, %v6417_v60 }
 0x5b4   :  { %4496 = vmatmul.mubr.msk.bf16.gmra.mrb[72].mxu1 %vm490_vm2, %v6415_v53 }
 0x5b5   :  { %4499 = vmatprep.mubr.msk.bf16.mxu1 %vm490_vm2, %v6429_v14 }
 0x5bc   :  { %4500 = vmatmul.mubr.msk.bf16.gmra.mrb[76].mxu1 %vm490_vm2, %v6427_v49 }
 0x64b   :  { %v2375_v30 = vpop.f32.mrb[56].mxu1 }
 0x64c   :  { %v4428_v7 = vpop.f32.mrb[57].mxu1  ;;  %v2386_v48 = vmul.f32 %v3910_v40, %v2375_v30  ;;  %v4740_v30 = vld [vmem:[%s6950_s22 + $0x10] sm:$0xff]   ;;  %v4742_v40 = vld [vmem:[%s6950_s22 + $0x20] sm:$0xff]  }
 0x64d   :  { %v4741_v7 = vld [vmem:[%s6950_s22 + $0x18] sm:$0xff]  }
 0x64e   :  { %v2811_v32 = vadd.f32 %v5082_v27, %v2386_v48  ;;  %v4743_v48 = vld [vmem:[%s6950_s22 + $0x28] sm:$0xff]  }
 0x66b   :  { %v2805_v53 = vpop.f32.mrb[60].mxu1 }
 0x66c   :  { %v2806_v60 = vadd.f32 %v2805_v53, %v2769_v8  ;;  %v4479_v49 = vpop.f32.mrb[61].mxu1  ;;  %v4744_v8 = vld [vmem:[%s6950_s22 + $0x30] sm:$0xff]   ;;  %v4746_v53 = vld [vmem:[%s6954_s25] sm:$0xff]  }
 0x66d   :  { %v2808_v14 = vpop.f32.mrb[62].mxu1  ;;  %v3297_v49 = vpop.permute.xlu1 %3296 }
 0x66e   :  { %v2812_v25 = vmul.f32 %v2806_v60, %v106_v61  ;;  %v4480_v20 = vpop.f32.mrb[63].mxu1  ;;  %v4745_v61 = vld [vmem:[%s6950_s22 + $0x38] sm:$0xff]   ;;  %v4747_v60 = vld [vmem:[%s6954_s25 + $0x10] sm:$0xff]  }
 0x66f   :  { %4587 = vmatprep.mubr.bf16.mxu1 %v4747_v60 }
 0x670   :  { %v2813_v46 = vadd.f32 %v2812_v25, %v2811_v32 }
 0x671   :  { %v3307_v14 = vpop.permute.xlu1 %3306 }
 0x672   :  { %2814 = vst.msk [vmem:[%s6953_s28] sm:$0xff] %vm125_vm0, %v2813_v46 }
 0x675   :  { %v3317_v27 = vpop.permute.xlu1 %3316 }
 0x677   :  { %v4489_v17 = vpop.f32.mrb[64].mxu1 }
 0x678   :  { %v2880_v34 = vpop.f32.mrb[65].mxu1 }
 0x679   :  { %v4490_v16 = vpop.f32.mrb[66].mxu1  ;;  %v3327_v46 = vpop.permute.xlu1 %3326 }
 0x67a   :  { %v2976_v1 = vpack.c.bf16 %v4490_v16, %v4489_v17  ;;  %v2883_v43 = vpop.f32.mrb[67].mxu1 }
 0x67b   :  { %v2975_v3 = vpack.c.bf16 %v2883_v43, %v2880_v34 }
 0x67d   :  { %4503 = vmatprep.subr.bf16.mxu0 %v2975_v3 }
 0x67e   :  { %4504 = vmatpush3.bf16.msra.mxu0 %v2975_v3 }
 0x67f   :  { %v4493_v50 = vpop.f32.mrb[68].mxu1  ;;  %4505 = vmatprep.subr.bf16.mxu0 %v2976_v1 }
 0x680   :  { %v2896_v15 = vpop.f32.mrb[69].mxu1 }
 0x681   :  { %v4494_v56 = vpop.f32.mrb[70].mxu1 }
 0x682   :  { %v2978_v13 = vpack.c.bf16 %v4494_v56, %v4493_v50  ;;  %v2899_v29 = vpop.f32.mrb[71].mxu1  ;;  %4506 = vmatpush3.bf16.msra.mxu0 %v2976_v1  ;;  %v3337_v56 = vpop.permute.xlu1 %3336 }
 0x683   :  { %v2977_v38 = vpack.c.bf16 %v2899_v29, %v2896_v15 }
 0x685   :  { %4507 = vmatprep.subr.bf16.mxu0 %v2977_v38 }
 0x686   :  { %4508 = vmatpush3.bf16.msra.mxu0 %v2977_v38 }
 0x687   :  { %v4497_v44 = vpop.f32.mrb[72].mxu1  ;;  %4509 = vmatprep.subr.bf16.mxu0 %v2978_v13 }
 0x688   :  { %v2912_v0 = vpop.f32.mrb[73].mxu1 }
 0x689   :  { %v4498_v9 = vpop.f32.mrb[74].mxu1 }
 0x68a   :  { %v2980_v57 = vpack.c.bf16 %v4498_v9, %v4497_v44  ;;  %v2915_v35 = vpop.f32.mrb[75].mxu1  ;;  %4510 = vmatpush3.bf16.msra.mxu0 %v2978_v13 }
 0x68b   :  { %v2979_v54 = vpack.c.bf16 %v2915_v35, %v2912_v0 }
 0x68d   :  { %4511 = vmatprep.subr.bf16.mxu0 %v2979_v54 }
 0x68e   :  { %4512 = vmatpush3.bf16.msra.mxu0 %v2979_v54 }
 0x68f   :  { %v4501_v24 = vpop.f32.mrb[76].mxu1  ;;  %4513 = vmatprep.subr.bf16.mxu0 %v2980_v57 }
 0x690   :  { %v2928_v47 = vpop.f32.mrb[77].mxu1 }
 0x691   :  { %v4502_v52 = vpop.f32.mrb[78].mxu1 }
 0x692   :  { %v2982_v19 = vpack.c.bf16 %v4502_v52, %v4501_v24  ;;  %v2931_v11 = vpop.f32.mrb[79].mxu1  ;;  %4514 = vmatpush3.bf16.msra.mxu0 %v2980_v57 }
 0x693   :  { %v2981_v62 = vpack.c.bf16 %v2931_v11, %v2928_v47  ;;  %v3347_v47 = vpop.permute.xlu1 %3346 }
 0x695   :  { %4515 = vmatprep.subr.bf16.mxu0 %v2981_v62 }
 0x696   :  { %4516 = vmatpush3.bf16.msra.mxu0 %v2981_v62 }
 0x697   :  { %4517 = vmatprep.subr.bf16.mxu0 %v2982_v19 }
 0x69a   :  { %4518 = vmatpush3.bf16.msra.mxu0 %v2982_v19 }
 0x69b   :  { %4535 = vmatprep.subr.bf16.mxu0 %v7060_v59 }
 0x69d   :  { %4520 = vmatmul.mubr.bf16.vlgmr.msra.gmra.mrb[48].mxu0 %v4731_v31 }
 0x69e   :  { %4536 = vmatpush3.bf16.msra.mxu0 %v7060_v59  ;;  %4523 = vmatprep.mubr.bf16.mxu0 %v4732_v51 }
 0x69f   :  { %4537 = vmatprep.subr.bf16.mxu0 %v7061_v37 }
 0x6a2   :  { %4538 = vmatpush3.bf16.msra.mxu0 %v7061_v37 }
 0x6a3   :  { %4539 = vmatprep.subr.bf16.mxu0 %v7062_v63 }
 0x6a5   :  { %4524 = vmatmul.mubr.bf16.gmra.mrb[52].mxu0 %v4733_v18 }
 0x6a6   :  { %4540 = vmatpush3.bf16.msra.mxu0 %v7062_v63  ;;  %4527 = vmatprep.mubr.bf16.mxu0 %v4734_v39 }
 0x6a7   :  { %4541 = vmatprep.subr.bf16.mxu0 %v7063_v58 }
 0x6aa   :  { %4542 = vmatpush3.bf16.msra.mxu0 %v7063_v58 }
 0x6ab   :  { %4543 = vmatprep.subr.bf16.mxu0 %v7064_v23 }
 0x6ad   :  { %4528 = vmatmul.mubr.bf16.gmra.mrb[56].mxu0 %v4735_v36 }
 0x6ae   :  { %4544 = vmatpush3.bf16.msra.mxu0 %v7064_v23  ;;  %4531 = vmatprep.mubr.bf16.mxu0 %v4736_v6 }
 0x6af   :  { %4545 = vmatprep.subr.bf16.mxu0 %v7065_v10 }
 0x6b2   :  { %4546 = vmatpush3.bf16.msra.mxu0 %v7065_v10  ;;  %v3357_v10 = vpop.permute.xlu1 %3356 }
 0x6b3   :  { %4547 = vmatprep.subr.bf16.mxu0 %v7066_v26 }
 0x6b5   :  { %4532 = vmatmul.mubr.bf16.gmra.mrb[60].mxu0 %v4737_v55 }
 0x6b6   :  { %4548 = vmatpush3.bf16.msra.mxu0 %v7066_v26  ;;  %4551 = vmatprep.mubr.bf16.mxu0 %v4738_v28 }
 0x6b7   :  { %4549 = vmatprep.subr.bf16.mxu0 %v7067_v5 }
 0x6ba   :  { %4550 = vmatpush3.bf16.msra.mxu0 %v7067_v5 }
 0x6bd   :  { %4552 = vmatmul.mubr.bf16.vlgmr.msra.gmra.mrb[48].mxu0 %v4739_v21 }
 0x6be   :  { %4555 = vmatprep.mubr.bf16.mxu0 %v4740_v30 }
 0x6c5   :  { %4556 = vmatmul.mubr.bf16.gmra.mrb[52].mxu0 %v4741_v7 }
 0x6c6   :  { %4559 = vmatprep.mubr.bf16.mxu0 %v4742_v40 }
 0x6cd   :  { %4560 = vmatmul.mubr.bf16.gmra.mrb[56].mxu0 %v4743_v48 }
 0x6ce   :  { %4563 = vmatprep.mubr.bf16.mxu0 %v4744_v8 }
 0x6d5   :  { %4564 = vmatmul.mubr.bf16.gmra.mrb[60].mxu0 %v4745_v61 }
 0x6d6   :  { %4583 = vmatprep.mubr.bf16.mxu0 %v4746_v53  ;;  %v3367_v53 = vpop.permute.xlu1 %3366 }
 0x790   :  { %v4553_v32 = vpop.f32.mrb[48].mxu0 }
 0x791   :  { %v6726_v25 = vadd.f32 %v4553_v32, %v6631_v4  ;;  %v3210_v20 = vpop.f32.mrb[49].mxu0 }
 0x792   :  { %v6729_v17 = vadd.f32 %v6629_v45, %v3210_v20  ;;  %v4554_v34 = vpop.f32.mrb[50].mxu0 }
 0x793   :  { %v3961_v16 = vmul.f32 -1.442695, %v6726_v25  ;;  %v6732_v1 = vadd.f32 %v4554_v34, %v3307_v14  ;;  %v3213_v43 = vpop.f32.mrb[51].mxu0 }
 0x794   :  { %v3959_v3 = vmul.f32 -1.442695, %v6729_v17  ;;  %v6735_v50 = vadd.f32 %v3297_v49, %v3213_v43 }
 0x795   :  { %5018 = vpow2.f32 %v3961_v16  ;;  %v3962_v15 = vmul.f32 -1.442695, %v6732_v1 }
 0x796   :  { %5020 = vpow2.f32 %v3959_v3  ;;  %v3960_v4 = vmul.f32 -1.442695, %v6735_v50 }
 0x797   :  { %5022 = vpow2.f32 %v3962_v15 }
 0x798   :  { %5024 = vpow2.f32 %v3960_v4  ;;  %v4557_v45 = vpop.f32.mrb[52].mxu0 }
 0x799   :  { %v6740_v13 = vadd.f32 %v4557_v45, %v6635_v42  ;;  %v3226_v29 = vpop.f32.mrb[53].mxu0 }
 0x79a   :  { %v6743_v38 = vadd.f32 %v6633_v22, %v3226_v29  ;;  %v4558_v44 = vpop.f32.mrb[54].mxu0 }
 0x79b   :  { %v3965_v0 = vmul.f32 -1.442695, %v6740_v13  ;;  %v6746_v9 = vadd.f32 %v4558_v44, %v3327_v46  ;;  %v3229_v57 = vpop.f32.mrb[55].mxu0 }
 0x79c   :  { %v3963_v35 = vmul.f32 -1.442695, %v6743_v38  ;;  %v6749_v54 = vadd.f32 %v3317_v27, %v3229_v57 }
 0x79d   :  { %5026 = vpow2.f32 %v3965_v0  ;;  %v3966_v24 = vmul.f32 -1.442695, %v6746_v9 }
 0x79e   :  { %5028 = vpow2.f32 %v3963_v35  ;;  %v3964_v42 = vmul.f32 -1.442695, %v6749_v54 }
 0x79f   :  { %v5019_v52 = vpop.eup %5018  ;;  %5030 = vpow2.f32 %v3966_v24 }
 0x7a0   :  { %v5021_v22 = vpop.eup %5020  ;;  %v3435_v19 = vadd.f32 1.0, %v5019_v52  ;;  %5032 = vpow2.f32 %v3964_v42  ;;  %v4561_v11 = vpop.f32.mrb[56].mxu0 }
 0x7a1   :  { %v5023_v62 = vpop.eup %5022  ;;  %v3433_v31 = vadd.f32 1.0, %v5021_v22  ;;  %v6754_v51 = vadd.f32 %v4561_v11, %v6639_v2  ;;  %v3242_v59 = vpop.f32.mrb[57].mxu0 }
 0x7a2   :  { %v5025_v37 = vpop.eup %5024  ;;  %5034 = vrcp.f32 %v3435_v19  ;;  %v3436_v18 = vadd.f32 1.0, %v5023_v62  ;;  %v6757_v39 = vadd.f32 %v6637_v41, %v3242_v59  ;;  %v4562_v63 = vpop.f32.mrb[58].mxu0 }
 0x7a3   :  { %5036 = vrcp.f32 %v3433_v31  ;;  %v3434_v58 = vadd.f32 1.0, %v5025_v37  ;;  %v3969_v36 = vmul.f32 -1.442695, %v6754_v51  ;;  %v6760_v6 = vadd.f32 %v4562_v63, %v3347_v47  ;;  %v3245_v23 = vpop.f32.mrb[59].mxu0 }
 0x7a4   :  { %5038 = vrcp.f32 %v3436_v18  ;;  %v3967_v2 = vmul.f32 -1.442695, %v6757_v39  ;;  %v6763_v55 = vadd.f32 %v3337_v56, %v3245_v23 }
 0x7a5   :  { %5040 = vrcp.f32 %v3434_v58  ;;  %v3970_v28 = vmul.f32 -1.442695, %v6760_v6 }
 0x7a6   :  { %5042 = vpow2.f32 %v3969_v36  ;;  %v3968_v41 = vmul.f32 -1.442695, %v6763_v55 }
 0x7a7   :  { %v5027_v26 = vpop.eup %5026  ;;  %5044 = vpow2.f32 %v3967_v2 }
 0x7a8   :  { %v5029_v5 = vpop.eup %5028  ;;  %v3439_v21 = vadd.f32 1.0, %v5027_v26  ;;  %5046 = vpow2.f32 %v3970_v28  ;;  %v4565_v30 = vpop.f32.mrb[60].mxu0 }
 0x7a9   :  { %v5031_v7 = vpop.eup %5030  ;;  %v3437_v40 = vadd.f32 1.0, %v5029_v5  ;;  %5048 = vpow2.f32 %v3968_v41  ;;  %v6768_v48 = vadd.f32 %v4565_v30, %v6643_v33  ;;  %v3258_v8 = vpop.f32.mrb[61].mxu0 }
 0x7aa   :  { %v5033_v61 = vpop.eup %5032  ;;  %5050 = vrcp.f32 %v3439_v21  ;;  %v3440_v60 = vadd.f32 1.0, %v5031_v7  ;;  %v6771_v49 = vadd.f32 %v6641_v12, %v3258_v8  ;;  %v4566_v14 = vpop.f32.mrb[62].mxu0 }
 0x7ab   :  { %5052 = vrcp.f32 %v3437_v40  ;;  %v3438_v27 = vadd.f32 1.0, %v5033_v61  ;;  %v3973_v32 = vmul.f32 -1.442695, %v6768_v48  ;;  %v6774_v20 = vadd.f32 %v4566_v14, %v3367_v53  ;;  %v3261_v46 = vpop.f32.mrb[63].mxu0 }
 0x7ac   :  { %v5035_v34 = vpop.eup %5034  ;;  %5054 = vrcp.f32 %v3440_v60  ;;  %v3971_v33 = vmul.f32 -1.442695, %v6771_v49  ;;  %v6777_v16 = vadd.f32 %v3357_v10, %v3261_v46  ;;  %v4751_v46 = vld [vmem:[%s6954_s25 + $0x28] sm:$0xff]  }
 0x7ad   :  { %v5037_v43 = vpop.eup %5036  ;;  %5056 = vrcp.f32 %v3438_v27  ;;  %v3974_v3 = vmul.f32 -1.442695, %v6774_v20  ;;  %v3483_v56 = vmul.f32 %v5035_v34, %v6726_v25  ;;  %v4752_v34 = vld [vmem:[%s6954_s25 + $0x30] sm:$0xff]  }
 0x7ae   :  { %v5039_v12 = vpop.eup %5038  ;;  %5058 = vpow2.f32 %v3973_v32  ;;  %v3972_v15 = vmul.f32 -1.442695, %v6777_v16  ;;  %v3481_v44 = vmul.f32 %v5037_v43, %v6729_v17  ;;  %v3545_v43 = vpop.permute.xlu0 %3544 }
 0x7af   :  { %v5041_v4 = vpop.eup %5040  ;;  %v3484_v45 = vmul.f32 %v5039_v12, %v6732_v1  ;;  %5060 = vpow2.f32 %v3971_v33  ;;  %v4753_v33 = vld [vmem:[%s6954_s25 + $0x38] sm:$0xff]  }
 0x7b0   :  { %v5043_v29 = vpop.eup %5042  ;;  %v3482_v0 = vmul.f32 %v5041_v4, %v6735_v50  ;;  %5062 = vpow2.f32 %v3974_v3 }
 0x7b1   :  { %v5045_v57 = vpop.eup %5044  ;;  %v3514_v35 = vpack.c.bf16 %v3484_v45, %v3483_v56  ;;  %v3443_v24 = vadd.f32 1.0, %v5043_v29  ;;  %5064 = vpow2.f32 %v3972_v15 }
 0x7b2   :  { %v5047_v47 = vpop.eup %5046  ;;  %v3513_v42 = vpack.c.bf16 %v3482_v0, %v3481_v44  ;;  %v3441_v52 = vadd.f32 1.0, %v5045_v57  ;;  %v3555_v12 = vpop.permute.xlu0 %3554 }
 0x7b3   :  { %v5049_v22 = vpop.eup %5048  ;;  %5066 = vrcp.f32 %v3443_v24  ;;  %v3444_v19 = vadd.f32 1.0, %v5047_v47 }
 0x7b4   :  { %v5051_v25 = vpop.eup %5050  ;;  %5068 = vrcp.f32 %v3441_v52  ;;  %v3442_v1 = vadd.f32 1.0, %v5049_v22  ;;  %4567 = vmatprep.subr.bf16.mxu0 %v3513_v42  ;;  %4611 = vmatprep.subr.bf16.mxu1 %v3513_v42 }
 0x7b5   :  { %v5053_v11 = vpop.eup %5052  ;;  %5070 = vrcp.f32 %v3444_v19  ;;  %4568 = vmatpush3.bf16.msra.mxu0 %v3513_v42  ;;  %4619 = vmatpush3.bf16.msra.mxu1 %v3513_v42  ;;  %v3487_v62 = vmul.f32 %v5051_v25, %v6740_v13 }
 0x7b6   :  { %v5055_v17 = vpop.eup %5054  ;;  %5072 = vrcp.f32 %v3442_v1  ;;  %4569 = vmatprep.subr.bf16.mxu0 %v3514_v35  ;;  %4612 = vmatprep.subr.bf16.mxu1 %v3514_v35  ;;  %v3485_v37 = vmul.f32 %v5053_v11, %v6743_v38  ;;  %v3565_v4 = vpop.permute.xlu0 %3564  ;;  %v5083_v1 = vld [vmem:[%s7005_s0 + $0x10] sm:$0xff] }
 0x7b7   :  { %v5057_v50 = vpop.eup %5056  ;;  %v3488_v31 = vmul.f32 %v5055_v17, %v6746_v9  ;;  %v5084_v17 = vld [vmem:[%s7005_s0 + $0x30] sm:$0xff] }
 0x7b8   :  { %v5059_v59 = vpop.eup %5058  ;;  %v3486_v18 = vmul.f32 %v5057_v50, %v6749_v54 }
 0x7b9   :  { %v5061_v63 = vpop.eup %5060  ;;  %v3516_v58 = vpack.c.bf16 %v3488_v31, %v3487_v62  ;;  %v3447_v36 = vadd.f32 1.0, %v5059_v59  ;;  %4570 = vmatpush3.bf16.msra.mxu0 %v3514_v35  ;;  %4620 = vmatpush3.bf16.msra.mxu1 %v3514_v35 }
 0x7ba   :  { %v5063_v23 = vpop.eup %5062  ;;  %v3515_v10 = vpack.c.bf16 %v3486_v18, %v3485_v37  ;;  %v3445_v2 = vadd.f32 1.0, %v5061_v63  ;;  %v3575_v45 = vpop.permute.xlu0 %3574  ;;  %v5085_v63 = vld [vmem:[%s7005_s0] sm:$0xff] }
 0x7bb   :  { %v5065_v28 = vpop.eup %5064  ;;  %5074 = vrcp.f32 %v3447_v36  ;;  %v3448_v41 = vadd.f32 1.0, %v5063_v23  ;;  %v5086_v36 = vld [vmem:[%s7005_s0 + $0x20] sm:$0xff] }
 0x7bc   :  { %5076 = vrcp.f32 %v3445_v2  ;;  %v3446_v13 = vadd.f32 1.0, %v5065_v28  ;;  %4571 = vmatprep.subr.bf16.mxu0 %v3515_v10  ;;  %4613 = vmatprep.subr.bf16.mxu1 %v3515_v10  ;;  %v5087_v28 = vld [vmem:[%s7005_s0 + $0x18] sm:$0xff] }
 0x7bd   :  { %v5067_v9 = vpop.eup %5066  ;;  %5078 = vrcp.f32 %v3448_v41  ;;  %4572 = vmatpush3.bf16.msra.mxu0 %v3515_v10  ;;  %4621 = vmatpush3.bf16.msra.mxu1 %v3515_v10 }
 0x7be   :  { %v5069_v38 = vpop.eup %5068  ;;  %5080 = vrcp.f32 %v3446_v13  ;;  %4573 = vmatprep.subr.bf16.mxu0 %v3516_v58  ;;  %4614 = vmatprep.subr.bf16.mxu1 %v3516_v58  ;;  %v3491_v5 = vmul.f32 %v5067_v9, %v6754_v51  ;;  %v3585_v44 = vpop.permute.xlu0 %3584  ;;  %v5088_v13 = vld [vmem:[%s7005_s0 + $0x38] sm:$0xff] }
 0x7bf   :  { %v5071_v54 = vpop.eup %5070  ;;  %v3489_v30 = vmul.f32 %v5069_v38, %v6757_v39 }
 0x7c0   :  { %v5073_v26 = vpop.eup %5072  ;;  %v3492_v21 = vmul.f32 %v5071_v54, %v6760_v6  ;;  %v5089_v54 = vld [vmem:[%s7005_s0 + $0x8] sm:$0xff] }
 0x7c1   :  { %v3490_v7 = vmul.f32 %v5073_v26, %v6763_v55  ;;  %4574 = vmatpush3.bf16.msra.mxu0 %v3516_v58  ;;  %4622 = vmatpush3.bf16.msra.mxu1 %v3516_v58 }
 0x7c2   :  { %v3518_v40 = vpack.c.bf16 %v3492_v21, %v3491_v5  ;;  %v3595_v38 = vpop.permute.xlu0 %3594  ;;  %v5090_v5 = vld [vmem:[%s7005_s0 + $0x28] sm:$0xff] }
 0x7c3   :  { %v3517_v8 = vpack.c.bf16 %v3490_v7, %v3489_v30 }
 0x7c5   :  { %v5075_v61 = vpop.eup %5074  ;;  %4575 = vmatprep.subr.bf16.mxu0 %v3517_v8  ;;  %4615 = vmatprep.subr.bf16.mxu1 %v3517_v8 }
 0x7c6   :  { %v5077_v53 = vpop.eup %5076  ;;  %4576 = vmatpush3.bf16.msra.mxu0 %v3517_v8  ;;  %4623 = vmatpush3.bf16.msra.mxu1 %v3517_v8  ;;  %v3495_v6 = vmul.f32 %v5075_v61, %v6768_v48  ;;  %v4748_v48 = vld [vmem:[%s6954_s25 + $0x8] sm:$0xff]  }
 0x7c7   :  { %v5079_v60 = vpop.eup %5078  ;;  %4577 = vmatprep.subr.bf16.mxu0 %v3518_v40  ;;  %4616 = vmatprep.subr.bf16.mxu1 %v3518_v40  ;;  %v3493_v55 = vmul.f32 %v5077_v53, %v6771_v49  ;;  %v4749_v49 = vld [vmem:[%s6954_s25 + $0x18] sm:$0xff]  }
 0x7c8   :  { %v5081_v51 = vpop.eup %5080  ;;  %v3496_v39 = vmul.f32 %v5079_v60, %v6774_v20  ;;  %v4750_v20 = vld [vmem:[%s6954_s25 + $0x20] sm:$0xff]   ;;  %v5091_v60 = vld [vmem:[%s7005_s0 + $0x50] sm:$0xff] }
 0x7c9   :  { %v3494_v14 = vmul.f32 %v5081_v51, %v6777_v16  ;;  %v3540_v16 = vpop.permute.xlu1 %3539 }
 0x7ca   :  { %v3520_v27 = vpack.c.bf16 %v3496_v39, %v3495_v6  ;;  %4578 = vmatpush3.bf16.msra.mxu0 %v3518_v40  ;;  %4624 = vmatpush3.bf16.msra.mxu1 %v3518_v40 }
 0x7cb   :  { %v3519_v32 = vpack.c.bf16 %v3494_v14, %v3493_v55  ;;  %v3605_v55 = vpop.permute.xlu0 %3604  ;;  %v5092_v14 = vld [vmem:[%s7005_s0 + $0x40] sm:$0xff] }
 0x7cd   :  { %4579 = vmatprep.subr.bf16.mxu0 %v3519_v32  ;;  %4617 = vmatprep.subr.bf16.mxu1 %v3519_v32  ;;  %v3550_v3 = vpop.permute.xlu1 %3549 }
 0x7ce   :  { %4580 = vmatpush3.bf16.msra.mxu0 %v3519_v32  ;;  %4625 = vmatpush3.bf16.msra.mxu1 %v3519_v32 }
 0x7cf   :  { %4581 = vmatprep.subr.bf16.mxu0 %v3520_v27  ;;  %4618 = vmatprep.subr.bf16.mxu1 %v3520_v27 }
 0x7d1   :  { %v3560_v15 = vpop.permute.xlu1 %3559 }
 0x7d2   :  { %4582 = vmatpush3.bf16.msra.mxu0 %v3520_v27  ;;  %4626 = vmatpush3.bf16.msra.mxu1 %v3520_v27 }
 0x7d5   :  { %4584 = vmatmul.mubr.bf16.vlgmr.msra.gmra.mrb[64].mxu0 %v4748_v48  ;;  %4588 = vmatmul.mubr.bf16.vlgmr.msra.gmra.mrb[80].mxu1 %v4749_v49  ;;  %v3570_v56 = vpop.permute.xlu1 %3569  ;;  %v5093_v48 = vld [vmem:[%s7005_s0 + $0x58] sm:$0xff] }
 0x7d6   :  { %4591 = vmatprep.mubr.bf16.mxu1 %v4750_v20  ;;  %v5094_v20 = vld [vmem:[%s7005_s0 + $0x48] sm:$0xff] }
 0x7d9   :  { %v3580_v29 = vpop.permute.xlu1 %3579 }
 0x7dd   :  { %4592 = vmatmul.mubr.bf16.gmra.mrb[84].mxu1 %v4751_v46  ;;  %v3590_v18 = vpop.permute.xlu1 %3589 }
 0x7de   :  { %4595 = vmatprep.mubr.bf16.mxu1 %v4752_v34 }
 0x7e1   :  { %v3600_v8 = vpop.permute.xlu1 %3599 }
 0x7e5   :  { %4596 = vmatmul.mubr.bf16.gmra.mrb[88].mxu1 %v4753_v33  ;;  %v3610_v34 = vpop.permute.xlu1 %3609 }
 0x8a8   :  { %v4585_v0 = vpop.f32.mrb[64].mxu0  ;;  %v4589_v57 = vpop.f32.mrb[80].mxu1 }
 0x8a9   :  { %v3708_v35 = vadd.f32 %v4585_v0, %v3550_v3  ;;  %v3724_v24 = vadd.f32 %v4589_v57, %v3570_v56  ;;  %v3699_v47 = vpop.f32.mrb[65].mxu0  ;;  %v3715_v42 = vpop.f32.mrb[81].mxu1 }
 0x8aa   :  { %v3700_v52 = vadd.f32 %v3699_v47, %v3540_v16  ;;  %v3716_v22 = vadd.f32 %v3715_v42, %v3560_v15  ;;  %v4586_v19 = vpop.f32.mrb[66].mxu0  ;;  %v4590_v25 = vpop.f32.mrb[82].mxu1  ;;  %v5098_v47 = vld [vmem:[%s7005_s0 + $0x68] sm:$0xff] }
 0x8ab   :  { %v3764_v11 = vadd.f32 %v5083_v1, %v3708_v35  ;;  %v3768_v50 = vadd.f32 %v5084_v17, %v3724_v24  ;;  %v3711_v62 = vadd.f32 %v4586_v19, %v3555_v12  ;;  %v3727_v31 = vadd.f32 %v4590_v25, %v3575_v45  ;;  %v3702_v59 = vpop.f32.mrb[67].mxu0  ;;  %v3718_v37 = vpop.f32.mrb[83].mxu1  ;;  %v5097_v35 = vld [vmem:[%s7005_s0 + $0x78] sm:$0xff] }
 0x8ac   :  { %v3762_v58 = vadd.f32 %v5085_v63, %v3700_v52  ;;  %v3766_v23 = vadd.f32 %v5086_v36, %v3716_v22  ;;  %v3703_v10 = vadd.f32 %v3702_v59, %v3545_v43  ;;  %v3719_v2 = vadd.f32 %v3718_v37, %v3565_v4  ;;  %v3615_v3 = vpop.permute.xlu0 %3614  ;;  %v5095_v4 = vld [vmem:[%s7005_s0 + $0x70] sm:$0xff] }
 0x8ad   :  { %3780 = vst.msk [vmem:[%s6955_s27 + $0x10] sm:$0xff] %vm125_vm0, %v3764_v11  ;;  %3784 = vst.msk [vmem:[%s6955_s27 + $0x30] sm:$0xff] %vm125_vm0, %v3768_v50  ;;  %v3765_v41 = vadd.f32 %v5087_v28, %v3711_v62  ;;  %v3769_v9 = vadd.f32 %v5088_v13, %v3727_v31 }
 0x8ae   :  { %3778 = vst.msk [vmem:[%s6955_s27] sm:$0xff] %vm125_vm0, %v3762_v58  ;;  %3782 = vst.msk [vmem:[%s6955_s27 + $0x20] sm:$0xff] %vm125_vm0, %v3766_v23  ;;  %v3763_v26 = vadd.f32 %v5089_v54, %v3703_v10  ;;  %v3767_v21 = vadd.f32 %v5090_v5, %v3719_v2 }
 0x8af   :  { %3781 = vst.msk [vmem:[%s6955_s27 + $0x18] sm:$0xff] %vm125_vm0, %v3765_v41  ;;  %3785 = vst.msk [vmem:[%s6955_s27 + $0x38] sm:$0xff] %vm125_vm0, %v3769_v9 }
 0x8b0   :  { %3779 = vst.msk [vmem:[%s6955_s27 + $0x8] sm:$0xff] %vm125_vm0, %v3763_v26  ;;  %3783 = vst.msk [vmem:[%s6955_s27 + $0x28] sm:$0xff] %vm125_vm0, %v3767_v21  ;;  %v4593_v30 = vpop.f32.mrb[84].mxu1 }
 0x8b1   :  { %v3740_v7 = vadd.f32 %v4593_v30, %v3590_v18  ;;  %v3731_v40 = vpop.f32.mrb[85].mxu1 }
 0x8b2   :  { %v3732_v61 = vadd.f32 %v3731_v40, %v3580_v29  ;;  %v4594_v53 = vpop.f32.mrb[86].mxu1 }
 0x8b3   :  { %v3772_v51 = vadd.f32 %v5091_v60, %v3740_v7  ;;  %v3743_v6 = vadd.f32 %v4594_v53, %v3595_v38  ;;  %v3734_v39 = vpop.f32.mrb[87].mxu1 }
 0x8b4   :  { %v3770_v27 = vadd.f32 %v5092_v14, %v3732_v61  ;;  %v3735_v32 = vadd.f32 %v3734_v39, %v3585_v44  ;;  %v5096_v44 = vld [vmem:[%s7005_s0 + $0x60] sm:$0xff] }
 0x8b5   :  { %3788 = vst.msk [vmem:[%s6955_s27 + $0x50] sm:$0xff] %vm125_vm0, %v3772_v51  ;;  %v3773_v49 = vadd.f32 %v5093_v48, %v3743_v6 }
 0x8b6   :  { %3786 = vst.msk [vmem:[%s6955_s27 + $0x40] sm:$0xff] %vm125_vm0, %v3770_v27  ;;  %v3771_v46 = vadd.f32 %v5094_v20, %v3735_v32 }
 0x8b7   :  { %3789 = vst.msk [vmem:[%s6955_s27 + $0x58] sm:$0xff] %vm125_vm0, %v3773_v49 }
 0x8b8   :  { %3787 = vst.msk [vmem:[%s6955_s27 + $0x48] sm:$0xff] %vm125_vm0, %v3771_v46  ;;  %v4597_v33 = vpop.f32.mrb[88].mxu1 }
 0x8b9   :  { %v3756_v16 = vadd.f32 %v4597_v33, %v3610_v34  ;;  %v3747_v43 = vpop.f32.mrb[89].mxu1 }
 0x8ba   :  { %v3748_v12 = vadd.f32 %v3747_v43, %v3600_v8  ;;  %v4598_v15 = vpop.f32.mrb[90].mxu1 }
 0x8bb   :  { %v3776_v56 = vadd.f32 %v5095_v4, %v3756_v16  ;;  %v3759_v45 = vadd.f32 %v4598_v15, %v3615_v3  ;;  %v3750_v29 = vpop.f32.mrb[91].mxu1 }
 0x8bc   :  { %v3774_v0 = vadd.f32 %v5096_v44, %v3748_v12  ;;  %v3751_v57 = vadd.f32 %v3750_v29, %v3605_v55 }
 0x8bd   :  { %3792 = vst.msk [vmem:[%s6955_s27 + $0x70] sm:$0xff] %vm125_vm0, %v3776_v56  ;;  %v3777_v24 = vadd.f32 %v5097_v35, %v3759_v45 }
 0x8be   :  { %3790 = vst.msk [vmem:[%s6955_s27 + $0x60] sm:$0xff] %vm125_vm0, %v3774_v0  ;;  %v3775_v42 = vadd.f32 %v5098_v47, %v3751_v57 }
 0x8bf   :  { %3793 = vst.msk [vmem:[%s6955_s27 + $0x78] sm:$0xff] %vm125_vm0, %v3777_v24 }
 0x8c0   :  { %3791 = vst.msk [vmem:[%s6955_s27 + $0x68] sm:$0xff] %vm125_vm0, %v3775_v42 }

</bundles_post_ra>
